<compile_context>
chip_gen: v7x
topology: tpu7x:2x2x1
jax: 0.10.0
libtpu: 0.0.40
codegen_flags: <defaults>
</compile_context>

<pallas_src>
import jax
import jax.numpy as jnp
from jax import lax
from jax.experimental import pallas as pl
from jax.experimental.pallas import tpu as pltpu

CHANNELS = 8
STYLE_DIM = 16
KSIZE = 3
DILATIONS = (1, 3, 5)
NUM_STAGES = len(DILATIONS)
EPS = 1e-5  # nn.InstanceNorm1d default eps

# Packed column-parameter slab layout (per row = (batch, channel)):
NUM_STYLE_COLS = 4 * NUM_STAGES   # per stage: [1+fc1b_gamma, fc1b_beta, 1+fc2b_gamma, fc2b_beta]
NUM_SNAKE_COLS = 4 * NUM_STAGES   # per stage: [alpha1, 1/alpha1, alpha2, 1/alpha2]
NUM_CBIAS_COLS = 2 * NUM_STAGES   # per stage: [conv1 bias, conv2 bias]
SNAKE_OFF = NUM_STYLE_COLS
CBIAS_OFF = NUM_STYLE_COLS + NUM_SNAKE_COLS
NUM_COLS = CBIAS_OFF + NUM_CBIAS_COLS


# ---------------------------------------------------------------------------
# Pallas kernel: full residual block (3 stages), whole batch in one grid step
# ---------------------------------------------------------------------------
def adain_resblock_kernel(x_ref, s2_ref, wq_ref, colp_ref, convw_ref,
                          o_ref, taps_ref):
    BC, T = x_ref.shape
    inv_t = 1.0 / T

    colp = colp_ref[...]                                       # (BC, NUM_COLS)

    # Fused AdaIN1D.fc for all stages / both AdaINs: ONE MXU matmul.
    # s2 is a layout expansion of the style vector s (built host-side, no
    # compute); bias + the (1+gamma) fold come from the packed column slab.
    style = jnp.dot(s2_ref[...], wq_ref[...],
                    preferred_element_type=jnp.float32) + colp[:, :NUM_STYLE_COLS]

    # Hoisted lane iota + per-offset wrap masks, reused by every tap / stage.
    lane = lax.broadcasted_iota(jnp.int32, (BC, T), 1)
    masks = {}
    for d in sorted(set(DILATIONS) | {1}):
        masks[d] = lane < (T - d)      # offset +d : zero the last d lanes
        masks[-d] = lane >= d          # offset -d : zero the first d lanes

    def col(arr, j):                   # (BC, 1) view of column j
        return arr[:, j:j + 1]

    def adain(xt, gamma1p, beta):
        # InstanceNorm1d (affine=False, biased var) then gamma1p*norm + beta.
        # One-pass stats: the two lane reductions are independent (XLU).
        s1 = jnp.sum(xt, axis=-1, keepdims=True)
        s2 = jnp.sum(xt * xt, axis=-1, keepdims=True)
        mean = s1 * inv_t
        var = jnp.maximum(s2 * inv_t - mean * mean, 0.0)
        scale = gamma1p * lax.rsqrt(var + EPS)                 # (BC, 1)
        shift = beta - scale * mean                            # (BC, 1)
        return scale * xt + shift

    def snake(xt, alpha, inv_alpha):
        # x + (1/alpha) * sin(alpha*x)^2   (1/alpha comes pre-folded in colp)
        sn = jnp.sin(alpha * xt)
        return xt + inv_alpha * (sn * sn)

    def shift_time(xt, off, mask):
        # z[:, t] = x[:, t + off] with zero fill; off is a static non-zero int.
        rolled = pltpu.roll(xt, (-off) % T, axis=1)            # XLU lane rotation
        return jnp.where(mask, rolled, 0.0)

    def conv(xt, widx, bias, dil):
        # Stage the 3 shifted taps in a reused VMEM scratch, then ONE
        # block-diagonal (BC, 3*BC) @ (3*BC, T) MXU matmul covers all batches.
        taps_ref[0:BC, :] = shift_time(xt, -dil, masks[-dil])  # tap k=0: -d
        taps_ref[BC:2 * BC, :] = xt                            # tap k=1:  0
        taps_ref[2 * BC:3 * BC, :] = shift_time(xt, dil, masks[dil])  # k=2: +d
        return jnp.dot(convw_ref[widx], taps_ref[...],
                       preferred_element_type=jnp.float32) + bias

    x = x_ref[...]                                             # (BC, T)
    for st in range(NUM_STAGES):
        dil = DILATIONS[st]
        g1p, be1 = col(style, 4 * st + 0), col(style, 4 * st + 1)
        g2p, be2 = col(style, 4 * st + 2), col(style, 4 * st + 3)
        a1 = col(colp, SNAKE_OFF + 4 * st + 0)
        ia1 = col(colp, SNAKE_OFF + 4 * st + 1)
        a2 = col(colp, SNAKE_OFF + 4 * st + 2)
        ia2 = col(colp, SNAKE_OFF + 4 * st + 3)
        cb1 = col(colp, CBIAS_OFF + 2 * st + 0)
        cb2 = col(colp, CBIAS_OFF + 2 * st + 1)

        xt = adain(x, g1p, be1)              # AdaIN1 (fc fused above)
        xt = snake(xt, a1, ia1)              # snake (alpha1)
        xt = conv(xt, 2 * st + 0, cb1, dil)  # dilated conv1
        xt = adain(xt, g2p, be2)             # AdaIN2
        xt = snake(xt, a2, ia2)              # snake (alpha2)
        xt = conv(xt, 2 * st + 1, cb2, 1)    # conv2 (dilation 1)
        x = xt + x                           # residual
    o_ref[...] = x


def adain_resblock(x_flat, s2, wq, colp, convw):
    BC, T = x_flat.shape
    assert T % 128 == 0, "T must be a multiple of 128 (lane-dense layout)"

    def full_spec(shape):
        zeros = (0,) * len(shape)
        return pl.BlockSpec(shape, lambda i: zeros)

    return pl.pallas_call(
        adain_resblock_kernel,
        out_shape=jax.ShapeDtypeStruct((BC, T), jnp.float32),
        grid=(1,),  # whole (tiny) batch in one step; see v7x TODO at top
        in_specs=[
            full_spec(x_flat.shape),
            full_spec(s2.shape),
            full_spec(wq.shape),
            full_spec(colp.shape),
            full_spec(convw.shape),
        ],
        out_specs=full_spec((BC, T)),
        scratch_shapes=[pltpu.VMEM((KSIZE * BC, T), jnp.float32)],  # tap slab
        compiler_params=pltpu.CompilerParams(
            dimension_semantics=("arbitrary",),
            vmem_limit_bytes=32 * 1024 * 1024,
        ),
    )(x_flat, s2, wq, colp, convw)


# ---------------------------------------------------------------------------
# Host-side packing glue (pure layout / parameter reshuffling, no module math
# except the weight_norm reparametrization which lives in init_params)
# ---------------------------------------------------------------------------
def pack_inputs(x, s, p):
    B, C, T = x.shape
    S, D = NUM_STAGES, STYLE_DIM

    x_flat = x.reshape(B * C, T)

    # Style layout expansion: s2[(b,c), (c',d)] = s[b,d] * (c == c').
    s2 = jnp.einsum("bd,ck->bckd", s,
                    jnp.eye(C, dtype=s.dtype)).reshape(B * C, C * D)

    # Stacked fc weights: wq[(c',d), j], j ordered per stage [g1, b1, g2, b2].
    parts = []
    for st in range(S):
        parts += [p["fc1w"][st, :C], p["fc1w"][st, C:],
                  p["fc2w"][st, :C], p["fc2w"][st, C:]]        # each (C, D)
    wq = jnp.stack(parts, axis=-1).reshape(C * D, NUM_STYLE_COLS)

    # Packed per-row column parameters (tiled over batch).
    def tile_b(v):                                             # (C,) -> (B*C,)
        return jnp.tile(v, (B,))

    cols = []
    for st in range(S):
        cols += [tile_b(1.0 + p["fc1b"][st, :C]), tile_b(p["fc1b"][st, C:]),
                 tile_b(1.0 + p["fc2b"][st, :C]), tile_b(p["fc2b"][st, C:])]
    for st in range(S):
        cols += [tile_b(p["alpha1"][st]), tile_b(1.0 / p["alpha1"][st]),
                 tile_b(p["alpha2"][st]), tile_b(1.0 / p["alpha2"][st])]
    for st in range(S):
        cols += [tile_b(p["b1"][st]), tile_b(p["b2"][st])]
    colp = jnp.stack(cols, axis=-1)                            # (B*C, NUM_COLS)

    # Block-diagonal fused-tap conv weights: column block (k, b', ci) matches
    # the in-kernel tap slab ordering; block-diag over batch so one matmul
    # handles all batches.  TODO(synk): cast to bf16 here for production T.
    eye_b = jnp.eye(B, dtype=jnp.float32)

    def blockdiag(w):                                          # (Co, Ci, K)
        wk = jnp.transpose(w, (2, 0, 1))                       # (K, Co, Ci)
        bd = jnp.einsum("koi,bc->bokci", wk, eye_b)            # (B,Co,K,B,Ci)
        return bd.reshape(B * C, KSIZE * B * C)

    convw = jnp.stack([blockdiag(p["w1"][st]) if j == 0 else blockdiag(p["w2"][st])
                       for st in range(S) for j in range(2)])  # (2S, BC, 3BC)

    return x_flat, s2, wq, colp, convw


# ---------------------------------------------------------------------------
# Deterministic synthetic parameters (shapes from the module's __init__)
# ---------------------------------------------------------------------------
def init_params(key):
    ks = iter(jax.random.split(key, 64))

    def weight_norm_conv():
        # weight_norm(Conv1d): w = g * v / ||v||, norm over (in, k) per out-ch
        v = 0.1 * jax.random.normal(next(ks), (CHANNELS, CHANNELS, KSIZE), jnp.float32)
        g = 1.0 + 0.05 * jax.random.normal(next(ks), (CHANNELS,), jnp.float32)
        vn = jnp.sqrt(jnp.sum(v * v, axis=(1, 2), keepdims=True))
        w = g[:, None, None] * v / vn
        b = 0.01 * jax.random.normal(next(ks), (CHANNELS,), jnp.float32)
        return w, b

    def linear():
        lim = 1.0 / (STYLE_DIM ** 0.5)
        w = jax.random.uniform(next(ks), (2 * CHANNELS, STYLE_DIM), jnp.float32, -lim, lim)
        b = jax.random.uniform(next(ks), (2 * CHANNELS,), jnp.float32, -lim, lim)
        return w, b

    p = dict(w1=[], b1=[], w2=[], b2=[], fc1w=[], fc1b=[], fc2w=[], fc2b=[])
    for _ in range(NUM_STAGES):
        w, b = weight_norm_conv(); p["w1"].append(w); p["b1"].append(b)
        w, b = weight_norm_conv(); p["w2"].append(w); p["b2"].append(b)
        w, b = linear(); p["fc1w"].append(w); p["fc1b"].append(b)
        w, b = linear(); p["fc2w"].append(w); p["fc2b"].append(b)
    p = {k: jnp.stack(v) for k, v in p.items()}
    p["alpha1"] = jnp.ones((NUM_STAGES, CHANNELS), jnp.float32)  # torch.ones init
    p["alpha2"] = jnp.ones((NUM_STAGES, CHANNELS), jnp.float32)
    return p


# ---------------------------------------------------------------------------
# Pure-JAX reference (independent path via lax.conv_general_dilated)
# ---------------------------------------------------------------------------
def ref_forward(x, s, p):
    B, C, T = x.shape

    def adain_ref(xt, gamma, beta):
        mean = jnp.mean(xt, axis=-1, keepdims=True)
        var = jnp.mean((xt - mean) ** 2, axis=-1, keepdims=True)
        norm = (xt - mean) / jnp.sqrt(var + EPS)
        return (1.0 + gamma[:, :, None]) * norm + beta[:, :, None]

    for st in range(NUM_STAGES):
        d = DILATIONS[st]
        h1 = s @ p["fc1w"][st].T + p["fc1b"][st]
        h2 = s @ p["fc2w"][st].T + p["fc2b"][st]
        a1 = p["alpha1"][st][None, :, None]
        a2 = p["alpha2"][st][None, :, None]
        xt = adain_ref(x, h1[:, :C], h1[:, C:])
        xt = xt + (1.0 / a1) * jnp.sin(a1 * xt) ** 2
        xt = lax.conv_general_dilated(xt, p["w1"][st], (1,), [(d, d)],
                                      rhs_dilation=(d,),
                                      dimension_numbers=("NCH", "OIH", "NCH"))
        xt = xt + p["b1"][st][None, :, None]
        xt = adain_ref(xt, h2[:, :C], h2[:, C:])
        xt = xt + (1.0 / a2) * jnp.sin(a2 * xt) ** 2
        xt = lax.conv_general_dilated(xt, p["w2"][st], (1,), [(1, 1)],
                                      rhs_dilation=(1,),
                                      dimension_numbers=("NCH", "OIH", "NCH"))
        xt = xt + p["b2"][st][None, :, None]
        x = xt + x
    return x


if __name__ == "__main__":
    B, C, T = 2, CHANNELS, 128   # T multiple of 128 -> lane-dense slabs
    key = jax.random.PRNGKey(0)
    k_x, k_s, k_p = jax.random.split(key, 3)
    x = jax.random.normal(k_x, (B, C, T), jnp.float32)
    s = jax.random.normal(k_s, (B, STYLE_DIM), jnp.float32)
    params = init_params(k_p)

    kernel_inputs = pack_inputs(x, s, params)
    out_flat = adain_resblock(*kernel_inputs)
    out_flat = jax.block_until_ready(out_flat)
    out = out_flat.reshape(B, C, T)

    ref = ref_forward(x, s, params)
    err = float(jnp.max(jnp.abs(out - ref)))
    # Tolerance allows for TPU matmul/conv pass differences between the fused
    # in-kernel MXU dots (style fc + block-diag convs) and the XLA reference;
    # real bugs are O(1) errors.
    assert jnp.allclose(out, ref, rtol=1e-3, atol=2e-3), f"max abs err {err}"
    print("KERNEL_OK")
</pallas_src>

<mosaic_0001>
module attributes {stable_mosaic.version = 11 : i64} {
  func.func @adain_resblock_kernel(%arg0: i32, %arg1: memref<16x128xf32, #tpu.memory_space<vmem>>, %arg2: memref<16x128xf32, #tpu.memory_space<vmem>>, %arg3: memref<128x12xf32, #tpu.memory_space<vmem>>, %arg4: memref<16x30xf32, #tpu.memory_space<vmem>>, %arg5: memref<6x16x48xf32, #tpu.memory_space<vmem>>, %arg6: memref<16x128xf32, #tpu.memory_space<vmem>>, %arg7: memref<48x128xf32, #tpu.memory_space<vmem>>) attributes {dimension_semantics = [#tpu.dimension_semantics<arbitrary>], iteration_bounds = array<i64: 1>, scalar_prefetch = 0 : i64, scratch_operands = 1 : i64, tpu.core_type = #tpu.core_type<tc>, window_params = [{pipeline_mode = #tpu.pipeline_mode<synchronous>, transform_indices = @transform_0, window_bounds = array<i64: 16, 128>}, {pipeline_mode = #tpu.pipeline_mode<synchronous>, transform_indices = @transform_1, window_bounds = array<i64: 16, 128>}, {pipeline_mode = #tpu.pipeline_mode<synchronous>, transform_indices = @transform_2, window_bounds = array<i64: 128, 12>}, {pipeline_mode = #tpu.pipeline_mode<synchronous>, transform_indices = @transform_3, window_bounds = array<i64: 16, 30>}, {pipeline_mode = #tpu.pipeline_mode<synchronous>, transform_indices = @transform_4, window_bounds = array<i64: 6, 16, 48>}, {pipeline_mode = #tpu.pipeline_mode<synchronous>, transform_indices = @transform_5, window_bounds = array<i64: 16, 128>}]} {
    %c0 = arith.constant 0 : index
    %c0_0 = arith.constant 0 : index
    %0 = vector.load %arg4[%c0, %c0_0] : memref<16x30xf32, #tpu.memory_space<vmem>>, vector<16x30xf32>
    %c0_1 = arith.constant 0 : index
    %c0_2 = arith.constant 0 : index
    %1 = vector.load %arg2[%c0_1, %c0_2] : memref<16x128xf32, #tpu.memory_space<vmem>>, vector<16x128xf32>
    %c0_3 = arith.constant 0 : index
    %c0_4 = arith.constant 0 : index
    %2 = vector.load %arg3[%c0_3, %c0_4] : memref<128x12xf32, #tpu.memory_space<vmem>>, vector<128x12xf32>
    %cst = arith.constant dense<0.000000e+00> : vector<16x12xf32>
    %3 = tpu.matmul %1, %2, %cst {dimension_numbers = #tpu.dot_dimension_numbers<[1], [0], [0], [1], [0, 0, 1, 1], [], []>} : vector<16x128xf32>, vector<128x12xf32>, vector<16x12xf32> -> vector<16x12xf32>
    %4 = vector.extract_strided_slice %0 {offsets = [0, 0], sizes = [16, 12], strides = [1, 1]} : vector<16x30xf32> to vector<16x12xf32>
    %5 = arith.addf %3, %4 : vector<16x12xf32>
    %6 = tpu.iota {dimensions = array<i32: 1>} : vector<16x128xi32>
    %c127_i32 = arith.constant 127 : i32
    %7 = vector.broadcast %c127_i32 : i32 to vector<16x128xi32>
    %8 = arith.cmpi slt, %6, %7 : vector<16x128xi32>
    %c1_i32 = arith.constant 1 : i32
    %9 = vector.broadcast %c1_i32 : i32 to vector<16x128xi32>
    %10 = arith.cmpi sge, %6, %9 : vector<16x128xi32>
    %c125_i32 = arith.constant 125 : i32
    %11 = vector.broadcast %c125_i32 : i32 to vector<16x128xi32>
    %12 = arith.cmpi slt, %6, %11 : vector<16x128xi32>
    %c3_i32 = arith.constant 3 : i32
    %13 = vector.broadcast %c3_i32 : i32 to vector<16x128xi32>
    %14 = arith.cmpi sge, %6, %13 : vector<16x128xi32>
    %c123_i32 = arith.constant 123 : i32
    %15 = vector.broadcast %c123_i32 : i32 to vector<16x128xi32>
    %16 = arith.cmpi slt, %6, %15 : vector<16x128xi32>
    %c5_i32 = arith.constant 5 : i32
    %17 = vector.broadcast %c5_i32 : i32 to vector<16x128xi32>
    %18 = arith.cmpi sge, %6, %17 : vector<16x128xi32>
    %c0_5 = arith.constant 0 : index
    %c0_6 = arith.constant 0 : index
    %19 = vector.load %arg1[%c0_5, %c0_6] : memref<16x128xf32, #tpu.memory_space<vmem>>, vector<16x128xf32>
    %20 = vector.extract_strided_slice %5 {offsets = [0, 0], sizes = [16, 1], strides = [1, 1]} : vector<16x12xf32> to vector<16x1xf32>
    %21 = vector.extract_strided_slice %5 {offsets = [0, 1], sizes = [16, 1], strides = [1, 1]} : vector<16x12xf32> to vector<16x1xf32>
    %22 = vector.extract_strided_slice %5 {offsets = [0, 2], sizes = [16, 1], strides = [1, 1]} : vector<16x12xf32> to vector<16x1xf32>
    %23 = vector.extract_strided_slice %5 {offsets = [0, 3], sizes = [16, 1], strides = [1, 1]} : vector<16x12xf32> to vector<16x1xf32>
    %24 = vector.extract_strided_slice %0 {offsets = [0, 12], sizes = [16, 1], strides = [1, 1]} : vector<16x30xf32> to vector<16x1xf32>
    %25 = vector.extract_strided_slice %0 {offsets = [0, 13], sizes = [16, 1], strides = [1, 1]} : vector<16x30xf32> to vector<16x1xf32>
    %26 = vector.extract_strided_slice %0 {offsets = [0, 14], sizes = [16, 1], strides = [1, 1]} : vector<16x30xf32> to vector<16x1xf32>
    %27 = vector.extract_strided_slice %0 {offsets = [0, 15], sizes = [16, 1], strides = [1, 1]} : vector<16x30xf32> to vector<16x1xf32>
    %28 = vector.extract_strided_slice %0 {offsets = [0, 24], sizes = [16, 1], strides = [1, 1]} : vector<16x30xf32> to vector<16x1xf32>
    %29 = vector.extract_strided_slice %0 {offsets = [0, 25], sizes = [16, 1], strides = [1, 1]} : vector<16x30xf32> to vector<16x1xf32>
    %cst_7 = arith.constant dense<0.000000e+00> : vector<16xf32>
    %30 = vector.multi_reduction <add>, %19, %cst_7 [1] : vector<16x128xf32> to vector<16xf32>
    %31 = vector.shape_cast %30 : vector<16xf32> to vector<16x1xf32>
    %32 = arith.mulf %19, %19 : vector<16x128xf32>
    %cst_8 = arith.constant dense<0.000000e+00> : vector<16xf32>
    %33 = vector.multi_reduction <add>, %32, %cst_8 [1] : vector<16x128xf32> to vector<16xf32>
    %34 = vector.shape_cast %33 : vector<16xf32> to vector<16x1xf32>
    %cst_9 = arith.constant 7.812500e-03 : f32
    %35 = vector.broadcast %cst_9 : f32 to vector<16x1xf32>
    %36 = arith.mulf %31, %35 : vector<16x1xf32>
    %cst_10 = arith.constant 7.812500e-03 : f32
    %37 = vector.broadcast %cst_10 : f32 to vector<16x1xf32>
    %38 = arith.mulf %34, %37 : vector<16x1xf32>
    %39 = arith.mulf %36, %36 : vector<16x1xf32>
    %40 = arith.subf %38, %39 : vector<16x1xf32>
    %cst_11 = arith.constant 0.000000e+00 : f32
    %41 = vector.broadcast %cst_11 : f32 to vector<16x1xf32>
    %42 = arith.maximumf %40, %41 : vector<16x1xf32>
    %cst_12 = arith.constant 9.99999974E-6 : f32
    %43 = vector.broadcast %cst_12 : f32 to vector<16x1xf32>
    %44 = arith.addf %42, %43 : vector<16x1xf32>
    %45 = math.rsqrt %44 : vector<16x1xf32>
    %46 = arith.mulf %20, %45 : vector<16x1xf32>
    %47 = arith.mulf %46, %36 : vector<16x1xf32>
    %48 = arith.subf %21, %47 : vector<16x1xf32>
    %49 = vector.broadcast %46 : vector<16x1xf32> to vector<16x128xf32>
    %50 = arith.mulf %49, %19 : vector<16x128xf32>
    %51 = vector.broadcast %48 : vector<16x1xf32> to vector<16x128xf32>
    %52 = arith.addf %50, %51 : vector<16x128xf32>
    %53 = vector.broadcast %24 : vector<16x1xf32> to vector<16x128xf32>
    %54 = arith.mulf %53, %52 : vector<16x128xf32>
    %55 = math.sin %54 : vector<16x128xf32>
    %56 = arith.mulf %55, %55 : vector<16x128xf32>
    %57 = vector.broadcast %25 : vector<16x1xf32> to vector<16x128xf32>
    %58 = arith.mulf %57, %56 : vector<16x128xf32>
    %59 = arith.addf %52, %58 : vector<16x128xf32>
    %c1_i32_13 = arith.constant 1 : i32
    %60 = tpu.dynamic_rotate %59 by %c1_i32_13 dim 1 : vector<16x128xf32>, i32 -> vector<16x128xf32>
    %cst_14 = arith.constant 0.000000e+00 : f32
    %61 = vector.broadcast %cst_14 : f32 to vector<16x128xf32>
    %62 = arith.select %10, %60, %61 : vector<16x128xi1>, vector<16x128xf32>
    %c0_15 = arith.constant 0 : index
    %c0_16 = arith.constant 0 : index
    %63 = vector.load %arg7[%c0_15, %c0_16] : memref<48x128xf32, #tpu.memory_space<vmem>>, vector<16x128xf32>
    tpu.vector_store %arg7[%c0_15, %c0_16], %62 {strides = array<i32>} : memref<48x128xf32, #tpu.memory_space<vmem>>, vector<16x128xf32>,
    %c16 = arith.constant 16 : index
    %c0_17 = arith.constant 0 : index
    %64 = vector.load %arg7[%c16, %c0_17] : memref<48x128xf32, #tpu.memory_space<vmem>>, vector<16x128xf32>
    tpu.vector_store %arg7[%c16, %c0_17], %59 {strides = array<i32>} : memref<48x128xf32, #tpu.memory_space<vmem>>, vector<16x128xf32>,
    %c127_i32_18 = arith.constant 127 : i32
    %65 = tpu.dynamic_rotate %59 by %c127_i32_18 dim 1 : vector<16x128xf32>, i32 -> vector<16x128xf32>
    %cst_19 = arith.constant 0.000000e+00 : f32
    %66 = vector.broadcast %cst_19 : f32 to vector<16x128xf32>
    %67 = arith.select %8, %65, %66 : vector<16x128xi1>, vector<16x128xf32>
    %c32 = arith.constant 32 : index
    %c0_20 = arith.constant 0 : index
    %68 = vector.load %arg7[%c32, %c0_20] : memref<48x128xf32, #tpu.memory_space<vmem>>, vector<16x128xf32>
    tpu.vector_store %arg7[%c32, %c0_20], %67 {strides = array<i32>} : memref<48x128xf32, #tpu.memory_space<vmem>>, vector<16x128xf32>,
    %c0_21 = arith.constant 0 : index
    %c0_22 = arith.constant 0 : index
    %c0_23 = arith.constant 0 : index
    %69 = vector.load %arg5[%c0_21, %c0_22, %c0_23] : memref<6x16x48xf32, #tpu.memory_space<vmem>>, vector<1x16x48xf32>
    %70 = vector.shape_cast %69 : vector<1x16x48xf32> to vector<16x48xf32>
    %c0_24 = arith.constant 0 : index
    %c0_25 = arith.constant 0 : index
    %71 = vector.load %arg7[%c0_24, %c0_25] : memref<48x128xf32, #tpu.memory_space<vmem>>, vector<48x128xf32>
    %cst_26 = arith.constant dense<0.000000e+00> : vector<16x128xf32>
    %72 = tpu.matmul %70, %71, %cst_26 {dimension_numbers = #tpu.dot_dimension_numbers<[1], [0], [0], [1], [0, 0, 1, 1], [], []>} : vector<16x48xf32>, vector<48x128xf32>, vector<16x128xf32> -> vector<16x128xf32>
    %73 = vector.broadcast %28 : vector<16x1xf32> to vector<16x128xf32>
    %74 = arith.addf %72, %73 : vector<16x128xf32>
    %cst_27 = arith.constant dense<0.000000e+00> : vector<16xf32>
    %75 = vector.multi_reduction <add>, %74, %cst_27 [1] : vector<16x128xf32> to vector<16xf32>
    %76 = vector.shape_cast %75 : vector<16xf32> to vector<16x1xf32>
    %77 = arith.mulf %74, %74 : vector<16x128xf32>
    %cst_28 = arith.constant dense<0.000000e+00> : vector<16xf32>
    %78 = vector.multi_reduction <add>, %77, %cst_28 [1] : vector<16x128xf32> to vector<16xf32>
    %79 = vector.shape_cast %78 : vector<16xf32> to vector<16x1xf32>
    %cst_29 = arith.constant 7.812500e-03 : f32
    %80 = vector.broadcast %cst_29 : f32 to vector<16x1xf32>
    %81 = arith.mulf %76, %80 : vector<16x1xf32>
    %cst_30 = arith.constant 7.812500e-03 : f32
    %82 = vector.broadcast %cst_30 : f32 to vector<16x1xf32>
    %83 = arith.mulf %79, %82 : vector<16x1xf32>
    %84 = arith.mulf %81, %81 : vector<16x1xf32>
    %85 = arith.subf %83, %84 : vector<16x1xf32>
    %cst_31 = arith.constant 0.000000e+00 : f32
    %86 = vector.broadcast %cst_31 : f32 to vector<16x1xf32>
    %87 = arith.maximumf %85, %86 : vector<16x1xf32>
    %cst_32 = arith.constant 9.99999974E-6 : f32
    %88 = vector.broadcast %cst_32 : f32 to vector<16x1xf32>
    %89 = arith.addf %87, %88 : vector<16x1xf32>
    %90 = math.rsqrt %89 : vector<16x1xf32>
    %91 = arith.mulf %22, %90 : vector<16x1xf32>
    %92 = arith.mulf %91, %81 : vector<16x1xf32>
    %93 = arith.subf %23, %92 : vector<16x1xf32>
    %94 = vector.broadcast %91 : vector<16x1xf32> to vector<16x128xf32>
    %95 = arith.mulf %94, %74 : vector<16x128xf32>
    %96 = vector.broadcast %93 : vector<16x1xf32> to vector<16x128xf32>
    %97 = arith.addf %95, %96 : vector<16x128xf32>
    %98 = vector.broadcast %26 : vector<16x1xf32> to vector<16x128xf32>
    %99 = arith.mulf %98, %97 : vector<16x128xf32>
    %100 = math.sin %99 : vector<16x128xf32>
    %101 = arith.mulf %100, %100 : vector<16x128xf32>
    %102 = vector.broadcast %27 : vector<16x1xf32> to vector<16x128xf32>
    %103 = arith.mulf %102, %101 : vector<16x128xf32>
    %104 = arith.addf %97, %103 : vector<16x128xf32>
    %c1_i32_33 = arith.constant 1 : i32
    %105 = tpu.dynamic_rotate %104 by %c1_i32_33 dim 1 : vector<16x128xf32>, i32 -> vector<16x128xf32>
    %cst_34 = arith.constant 0.000000e+00 : f32
    %106 = vector.broadcast %cst_34 : f32 to vector<16x128xf32>
    %107 = arith.select %10, %105, %106 : vector<16x128xi1>, vector<16x128xf32>
    %c0_35 = arith.constant 0 : index
    %c0_36 = arith.constant 0 : index
    %108 = vector.load %arg7[%c0_35, %c0_36] : memref<48x128xf32, #tpu.memory_space<vmem>>, vector<16x128xf32>
    tpu.vector_store %arg7[%c0_35, %c0_36], %107 {strides = array<i32>} : memref<48x128xf32, #tpu.memory_space<vmem>>, vector<16x128xf32>,
    %c16_37 = arith.constant 16 : index
    %c0_38 = arith.constant 0 : index
    %109 = vector.load %arg7[%c16_37, %c0_38] : memref<48x128xf32, #tpu.memory_space<vmem>>, vector<16x128xf32>
    tpu.vector_store %arg7[%c16_37, %c0_38], %104 {strides = array<i32>} : memref<48x128xf32, #tpu.memory_space<vmem>>, vector<16x128xf32>,
    %c127_i32_39 = arith.constant 127 : i32
    %110 = tpu.dynamic_rotate %104 by %c127_i32_39 dim 1 : vector<16x128xf32>, i32 -> vector<16x128xf32>
    %cst_40 = arith.constant 0.000000e+00 : f32
    %111 = vector.broadcast %cst_40 : f32 to vector<16x128xf32>
    %112 = arith.select %8, %110, %111 : vector<16x128xi1>, vector<16x128xf32>
    %c32_41 = arith.constant 32 : index
    %c0_42 = arith.constant 0 : index
    %113 = vector.load %arg7[%c32_41, %c0_42] : memref<48x128xf32, #tpu.memory_space<vmem>>, vector<16x128xf32>
    tpu.vector_store %arg7[%c32_41, %c0_42], %112 {strides = array<i32>} : memref<48x128xf32, #tpu.memory_space<vmem>>, vector<16x128xf32>,
    %c1 = arith.constant 1 : index
    %c0_43 = arith.constant 0 : index
    %c0_44 = arith.constant 0 : index
    %114 = vector.load %arg5[%c1, %c0_43, %c0_44] : memref<6x16x48xf32, #tpu.memory_space<vmem>>, vector<1x16x48xf32>
    %115 = vector.shape_cast %114 : vector<1x16x48xf32> to vector<16x48xf32>
    %c0_45 = arith.constant 0 : index
    %c0_46 = arith.constant 0 : index
    %116 = vector.load %arg7[%c0_45, %c0_46] : memref<48x128xf32, #tpu.memory_space<vmem>>, vector<48x128xf32>
    %cst_47 = arith.constant dense<0.000000e+00> : vector<16x128xf32>
    %117 = tpu.matmul %115, %116, %cst_47 {dimension_numbers = #tpu.dot_dimension_numbers<[1], [0], [0], [1], [0, 0, 1, 1], [], []>} : vector<16x48xf32>, vector<48x128xf32>, vector<16x128xf32> -> vector<16x128xf32>
    %118 = vector.broadcast %29 : vector<16x1xf32> to vector<16x128xf32>
    %119 = arith.addf %117, %118 : vector<16x128xf32>
    %120 = arith.addf %119, %19 : vector<16x128xf32>
    %121 = vector.extract_strided_slice %5 {offsets = [0, 4], sizes = [16, 1], strides = [1, 1]} : vector<16x12xf32> to vector<16x1xf32>
    %122 = vector.extract_strided_slice %5 {offsets = [0, 5], sizes = [16, 1], strides = [1, 1]} : vector<16x12xf32> to vector<16x1xf32>
    %123 = vector.extract_strided_slice %5 {offsets = [0, 6], sizes = [16, 1], strides = [1, 1]} : vector<16x12xf32> to vector<16x1xf32>
    %124 = vector.extract_strided_slice %5 {offsets = [0, 7], sizes = [16, 1], strides = [1, 1]} : vector<16x12xf32> to vector<16x1xf32>
    %125 = vector.extract_strided_slice %0 {offsets = [0, 16], sizes = [16, 1], strides = [1, 1]} : vector<16x30xf32> to vector<16x1xf32>
    %126 = vector.extract_strided_slice %0 {offsets = [0, 17], sizes = [16, 1], strides = [1, 1]} : vector<16x30xf32> to vector<16x1xf32>
    %127 = vector.extract_strided_slice %0 {offsets = [0, 18], sizes = [16, 1], strides = [1, 1]} : vector<16x30xf32> to vector<16x1xf32>
    %128 = vector.extract_strided_slice %0 {offsets = [0, 19], sizes = [16, 1], strides = [1, 1]} : vector<16x30xf32> to vector<16x1xf32>
    %129 = vector.extract_strided_slice %0 {offsets = [0, 26], sizes = [16, 1], strides = [1, 1]} : vector<16x30xf32> to vector<16x1xf32>
    %130 = vector.extract_strided_slice %0 {offsets = [0, 27], sizes = [16, 1], strides = [1, 1]} : vector<16x30xf32> to vector<16x1xf32>
    %cst_48 = arith.constant dense<0.000000e+00> : vector<16xf32>
    %131 = vector.multi_reduction <add>, %120, %cst_48 [1] : vector<16x128xf32> to vector<16xf32>
    %132 = vector.shape_cast %131 : vector<16xf32> to vector<16x1xf32>
    %133 = arith.mulf %120, %120 : vector<16x128xf32>
    %cst_49 = arith.constant dense<0.000000e+00> : vector<16xf32>
    %134 = vector.multi_reduction <add>, %133, %cst_49 [1] : vector<16x128xf32> to vector<16xf32>
    %135 = vector.shape_cast %134 : vector<16xf32> to vector<16x1xf32>
    %cst_50 = arith.constant 7.812500e-03 : f32
    %136 = vector.broadcast %cst_50 : f32 to vector<16x1xf32>
    %137 = arith.mulf %132, %136 : vector<16x1xf32>
    %cst_51 = arith.constant 7.812500e-03 : f32
    %138 = vector.broadcast %cst_51 : f32 to vector<16x1xf32>
    %139 = arith.mulf %135, %138 : vector<16x1xf32>
    %140 = arith.mulf %137, %137 : vector<16x1xf32>
    %141 = arith.subf %139, %140 : vector<16x1xf32>
    %cst_52 = arith.constant 0.000000e+00 : f32
    %142 = vector.broadcast %cst_52 : f32 to vector<16x1xf32>
    %143 = arith.maximumf %141, %142 : vector<16x1xf32>
    %cst_53 = arith.constant 9.99999974E-6 : f32
    %144 = vector.broadcast %cst_53 : f32 to vector<16x1xf32>
    %145 = arith.addf %143, %144 : vector<16x1xf32>
    %146 = math.rsqrt %145 : vector<16x1xf32>
    %147 = arith.mulf %121, %146 : vector<16x1xf32>
    %148 = arith.mulf %147, %137 : vector<16x1xf32>
    %149 = arith.subf %122, %148 : vector<16x1xf32>
    %150 = vector.broadcast %147 : vector<16x1xf32> to vector<16x128xf32>
    %151 = arith.mulf %150, %120 : vector<16x128xf32>
    %152 = vector.broadcast %149 : vector<16x1xf32> to vector<16x128xf32>
    %153 = arith.addf %151, %152 : vector<16x128xf32>
    %154 = vector.broadcast %125 : vector<16x1xf32> to vector<16x128xf32>
    %155 = arith.mulf %154, %153 : vector<16x128xf32>
    %156 = math.sin %155 : vector<16x128xf32>
    %157 = arith.mulf %156, %156 : vector<16x128xf32>
    %158 = vector.broadcast %126 : vector<16x1xf32> to vector<16x128xf32>
    %159 = arith.mulf %158, %157 : vector<16x128xf32>
    %160 = arith.addf %153, %159 : vector<16x128xf32>
    %c3_i32_54 = arith.constant 3 : i32
    %161 = tpu.dynamic_rotate %160 by %c3_i32_54 dim 1 : vector<16x128xf32>, i32 -> vector<16x128xf32>
    %cst_55 = arith.constant 0.000000e+00 : f32
    %162 = vector.broadcast %cst_55 : f32 to vector<16x128xf32>
    %163 = arith.select %14, %161, %162 : vector<16x128xi1>, vector<16x128xf32>
    %c0_56 = arith.constant 0 : index
    %c0_57 = arith.constant 0 : index
    %164 = vector.load %arg7[%c0_56, %c0_57] : memref<48x128xf32, #tpu.memory_space<vmem>>, vector<16x128xf32>
    tpu.vector_store %arg7[%c0_56, %c0_57], %163 {strides = array<i32>} : memref<48x128xf32, #tpu.memory_space<vmem>>, vector<16x128xf32>,
    %c16_58 = arith.constant 16 : index
    %c0_59 = arith.constant 0 : index
    %165 = vector.load %arg7[%c16_58, %c0_59] : memref<48x128xf32, #tpu.memory_space<vmem>>, vector<16x128xf32>
    tpu.vector_store %arg7[%c16_58, %c0_59], %160 {strides = array<i32>} : memref<48x128xf32, #tpu.memory_space<vmem>>, vector<16x128xf32>,
    %c125_i32_60 = arith.constant 125 : i32
    %166 = tpu.dynamic_rotate %160 by %c125_i32_60 dim 1 : vector<16x128xf32>, i32 -> vector<16x128xf32>
    %cst_61 = arith.constant 0.000000e+00 : f32
    %167 = vector.broadcast %cst_61 : f32 to vector<16x128xf32>
    %168 = arith.select %12, %166, %167 : vector<16x128xi1>, vector<16x128xf32>
    %c32_62 = arith.constant 32 : index
    %c0_63 = arith.constant 0 : index
    %169 = vector.load %arg7[%c32_62, %c0_63] : memref<48x128xf32, #tpu.memory_space<vmem>>, vector<16x128xf32>
    tpu.vector_store %arg7[%c32_62, %c0_63], %168 {strides = array<i32>} : memref<48x128xf32, #tpu.memory_space<vmem>>, vector<16x128xf32>,
    %c2 = arith.constant 2 : index
    %c0_64 = arith.constant 0 : index
    %c0_65 = arith.constant 0 : index
    %170 = vector.load %arg5[%c2, %c0_64, %c0_65] : memref<6x16x48xf32, #tpu.memory_space<vmem>>, vector<1x16x48xf32>
    %171 = vector.shape_cast %170 : vector<1x16x48xf32> to vector<16x48xf32>
    %c0_66 = arith.constant 0 : index
    %c0_67 = arith.constant 0 : index
    %172 = vector.load %arg7[%c0_66, %c0_67] : memref<48x128xf32, #tpu.memory_space<vmem>>, vector<48x128xf32>
    %cst_68 = arith.constant dense<0.000000e+00> : vector<16x128xf32>
    %173 = tpu.matmul %171, %172, %cst_68 {dimension_numbers = #tpu.dot_dimension_numbers<[1], [0], [0], [1], [0, 0, 1, 1], [], []>} : vector<16x48xf32>, vector<48x128xf32>, vector<16x128xf32> -> vector<16x128xf32>
    %174 = vector.broadcast %129 : vector<16x1xf32> to vector<16x128xf32>
    %175 = arith.addf %173, %174 : vector<16x128xf32>
    %cst_69 = arith.constant dense<0.000000e+00> : vector<16xf32>
    %176 = vector.multi_reduction <add>, %175, %cst_69 [1] : vector<16x128xf32> to vector<16xf32>
    %177 = vector.shape_cast %176 : vector<16xf32> to vector<16x1xf32>
    %178 = arith.mulf %175, %175 : vector<16x128xf32>
    %cst_70 = arith.constant dense<0.000000e+00> : vector<16xf32>
    %179 = vector.multi_reduction <add>, %178, %cst_70 [1] : vector<16x128xf32> to vector<16xf32>
    %180 = vector.shape_cast %179 : vector<16xf32> to vector<16x1xf32>
    %cst_71 = arith.constant 7.812500e-03 : f32
    %181 = vector.broadcast %cst_71 : f32 to vector<16x1xf32>
    %182 = arith.mulf %177, %181 : vector<16x1xf32>
    %cst_72 = arith.constant 7.812500e-03 : f32
    %183 = vector.broadcast %cst_72 : f32 to vector<16x1xf32>
    %184 = arith.mulf %180, %183 : vector<16x1xf32>
    %185 = arith.mulf %182, %182 : vector<16x1xf32>
    %186 = arith.subf %184, %185 : vector<16x1xf32>
    %cst_73 = arith.constant 0.000000e+00 : f32
    %187 = vector.broadcast %cst_73 : f32 to vector<16x1xf32>
    %188 = arith.maximumf %186, %187 : vector<16x1xf32>
    %cst_74 = arith.constant 9.99999974E-6 : f32
    %189 = vector.broadcast %cst_74 : f32 to vector<16x1xf32>
    %190 = arith.addf %188, %189 : vector<16x1xf32>
    %191 = math.rsqrt %190 : vector<16x1xf32>
    %192 = arith.mulf %123, %191 : vector<16x1xf32>
    %193 = arith.mulf %192, %182 : vector<16x1xf32>
    %194 = arith.subf %124, %193 : vector<16x1xf32>
    %195 = vector.broadcast %192 : vector<16x1xf32> to vector<16x128xf32>
    %196 = arith.mulf %195, %175 : vector<16x128xf32>
    %197 = vector.broadcast %194 : vector<16x1xf32> to vector<16x128xf32>
    %198 = arith.addf %196, %197 : vector<16x128xf32>
    %199 = vector.broadcast %127 : vector<16x1xf32> to vector<16x128xf32>
    %200 = arith.mulf %199, %198 : vector<16x128xf32>
    %201 = math.sin %200 : vector<16x128xf32>
    %202 = arith.mulf %201, %201 : vector<16x128xf32>
    %203 = vector.broadcast %128 : vector<16x1xf32> to vector<16x128xf32>
    %204 = arith.mulf %203, %202 : vector<16x128xf32>
    %205 = arith.addf %198, %204 : vector<16x128xf32>
    %c1_i32_75 = arith.constant 1 : i32
    %206 = tpu.dynamic_rotate %205 by %c1_i32_75 dim 1 : vector<16x128xf32>, i32 -> vector<16x128xf32>
    %cst_76 = arith.constant 0.000000e+00 : f32
    %207 = vector.broadcast %cst_76 : f32 to vector<16x128xf32>
    %208 = arith.select %10, %206, %207 : vector<16x128xi1>, vector<16x128xf32>
    %c0_77 = arith.constant 0 : index
    %c0_78 = arith.constant 0 : index
    %209 = vector.load %arg7[%c0_77, %c0_78] : memref<48x128xf32, #tpu.memory_space<vmem>>, vector<16x128xf32>
    tpu.vector_store %arg7[%c0_77, %c0_78], %208 {strides = array<i32>} : memref<48x128xf32, #tpu.memory_space<vmem>>, vector<16x128xf32>,
    %c16_79 = arith.constant 16 : index
    %c0_80 = arith.constant 0 : index
    %210 = vector.load %arg7[%c16_79, %c0_80] : memref<48x128xf32, #tpu.memory_space<vmem>>, vector<16x128xf32>
    tpu.vector_store %arg7[%c16_79, %c0_80], %205 {strides = array<i32>} : memref<48x128xf32, #tpu.memory_space<vmem>>, vector<16x128xf32>,
    %c127_i32_81 = arith.constant 127 : i32
    %211 = tpu.dynamic_rotate %205 by %c127_i32_81 dim 1 : vector<16x128xf32>, i32 -> vector<16x128xf32>
    %cst_82 = arith.constant 0.000000e+00 : f32
    %212 = vector.broadcast %cst_82 : f32 to vector<16x128xf32>
    %213 = arith.select %8, %211, %212 : vector<16x128xi1>, vector<16x128xf32>
    %c32_83 = arith.constant 32 : index
    %c0_84 = arith.constant 0 : index
    %214 = vector.load %arg7[%c32_83, %c0_84] : memref<48x128xf32, #tpu.memory_space<vmem>>, vector<16x128xf32>
    tpu.vector_store %arg7[%c32_83, %c0_84], %213 {strides = array<i32>} : memref<48x128xf32, #tpu.memory_space<vmem>>, vector<16x128xf32>,
    %c3 = arith.constant 3 : index
    %c0_85 = arith.constant 0 : index
    %c0_86 = arith.constant 0 : index
    %215 = vector.load %arg5[%c3, %c0_85, %c0_86] : memref<6x16x48xf32, #tpu.memory_space<vmem>>, vector<1x16x48xf32>
    %216 = vector.shape_cast %215 : vector<1x16x48xf32> to vector<16x48xf32>
    %c0_87 = arith.constant 0 : index
    %c0_88 = arith.constant 0 : index
    %217 = vector.load %arg7[%c0_87, %c0_88] : memref<48x128xf32, #tpu.memory_space<vmem>>, vector<48x128xf32>
    %cst_89 = arith.constant dense<0.000000e+00> : vector<16x128xf32>
    %218 = tpu.matmul %216, %217, %cst_89 {dimension_numbers = #tpu.dot_dimension_numbers<[1], [0], [0], [1], [0, 0, 1, 1], [], []>} : vector<16x48xf32>, vector<48x128xf32>, vector<16x128xf32> -> vector<16x128xf32>
    %219 = vector.broadcast %130 : vector<16x1xf32> to vector<16x128xf32>
    %220 = arith.addf %218, %219 : vector<16x128xf32>
    %221 = arith.addf %220, %120 : vector<16x128xf32>
    %222 = vector.extract_strided_slice %5 {offsets = [0, 8], sizes = [16, 1], strides = [1, 1]} : vector<16x12xf32> to vector<16x1xf32>
    %223 = vector.extract_strided_slice %5 {offsets = [0, 9], sizes = [16, 1], strides = [1, 1]} : vector<16x12xf32> to vector<16x1xf32>
    %224 = vector.extract_strided_slice %5 {offsets = [0, 10], sizes = [16, 1], strides = [1, 1]} : vector<16x12xf32> to vector<16x1xf32>
    %225 = vector.extract_strided_slice %5 {offsets = [0, 11], sizes = [16, 1], strides = [1, 1]} : vector<16x12xf32> to vector<16x1xf32>
    %226 = vector.extract_strided_slice %0 {offsets = [0, 20], sizes = [16, 1], strides = [1, 1]} : vector<16x30xf32> to vector<16x1xf32>
    %227 = vector.extract_strided_slice %0 {offsets = [0, 21], sizes = [16, 1], strides = [1, 1]} : vector<16x30xf32> to vector<16x1xf32>
    %228 = vector.extract_strided_slice %0 {offsets = [0, 22], sizes = [16, 1], strides = [1, 1]} : vector<16x30xf32> to vector<16x1xf32>
    %229 = vector.extract_strided_slice %0 {offsets = [0, 23], sizes = [16, 1], strides = [1, 1]} : vector<16x30xf32> to vector<16x1xf32>
    %230 = vector.extract_strided_slice %0 {offsets = [0, 28], sizes = [16, 1], strides = [1, 1]} : vector<16x30xf32> to vector<16x1xf32>
    %231 = vector.extract_strided_slice %0 {offsets = [0, 29], sizes = [16, 1], strides = [1, 1]} : vector<16x30xf32> to vector<16x1xf32>
    %cst_90 = arith.constant dense<0.000000e+00> : vector<16xf32>
    %232 = vector.multi_reduction <add>, %221, %cst_90 [1] : vector<16x128xf32> to vector<16xf32>
    %233 = vector.shape_cast %232 : vector<16xf32> to vector<16x1xf32>
    %234 = arith.mulf %221, %221 : vector<16x128xf32>
    %cst_91 = arith.constant dense<0.000000e+00> : vector<16xf32>
    %235 = vector.multi_reduction <add>, %234, %cst_91 [1] : vector<16x128xf32> to vector<16xf32>
    %236 = vector.shape_cast %235 : vector<16xf32> to vector<16x1xf32>
    %cst_92 = arith.constant 7.812500e-03 : f32
    %237 = vector.broadcast %cst_92 : f32 to vector<16x1xf32>
    %238 = arith.mulf %233, %237 : vector<16x1xf32>
    %cst_93 = arith.constant 7.812500e-03 : f32
    %239 = vector.broadcast %cst_93 : f32 to vector<16x1xf32>
    %240 = arith.mulf %236, %239 : vector<16x1xf32>
    %241 = arith.mulf %238, %238 : vector<16x1xf32>
    %242 = arith.subf %240, %241 : vector<16x1xf32>
    %cst_94 = arith.constant 0.000000e+00 : f32
    %243 = vector.broadcast %cst_94 : f32 to vector<16x1xf32>
    %244 = arith.maximumf %242, %243 : vector<16x1xf32>
    %cst_95 = arith.constant 9.99999974E-6 : f32
    %245 = vector.broadcast %cst_95 : f32 to vector<16x1xf32>
    %246 = arith.addf %244, %245 : vector<16x1xf32>
    %247 = math.rsqrt %246 : vector<16x1xf32>
    %248 = arith.mulf %222, %247 : vector<16x1xf32>
    %249 = arith.mulf %248, %238 : vector<16x1xf32>
    %250 = arith.subf %223, %249 : vector<16x1xf32>
    %251 = vector.broadcast %248 : vector<16x1xf32> to vector<16x128xf32>
    %252 = arith.mulf %251, %221 : vector<16x128xf32>
    %253 = vector.broadcast %250 : vector<16x1xf32> to vector<16x128xf32>
    %254 = arith.addf %252, %253 : vector<16x128xf32>
    %255 = vector.broadcast %226 : vector<16x1xf32> to vector<16x128xf32>
    %256 = arith.mulf %255, %254 : vector<16x128xf32>
    %257 = math.sin %256 : vector<16x128xf32>
    %258 = arith.mulf %257, %257 : vector<16x128xf32>
    %259 = vector.broadcast %227 : vector<16x1xf32> to vector<16x128xf32>
    %260 = arith.mulf %259, %258 : vector<16x128xf32>
    %261 = arith.addf %254, %260 : vector<16x128xf32>
    %c5_i32_96 = arith.constant 5 : i32
    %262 = tpu.dynamic_rotate %261 by %c5_i32_96 dim 1 : vector<16x128xf32>, i32 -> vector<16x128xf32>
    %cst_97 = arith.constant 0.000000e+00 : f32
    %263 = vector.broadcast %cst_97 : f32 to vector<16x128xf32>
    %264 = arith.select %18, %262, %263 : vector<16x128xi1>, vector<16x128xf32>
    %c0_98 = arith.constant 0 : index
    %c0_99 = arith.constant 0 : index
    %265 = vector.load %arg7[%c0_98, %c0_99] : memref<48x128xf32, #tpu.memory_space<vmem>>, vector<16x128xf32>
    tpu.vector_store %arg7[%c0_98, %c0_99], %264 {strides = array<i32>} : memref<48x128xf32, #tpu.memory_space<vmem>>, vector<16x128xf32>,
    %c16_100 = arith.constant 16 : index
    %c0_101 = arith.constant 0 : index
    %266 = vector.load %arg7[%c16_100, %c0_101] : memref<48x128xf32, #tpu.memory_space<vmem>>, vector<16x128xf32>
    tpu.vector_store %arg7[%c16_100, %c0_101], %261 {strides = array<i32>} : memref<48x128xf32, #tpu.memory_space<vmem>>, vector<16x128xf32>,
    %c123_i32_102 = arith.constant 123 : i32
    %267 = tpu.dynamic_rotate %261 by %c123_i32_102 dim 1 : vector<16x128xf32>, i32 -> vector<16x128xf32>
    %cst_103 = arith.constant 0.000000e+00 : f32
    %268 = vector.broadcast %cst_103 : f32 to vector<16x128xf32>
    %269 = arith.select %16, %267, %268 : vector<16x128xi1>, vector<16x128xf32>
    %c32_104 = arith.constant 32 : index
    %c0_105 = arith.constant 0 : index
    %270 = vector.load %arg7[%c32_104, %c0_105] : memref<48x128xf32, #tpu.memory_space<vmem>>, vector<16x128xf32>
    tpu.vector_store %arg7[%c32_104, %c0_105], %269 {strides = array<i32>} : memref<48x128xf32, #tpu.memory_space<vmem>>, vector<16x128xf32>,
    %c4 = arith.constant 4 : index
    %c0_106 = arith.constant 0 : index
    %c0_107 = arith.constant 0 : index
    %271 = vector.load %arg5[%c4, %c0_106, %c0_107] : memref<6x16x48xf32, #tpu.memory_space<vmem>>, vector<1x16x48xf32>
    %272 = vector.shape_cast %271 : vector<1x16x48xf32> to vector<16x48xf32>
    %c0_108 = arith.constant 0 : index
    %c0_109 = arith.constant 0 : index
    %273 = vector.load %arg7[%c0_108, %c0_109] : memref<48x128xf32, #tpu.memory_space<vmem>>, vector<48x128xf32>
    %cst_110 = arith.constant dense<0.000000e+00> : vector<16x128xf32>
    %274 = tpu.matmul %272, %273, %cst_110 {dimension_numbers = #tpu.dot_dimension_numbers<[1], [0], [0], [1], [0, 0, 1, 1], [], []>} : vector<16x48xf32>, vector<48x128xf32>, vector<16x128xf32> -> vector<16x128xf32>
    %275 = vector.broadcast %230 : vector<16x1xf32> to vector<16x128xf32>
    %276 = arith.addf %274, %275 : vector<16x128xf32>
    %cst_111 = arith.constant dense<0.000000e+00> : vector<16xf32>
    %277 = vector.multi_reduction <add>, %276, %cst_111 [1] : vector<16x128xf32> to vector<16xf32>
    %278 = vector.shape_cast %277 : vector<16xf32> to vector<16x1xf32>
    %279 = arith.mulf %276, %276 : vector<16x128xf32>
    %cst_112 = arith.constant dense<0.000000e+00> : vector<16xf32>
    %280 = vector.multi_reduction <add>, %279, %cst_112 [1] : vector<16x128xf32> to vector<16xf32>
    %281 = vector.shape_cast %280 : vector<16xf32> to vector<16x1xf32>
    %cst_113 = arith.constant 7.812500e-03 : f32
    %282 = vector.broadcast %cst_113 : f32 to vector<16x1xf32>
    %283 = arith.mulf %278, %282 : vector<16x1xf32>
    %cst_114 = arith.constant 7.812500e-03 : f32
    %284 = vector.broadcast %cst_114 : f32 to vector<16x1xf32>
    %285 = arith.mulf %281, %284 : vector<16x1xf32>
    %286 = arith.mulf %283, %283 : vector<16x1xf32>
    %287 = arith.subf %285, %286 : vector<16x1xf32>
    %cst_115 = arith.constant 0.000000e+00 : f32
    %288 = vector.broadcast %cst_115 : f32 to vector<16x1xf32>
    %289 = arith.maximumf %287, %288 : vector<16x1xf32>
    %cst_116 = arith.constant 9.99999974E-6 : f32
    %290 = vector.broadcast %cst_116 : f32 to vector<16x1xf32>
    %291 = arith.addf %289, %290 : vector<16x1xf32>
    %292 = math.rsqrt %291 : vector<16x1xf32>
    %293 = arith.mulf %224, %292 : vector<16x1xf32>
    %294 = arith.mulf %293, %283 : vector<16x1xf32>
    %295 = arith.subf %225, %294 : vector<16x1xf32>
    %296 = vector.broadcast %293 : vector<16x1xf32> to vector<16x128xf32>
    %297 = arith.mulf %296, %276 : vector<16x128xf32>
    %298 = vector.broadcast %295 : vector<16x1xf32> to vector<16x128xf32>
    %299 = arith.addf %297, %298 : vector<16x128xf32>
    %300 = vector.broadcast %228 : vector<16x1xf32> to vector<16x128xf32>
    %301 = arith.mulf %300, %299 : vector<16x128xf32>
    %302 = math.sin %301 : vector<16x128xf32>
    %303 = arith.mulf %302, %302 : vector<16x128xf32>
    %304 = vector.broadcast %229 : vector<16x1xf32> to vector<16x128xf32>
    %305 = arith.mulf %304, %303 : vector<16x128xf32>
    %306 = arith.addf %299, %305 : vector<16x128xf32>
    %c1_i32_117 = arith.constant 1 : i32
    %307 = tpu.dynamic_rotate %306 by %c1_i32_117 dim 1 : vector<16x128xf32>, i32 -> vector<16x128xf32>
    %cst_118 = arith.constant 0.000000e+00 : f32
    %308 = vector.broadcast %cst_118 : f32 to vector<16x128xf32>
    %309 = arith.select %10, %307, %308 : vector<16x128xi1>, vector<16x128xf32>
    %c0_119 = arith.constant 0 : index
    %c0_120 = arith.constant 0 : index
    %310 = vector.load %arg7[%c0_119, %c0_120] : memref<48x128xf32, #tpu.memory_space<vmem>>, vector<16x128xf32>
    tpu.vector_store %arg7[%c0_119, %c0_120], %309 {strides = array<i32>} : memref<48x128xf32, #tpu.memory_space<vmem>>, vector<16x128xf32>,
    %c16_121 = arith.constant 16 : index
    %c0_122 = arith.constant 0 : index
    %311 = vector.load %arg7[%c16_121, %c0_122] : memref<48x128xf32, #tpu.memory_space<vmem>>, vector<16x128xf32>
    tpu.vector_store %arg7[%c16_121, %c0_122], %306 {strides = array<i32>} : memref<48x128xf32, #tpu.memory_space<vmem>>, vector<16x128xf32>,
    %c127_i32_123 = arith.constant 127 : i32
    %312 = tpu.dynamic_rotate %306 by %c127_i32_123 dim 1 : vector<16x128xf32>, i32 -> vector<16x128xf32>
    %cst_124 = arith.constant 0.000000e+00 : f32
    %313 = vector.broadcast %cst_124 : f32 to vector<16x128xf32>
    %314 = arith.select %8, %312, %313 : vector<16x128xi1>, vector<16x128xf32>
    %c32_125 = arith.constant 32 : index
    %c0_126 = arith.constant 0 : index
    %315 = vector.load %arg7[%c32_125, %c0_126] : memref<48x128xf32, #tpu.memory_space<vmem>>, vector<16x128xf32>
    tpu.vector_store %arg7[%c32_125, %c0_126], %314 {strides = array<i32>} : memref<48x128xf32, #tpu.memory_space<vmem>>, vector<16x128xf32>,
    %c5 = arith.constant 5 : index
    %c0_127 = arith.constant 0 : index
    %c0_128 = arith.constant 0 : index
    %316 = vector.load %arg5[%c5, %c0_127, %c0_128] : memref<6x16x48xf32, #tpu.memory_space<vmem>>, vector<1x16x48xf32>
    %317 = vector.shape_cast %316 : vector<1x16x48xf32> to vector<16x48xf32>
    %c0_129 = arith.constant 0 : index
    %c0_130 = arith.constant 0 : index
    %318 = vector.load %arg7[%c0_129, %c0_130] : memref<48x128xf32, #tpu.memory_space<vmem>>, vector<48x128xf32>
    %cst_131 = arith.constant dense<0.000000e+00> : vector<16x128xf32>
    %319 = tpu.matmul %317, %318, %cst_131 {dimension_numbers = #tpu.dot_dimension_numbers<[1], [0], [0], [1], [0, 0, 1, 1], [], []>} : vector<16x48xf32>, vector<48x128xf32>, vector<16x128xf32> -> vector<16x128xf32>
    %320 = vector.broadcast %231 : vector<16x1xf32> to vector<16x128xf32>
    %321 = arith.addf %319, %320 : vector<16x128xf32>
    %322 = arith.addf %321, %221 : vector<16x128xf32>
    %c0_132 = arith.constant 0 : index
    %c0_133 = arith.constant 0 : index
    %323 = vector.load %arg6[%c0_132, %c0_133] : memref<16x128xf32, #tpu.memory_space<vmem>>, vector<16x128xf32>
    tpu.vector_store %arg6[%c0_132, %c0_133], %322 {strides = array<i32>} : memref<16x128xf32, #tpu.memory_space<vmem>>, vector<16x128xf32>,
    return
  }
  func.func @transform_0(%arg0: i32) -> (i32, i32) {
    %c0_i32 = arith.constant 0 : i32
    %c0_i32_0 = arith.constant 0 : i32
    %c0_i32_1 = arith.constant 0 : i32
    return %c0_i32, %c0_i32_0 : i32, i32
  }
  func.func @transform_1(%arg0: i32) -> (i32, i32) {
    %c0_i32 = arith.constant 0 : i32
    %c0_i32_0 = arith.constant 0 : i32
    %c0_i32_1 = arith.constant 0 : i32
    return %c0_i32, %c0_i32_0 : i32, i32
  }
  func.func @transform_2(%arg0: i32) -> (i32, i32) {
    %c0_i32 = arith.constant 0 : i32
    %c0_i32_0 = arith.constant 0 : i32
    %c0_i32_1 = arith.constant 0 : i32
    return %c0_i32, %c0_i32_0 : i32, i32
  }
  func.func @transform_3(%arg0: i32) -> (i32, i32) {
    %c0_i32 = arith.constant 0 : i32
    %c0_i32_0 = arith.constant 0 : i32
    %c0_i32_1 = arith.constant 0 : i32
    return %c0_i32, %c0_i32_0 : i32, i32
  }
  func.func @transform_4(%arg0: i32) -> (i32, i32, i32) {
    %c0_i32 = arith.constant 0 : i32
    %c0_i32_0 = arith.constant 0 : i32
    %c0_i32_1 = arith.constant 0 : i32
    %c0_i32_2 = arith.constant 0 : i32
    return %c0_i32, %c0_i32_0, %c0_i32_1 : i32, i32, i32
  }
  func.func @transform_5(%arg0: i32) -> (i32, i32) {
    %c0_i32 = arith.constant 0 : i32
    %c0_i32_0 = arith.constant 0 : i32
    %c0_i32_1 = arith.constant 0 : i32
    return %c0_i32, %c0_i32_0 : i32, i32
  }
}

</mosaic_0001>

<bundles_post_ra>
// kernel: tpu_custom_call.1
= control target key start
LH: loop header
LB: loop body
LE: loop exit
PB: predicated region body
PF: predicated region fallthrough
CT: control target
= control target key end

     0   :  { %s4366_s0 = inlined_call_operand.vmem [shape: f32[16,128], index: 0, kind: input, shape index: {}]   ;;  %s4367_s1 = inlined_call_operand.vmem [shape: f32[16,128], index: 1, kind: input, shape index: {}]   ;;  %s4368_s2 = inlined_call_operand.vmem [shape: f32[128,12], index: 2, kind: input, shape index: {}]   ;;  %s4369_s3 = inlined_call_operand.vmem [shape: f32[16,30], index: 3, kind: input, shape index: {}]   ;;  %s4370_s4 = inlined_call_operand.vmem [shape: f32[6,16,48], index: 4, kind: input, shape index: {}]   ;;  %s4371_s5 = inlined_call_operand.hbm [shape: f32[16,128], index: 5, kind: output, shape index: {}]  }
   0x1   :  { %v25_v0 = vld [vmem:[%s4368_s2] sm:$0xff]  ;;  %v26_v1 = vld [vmem:[%s4368_s2 + $0x8] sm:$0xff]  ;;  %v27_v2 = vld [vmem:[%s4368_s2 + $0x10] sm:$0xff] }
   0x2   :  { %v2897_v3 = vpack.c.bf16 %v26_v1, %v25_v0  ;;  %v28_v4 = vld [vmem:[%s4368_s2 + $0x18] sm:$0xff]  ;;  %v29_v6 = vld [vmem:[%s4368_s2 + $0x20] sm:$0xff]  ;;  %v30_v7 = vld [vmem:[%s4368_s2 + $0x28] sm:$0xff] }
   0x3   :  { %v2901_v5 = vpack.c.bf16 %v28_v4, %v27_v2  ;;  %v2905_v8 = vpack.c.bf16 %v30_v7, %v29_v6  ;;  %v31_v9 = vld [vmem:[%s4368_s2 + $0x30] sm:$0xff]  ;;  %v32_v10 = vld [vmem:[%s4368_s2 + $0x38] sm:$0xff]  ;;  %v23_v11 = vld [vmem:[%s4367_s1] sm:$0xff] }
   0x4   :  { %2898 = vmatprep.subr.bf16.mxu0 %v2897_v3  ;;  %2804 = vmatprep.mubr.f32.mxu0 %v23_v11  ;;  %v3438_v12 = vld [vmem:[%s4366_s0] sm:$0xff]  ;;  %v3443_v13 = vld [vmem:[%s4366_s0 + $0x8] sm:$0xff] }
   0x5   :  { %2900 = vmatpush3.bf16.msra.mxu0 %v2897_v3 }
   0x6   :  { %2902 = vmatprep.subr.bf16.mxu0 %v2901_v5 }
   0x7   :  { %10 = vsyncpa [#allocation4], 0  ;;  %126 = vadd.xlane.f32.xlu0 %v3438_v12  ;;  %v130_v14 = vmul.f32 %v3438_v12, %v3438_v12  ;;  %v2909_v15 = vpack.c.bf16 %v32_v10, %v31_v9  ;;  %v131_v16 = vmul.f32 %v3443_v13, %v3443_v13  ;;  %v33_v17 = vld [vmem:[%s4368_s2 + $0x40] sm:$0xff]  ;;  %v34_v18 = vld [vmem:[%s4368_s2 + $0x48] sm:$0xff]  ;;  %v3333_v30 = vmov 0   ;;  %s3335_s10 = smov 1  }
   0x8   :  { %v2913_v19 = vpack.c.bf16 %v34_v18, %v33_v17  ;;  %v35_v20 = vld [vmem:[%s4368_s2 + $0x50] sm:$0xff]  ;;  %v36_v21 = vld [vmem:[%s4368_s2 + $0x58] sm:$0xff]  ;;  %v37_v23 = vld [vmem:[%s4368_s2 + $0x60] sm:$0xff]  ;;  %3118 = vset.pattern.permute.xlu1 %v3333_v30  ;;  %v3334_v47 = vmov 1   ;;  %v3336_v0 = vmov 12   ;;  %v3337_v1 = vmov 13  }
   0x9   :  { %2904 = vmatpush3.bf16.msra.mxu0 %v2901_v5  ;;  %132 = vadd.xlane.f32.xlu1 %v130_v14  ;;  %v2917_v22 = vpack.c.bf16 %v36_v21, %v35_v20  ;;  %v38_v24 = vld [vmem:[%s4368_s2 + $0x68] sm:$0xff]  ;;  %v39_v26 = vld [vmem:[%s4368_s2 + $0x70] sm:$0xff]  ;;  %v40_v27 = vld [vmem:[%s4368_s2 + $0x78] sm:$0xff]  ;;  %s3344_s11 = smov 127   ;;  %s3356_s28 = smov 3  }
   0xa   :  { %2906 = vmatprep.subr.bf16.mxu0 %v2905_v8  ;;  %v2921_v25 = vpack.c.bf16 %v38_v24, %v37_v23  ;;  %v2925_v28 = vpack.c.bf16 %v40_v27, %v39_v26  ;;  %v24_v29 = vld [vmem:[%s4367_s1 + $0x8] sm:$0xff]  ;;  %3121 = vset.pattern.permute.xlu0 %v3334_v47  ;;  %v3486_v49 = vld [vmem:[%s4369_s3] sm:$0xff]  ;;  %s3367_s16 = smov 123   ;;  %s3368_s17 = smov 5  }
   0xb   :  { %128 = vadd.xlane.f32.xlu0 %v3443_v13  ;;  %v3481_v48 = vld [vmem:[%s4369_s3 + $0x8] sm:$0xff] }
   0xd   :  { %2908 = vmatpush3.bf16.msra.mxu0 %v2905_v8  ;;  %134 = vadd.xlane.f32.xlu1 %v131_v16 }
   0xe   :  { %2910 = vmatprep.subr.bf16.mxu0 %v2909_v15 }
  0x11   :  { %2912 = vmatpush3.bf16.msra.mxu0 %v2909_v15 }
  0x12   :  { %2914 = vmatprep.subr.bf16.mxu0 %v2913_v19 }
  0x15   :  { %2916 = vmatpush3.bf16.msra.mxu0 %v2913_v19 }
  0x16   :  { %2918 = vmatprep.subr.bf16.mxu0 %v2917_v22 }
  0x19   :  { %2920 = vmatpush3.bf16.msra.mxu0 %v2917_v22 }
  0x1a   :  { %2922 = vmatprep.subr.bf16.mxu0 %v2921_v25 }
  0x1d   :  { %2924 = vmatpush3.bf16.msra.mxu0 %v2921_v25 }
  0x1e   :  { %2926 = vmatprep.subr.bf16.mxu0 %v2925_v28 }
  0x21   :  { %2928 = vmatpush3.bf16.msra.mxu0 %v2925_v28 }
  0x24   :  { %2805 = vmatmul.mubr.f32.vlgmr.msra.gmra.mrb[0].mxu0 %v24_v29 }
  0x94   :  { %v127_v31 = vpop.xlane.xlu0 %126 }
  0x95   :  { %v136_v36 = vmul.f32 0.0078125, %v127_v31 }
  0x96   :  { %v133_v32 = vpop.xlane.xlu1 %132 }
  0x97   :  { %v140_v39 = vmul.f32 %v136_v36, %v136_v36  ;;  %v138_v40 = vmul.f32 0.0078125, %v133_v32 }
  0x98   :  { %v129_v33 = vpop.xlane.xlu0 %128 }
  0x99   :  { %v137_v34 = vmul.f32 0.0078125, %v129_v33  ;;  %v142_v42 = vsub.f32 %v138_v40, %v140_v39  ;;  %v3340_v40 = vmov 2131351028  }
  0x9a   :  { %v135_v35 = vpop.xlane.xlu1 %134 }
  0x9b   :  { %v141_v37 = vmul.f32 %v137_v34, %v137_v34  ;;  %v139_v38 = vmul.f32 0.0078125, %v135_v35  ;;  %v144_v44 = vmax.f32 %v142_v42, 0.0  ;;  %v3341_v42 = vmov 2102212464  }
  0x9d   :  { %v143_v41 = vsub.f32 %v139_v38, %v141_v37  ;;  %v146_v46 = vadd.f32 1e-05, %v144_v44  ;;  %v3339_v38 = vmov 2475754826   ;;  %v3342_v44 = vmov 920167782  }
  0x9f   :  { %v145_v43 = vmax.f32 %v143_v41, 0.0 }
  0xa1   :  { %v147_v45 = vadd.f32 1e-05, %v145_v43 }
  0xa3   :  { %3229 = vrsqrt.f32 %v147_v45 }
  0xa4   :  { %3231 = vrsqrt.f32 %v146_v46 }
  0xad   :  { %v3230_v50 = vpop.eup %3229 }
  0xae   :  { %v3232_v55 = vpop.eup %3231 }
  0xf7   :  { %v2806_v51 = vpop.f32.mrb[0].mxu0 }
  0xf8   :  { %v3489_v52 = vadd.f32 %v2806_v51, %v3481_v48  ;;  %v107_v53 = vpop.f32.mrb[1].mxu0 }
  0xf9   :  { %v3492_v54 = vadd.f32 %v107_v53, %v3486_v49 }
  0xfa   :  { %v151_v56 = vmul.f32 %v3230_v50, %v3489_v52 }
  0xfb   :  { %v150_v57 = vmul.f32 %v3232_v55, %v3492_v54  ;;  %v3343_v55 = vmov 1326507024  }
  0xfc   :  { %v153_v58 = vmul.f32 %v151_v56, %v137_v34  ;;  %v3338_v34 = vmov 683565275  }
  0xfd   :  { %v152_v59 = vmul.f32 %v150_v57, %v136_v36 }
  0xfe   :  { %158 = vrot.lane.b32.xlu1 %v153_v58, %s3335_s10 }
  0xff   :  { %156 = vrot.lane.b32.xlu0 %v152_v59, %s3335_s10 }
 0x102   :  { %166 = vperm.xlu1 %3118, %v150_v57  }
 0x106   :  { %171 = vperm.xlu1 %3118, %v151_v56  }
 0x10a   :  { %3119 = vset.pattern.permute.xlu1 %v3334_v47 }
 0x170   :  { %v159_v60 = vpop.permute.xlu1 %158 }
 0x171   :  { %v163_v61 = vsub.f32 %v3489_v52, %v159_v60  ;;  %v157_v62 = vpop.permute.xlu0 %156 }
 0x172   :  { %v162_v63 = vsub.f32 %v3492_v54, %v157_v62 }
 0x173   :  { %183 = vperm.xlu1 %3119, %v163_v61  }
 0x174   :  { %178 = vperm.xlu0 %3121, %v162_v63  }
 0x177   :  { %3120 = vset.pattern.permute.xlu1 %v3336_v0 }
 0x178   :  { %3122 = vset.pattern.permute.xlu0 %v3336_v0  ;;  %190 = vperm.xlu1 %3120, %v3486_v49  }
 0x179   :  { %195 = vperm.xlu0 %3122, %v3481_v48  }
 0x17c   :  { %3123 = vset.pattern.permute.xlu1 %v3337_v1 }
 0x17d   :  { %411 = vperm.xlu1 %3123, %v3486_v49  }
 0x181   :  { %415 = vperm.xlu1 %3123, %v3481_v48   ;;  %v167_v2 = vpop.permute.xlu1 %166 }
 0x182   :  { %v174_v6 = vmul.f32 %v167_v2, %v3438_v12 }
 0x185   :  { %v172_v3 = vpop.permute.xlu1 %171 }
 0x186   :  { %v175_v7 = vmul.f32 %v172_v3, %v3443_v13 }
 0x1f2   :  { %v184_v4 = vpop.permute.xlu1 %183 }
 0x1f3   :  { %v179_v5 = vpop.permute.xlu0 %178  ;;  %v3508_v9 = vadd.f32 %v184_v4, %v175_v7 }
 0x1f4   :  { %v3506_v8 = vadd.f32 %v179_v5, %v174_v6 }
 0x1f7   :  { %v191_v10 = vpop.permute.xlu1 %190 }
 0x1f8   :  { %v3511_v11 = vmul.f32 %v191_v10, %v3506_v8  ;;  %v196_v14 = vpop.permute.xlu0 %195 }
 0x1f9   :  { %v3514_v15 = vmul.f32 %v196_v14, %v3508_v9 }
 0x1fa   :  { %v200_v16 = vand.u32 2147483647, %v3511_v11  ;;  %v203_v17 = vand.u32 2139095040, %v3511_v11  ;;  %vm202_vm14 = vcmp.lt.s32.totalorder %v3511_v11, 0 }
 0x1fb   :  { %v307_v12 = vand.u32 2139095040, %v3514_v15  ;;  %v304_v19 = vand.u32 2147483647, %v3514_v15 }
 0x1fc   :  { %v204_v18 = vshrl.u32 %v203_v17, 23  ;;  %v207_v13 = vand.u32 8388607, %v200_v16  ;;  %vm201_vm15 = vcmp.le.f32.partialorder %v200_v16, 0.7853982 }
 0x1fd   :  { %v308_v20 = vshrl.u32 %v307_v12, 23  ;;  %v3524_v25 = vand.u32 8388607, %v304_v19 }
 0x1fe   :  { %v2612_v21 = vadd.s32 4294967169, %v204_v18  ;;  %v208_v24 = vor.u32 8388608, %v207_v13 }
 0x1ff   :  { %v2616_v22 = vadd.s32 4294967169, %v308_v20  ;;  %v312_v32 = vor.u32 8388608, %v3524_v25 }
 0x200   :  { %v210_v23 = vadd.s32 1, %v2612_v21  ;;  %v3526_v31 = vshll.u32 %v208_v24, 8 }
 0x201   :  { %v314_v26 = vadd.s32 1, %v2616_v22 }
 0x202   :  { %vm211_vm0 = vcmp.gt.s32.totalorder %v210_v23, 0 }
 0x203   :  { %v212_v27 = vsel %vm211_vm0, %v210_v23, 0  ;;  %vm315_vm1 = vcmp.gt.s32.totalorder %v314_v26, 0  ;;  %vm306_vm0 = vcmp.lt.s32.totalorder %v3514_v15, 0 }
 0x204   :  { %v213_v28 = vshrl.u32 %v212_v27, 5  ;;  %v214_v29 = vand.u32 31, %v212_v27  ;;  %v316_v30 = vsel %vm315_vm1, %v314_v26, 0  ;;  %vm305_vm1 = vcmp.le.f32.partialorder %v304_v19, 0.7853982 }
 0x205   :  { %v3530_v36 = vshrl.u32 %v316_v30, 5  ;;  %v318_v37 = vand.u32 31, %v316_v30 }
 0x206   :  { %v215_v33 = vsub.s32 32, %v214_v29  ;;  %v217_v35 = vshll.u32 %v3338_v34, %v214_v29  ;;  %v220_v39 = vshll.u32 %v3339_v38, %v214_v29  ;;  %v223_v41 = vshll.u32 %v3340_v40, %v214_v29 }
 0x207   :  { %v226_v43 = vshll.u32 %v3341_v42, %v214_v29  ;;  %v229_v45 = vshll.u32 %v3342_v44, %v214_v29  ;;  %vm232_vm2 = vcmp.lt.s32.totalorder %v213_v28, 1  ;;  %vm233_vm3 = vcmp.lt.s32.totalorder %v213_v28, 2 }
 0x208   :  { %v218_v46 = vshrl.u32 %v3339_v38, %v215_v33  ;;  %v221_v47 = vshrl.u32 %v3340_v40, %v215_v33  ;;  %v224_v50 = vshrl.u32 %v3341_v42, %v215_v33  ;;  %v216_v51 = vshrl.u32 %v3338_v34, %v215_v33 }
 0x209   :  { %v227_v53 = vshrl.u32 %v3342_v44, %v215_v33  ;;  %v230_v56 = vshrl.u32 %v3343_v55, %v215_v33  ;;  %v319_v60 = vsub.s32 32, %v318_v37  ;;  %vm234_vm4 = vcmp.lt.s32.totalorder %v213_v28, 3 }
 0x20a   :  { %v219_v57 = vor.u32 %v218_v46, %v217_v35  ;;  %v222_v58 = vor.u32 %v221_v47, %v220_v39  ;;  %v225_v59 = vor.u32 %v224_v50, %v223_v41  ;;  %vm235_vm5 = vcmp.lt.s32.totalorder %v213_v28, 4 }
 0x20b   :  { %v228_v61 = vor.u32 %v227_v53, %v226_v43  ;;  %v231_v62 = vor.u32 %v230_v56, %v229_v45  ;;  %v321_v6 = vshll.u32 %v3338_v34, %v318_v37  ;;  %v322_v14 = vshrl.u32 %v3339_v38, %v319_v60 }
 0x20c   :  { %v236_v63 = vsel %vm232_vm2, %v216_v51, %v219_v57  ;;  %v237_v0 = vsel %vm235_vm5, %v225_v59, 2102212464  ;;  %v240_v1 = vsel %vm232_vm2, %v219_v57, %v222_v58  ;;  %v244_v2 = vsel %vm232_vm2, %v222_v58, %v225_v59 }
 0x20d   :  { %v238_v3 = vsel %vm234_vm4, %v222_v58, %v237_v0  ;;  %v241_v4 = vsel %vm235_vm5, %v228_v61, 920167782  ;;  %v245_v5 = vsel %vm235_vm5, %v231_v62, 1326507024  ;;  %v324_v17 = vshll.u32 %v3339_v38, %v318_v37 }
 0x20e   :  { %v242_v7 = vsel %vm234_vm4, %v225_v59, %v241_v4  ;;  %v246_v10 = vsel %vm234_vm4, %v228_v61, %v245_v5  ;;  %v239_v12 = vsel %vm233_vm3, %v236_v63, %v238_v3  ;;  %v325_v20 = vshrl.u32 %v3340_v40, %v319_v60 }
 0x20f   :  { %v243_v18 = vsel %vm233_vm3, %v240_v1, %v242_v7  ;;  %v247_v13 = vsel %vm233_vm3, %v244_v2, %v246_v10  ;;  %v323_v25 = vor.u32 %v322_v14, %v321_v6  ;;  %v327_v27 = vshll.u32 %v3340_v40, %v318_v37 }
 0x210   :  { %v3553_v21 = vmul.u32.u64.low %v3526_v31, %v247_v13  ;;  %v3554_v22 = vmul.u32.u64.high %v3526_v31, %v247_v13, %v3553_v21  ;;  %v3557_v23 = vmul.u32.u64.low %v3526_v31, %v243_v18  ;;  %v3558_v24 = vmul.u32.u64.high %v3526_v31, %v243_v18, %v3557_v23 }
 0x211   :  { %v326_v26 = vor.u32 %v325_v20, %v324_v17  ;;  %v328_v29 = vshrl.u32 %v3341_v42, %v319_v60  ;;  %v330_v30 = vshll.u32 %v3341_v42, %v318_v37  ;;  %v331_v28 = vshrl.u32 %v3342_v44, %v319_v60 }
 0x212   :  { %v334_v33 = vshrl.u32 %v3343_v55, %v319_v60  ;;  %v352_v35 = vshll.u32 %v312_v32, 8  ;;  %v255_v39 = vmul.u32 %v3526_v31, %v239_v12  ;;  %v320_v41 = vshrl.u32 %v3338_v34, %v319_v60 }
 0x213   :  { %v329_v43 = vor.u32 %v328_v29, %v327_v27  ;;  %v333_v45 = vshll.u32 %v3342_v44, %v318_v37  ;;  %vm257_vm6 = vc.u32 %v3554_v22, %v3557_v23  ;;  %v258_v46 = vadd.s32 1, %v3558_v24 }
 0x214   :  { %v332_v47 = vor.u32 %v331_v28, %v330_v30  ;;  %vm336_vm7 = vcmp.lt.s32.totalorder %v3530_v36, 1  ;;  %vm338_vm8 = vcmp.lt.s32.totalorder %v3530_v36, 3  ;;  %vm339_vm9 = vcmp.lt.s32.totalorder %v3530_v36, 4 }
 0x215   :  { %v335_v50 = vor.u32 %v334_v33, %v333_v45  ;;  %v344_v32 = vsel %vm336_vm7, %v323_v25, %v326_v26  ;;  %v259_v31 = vsel %vm257_vm6, %v258_v46, %v3558_v24  ;;  %v341_v51 = vsel %vm339_vm9, %v329_v43, 2102212464 }
 0x216   :  { %v345_v53 = vsel %vm339_vm9, %v332_v47, 920167782  ;;  %v348_v56 = vsel %vm336_vm7, %v326_v26, %v329_v43  ;;  %v260_v57 = vadd.s32 %v259_v31, %v255_v39  ;;  %vm337_vm10 = vcmp.lt.s32.totalorder %v3530_v36, 2 }
 0x217   :  { %v346_v37 = vsel %vm338_vm8, %v329_v43, %v345_v53  ;;  %v349_v58 = vsel %vm339_vm9, %v335_v50, 1326507024  ;;  %v340_v59 = vsel %vm336_vm7, %v320_v41, %v323_v25  ;;  %v342_v60 = vsel %vm338_vm8, %v326_v26, %v341_v51 }
 0x218   :  { %v347_v61 = vsel %vm337_vm10, %v344_v32, %v346_v37  ;;  %v350_v62 = vsel %vm338_vm8, %v332_v47, %v349_v58  ;;  %v261_v63 = vadd.s32 536870912, %v260_v57  ;;  %v343_v6 = vsel %vm337_vm10, %v340_v59, %v342_v60 }
 0x219   :  { %v351_v0 = vsel %vm337_vm10, %v348_v56, %v350_v62  ;;  %v3575_v1 = vmul.u32.u64.low %v352_v35, %v347_v61  ;;  %v3576_v2 = vmul.u32.u64.high %v352_v35, %v347_v61, %v3575_v1  ;;  %v359_v36 = vmul.u32 %v352_v35, %v343_v6 }
 0x21a   :  { %v3578_v3 = vmul.u32.u64.low %v352_v35, %v351_v0  ;;  %v3579_v4 = vmul.u32.u64.high %v352_v35, %v351_v0, %v3578_v3  ;;  %v262_v5 = vshrl.u32 %v261_v63, 30  ;;  %v256_v28 = vadd.s32 %v3557_v23, %v3554_v22 }
 0x21b   :  { %v362_v10 = vadd.s32 1, %v3576_v2  ;;  %vm292_vm5 = vweird.f32 %v3511_v11  ;;  %vm396_vm9 = vweird.f32 %v3514_v15  ;;  %vm456_vm10 = vcmask 392192  }
 0x21c   :  { %v263_v7 = vshll.u32 %v262_v5, 30  ;;  %vm361_vm11 = vc.u32 %v3579_v4, %v3575_v1  ;;  %v286_v23 = vsub.s32 4, %v262_v5 }
 0x21d   :  { %v363_v17 = vsel %vm361_vm11, %v362_v10, %v3576_v2 }
 0x21e   :  { %v264_v14 = vsub.s32 %v260_v57, %v263_v7  ;;  %v364_v12 = vadd.s32 %v363_v17, %v359_v36  ;;  %v360_v57 = vadd.s32 %v3575_v1, %v3579_v4  ;;  %v287_v3 = vsel %vm202_vm14, %v286_v23, %v262_v5 }
 0x21f   :  { %v289_v10 = vsel %vm201_vm15, 0, %v287_v3  ;;  %v3345_v23 = vmov 24  }
 0x220   :  { %v266_v18 = vsub.s32 0, %v264_v14  ;;  %v365_v13 = vadd.s32 536870912, %v364_v12  ;;  %v293_v17 = vadd.s32 3, %v289_v10  ;;  %3135 = vset.pattern.permute.xlu1 %v3345_v23  ;;  %3134 = vset.pattern.permute.xlu0 %v3345_v23 }
 0x222   :  { %v2613_v20 = vmin.u32 %v266_v18, %v264_v14  ;;  %v366_v21 = vshrl.u32 %v365_v13, 30  ;;  %v294_v13 = vand.u32 3, %v293_v17 }
 0x224   :  { %v268_v24 = vclz %v2613_v20  ;;  %v367_v25 = vshll.u32 %v366_v21, 30  ;;  %vm299_vm2 = vcmp.eq.s32.totalorder %v294_v13, 2  ;;  %vm296_vm3 = vcmp.eq.s32.totalorder %v294_v13, 0 }
 0x225   :  { %vm295_vm4 = vcmp.lt.s32.totalorder %v294_v13, 2 }
 0x226   :  { %v2614_v26 = vadd.s32 4294967294, %v268_v24  ;;  %v368_v27 = vsub.s32 %v364_v12, %v367_v25 }
 0x228   :  { %vm2615_vm12 = vcmp.lt.s32.totalorder %v2614_v26, 0  ;;  %v370_v30 = vsub.s32 0, %v368_v27 }
 0x229   :  { %v271_v29 = vsel %vm2615_vm12, 0, %v2614_v26 }
 0x22a   :  { %v272_v33 = vsub.s32 32, %v271_v29  ;;  %v276_v35 = vsub.s32 4294967266, %v271_v29  ;;  %v2617_v39 = vmin.u32 %v370_v30, %v368_v27  ;;  %v273_v41 = vshll.u32 %v264_v14, %v271_v29 }
 0x22b   :  { %v390_v14 = vsub.s32 4, %v366_v21 }
 0x22c   :  { %v274_v43 = vshrl.u32 %v256_v28, %v272_v33  ;;  %v277_v45 = vadd.s32 127, %v276_v35  ;;  %v372_v46 = vclz %v2617_v39 }
 0x22d   :  { %v391_v16 = vsel %vm306_vm0, %v390_v14, %v366_v21 }
 0x22e   :  { %v275_v47 = vor.u32 %v274_v43, %v273_v41  ;;  %v278_v50 = vshll.u32 %v277_v45, 23  ;;  %v2618_v32 = vadd.s32 4294967294, %v372_v46  ;;  %v393_v24 = vsel %vm305_vm1, 0, %v391_v16  ;;  %v412_v45 = vpop.permute.xlu1 %411 }
 0x22f   :  { %v397_v30 = vadd.s32 3, %v393_v24 }
 0x230   :  { %v279_v31 = vor.u32 4788187, %v278_v50  ;;  %vm2619_vm13 = vcmp.lt.s32.totalorder %v2618_v32, 0  ;;  %v282_v53 = vcvt.s32.f32 %v275_v47 }
 0x231   :  { %v375_v56 = vsel %vm2619_vm13, 0, %v2618_v32  ;;  %v398_v21 = vand.u32 3, %v397_v30 }
 0x232   :  { %v280_v51 = vand.u32 2147483647, %v279_v31  ;;  %v376_v37 = vsub.s32 32, %v375_v56  ;;  %v380_v58 = vsub.s32 4294967266, %v375_v56  ;;  %v377_v59 = vshll.u32 %v368_v27, %v375_v56 }
 0x233   :  { %vm403_vm6 = vcmp.eq.s32.totalorder %v398_v21, 2  ;;  %vm400_vm7 = vcmp.eq.s32.totalorder %v398_v21, 0  ;;  %vm399_vm8 = vcmp.lt.s32.totalorder %v398_v21, 2 }
 0x234   :  { %v283_v22 = vmul.f32 %v282_v53, %v280_v51  ;;  %v378_v60 = vshrl.u32 %v360_v57, %v376_v37  ;;  %v381_v61 = vadd.s32 127, %v380_v58 }
 0x236   :  { %v284_v62 = vxor.u32 2147483648, %v283_v22  ;;  %v379_v63 = vor.u32 %v378_v60, %v377_v59  ;;  %v382_v0 = vshll.u32 %v381_v61, 23 }
 0x238   :  { %v285_v2 = vsel %vm202_vm14, %v284_v62, %v283_v22  ;;  %v383_v6 = vor.u32 4788187, %v382_v0  ;;  %v386_v7 = vcvt.s32.f32 %v379_v63 }
 0x239   :  { %v288_v1 = vsel %vm201_vm15, %v3511_v11, %v285_v2  ;;  %v416_v11 = vpop.permute.xlu1 %415 }
 0x23a   :  { %3233 = vcosq.f32 %v288_v1  ;;  %v384_v4 = vand.u32 2147483647, %v383_v6 }
 0x23b   :  { %3235 = vsinq.f32 %v288_v1 }
 0x23c   :  { %v387_v36 = vmul.f32 %v386_v7, %v384_v4  ;;  %v441_v4 = vld [vmem:[%s4370_s4 + $0x8] sm:$0xff] }
 0x23e   :  { %v388_v12 = vxor.u32 2147483648, %v387_v36 }
 0x240   :  { %v389_v18 = vsel %vm306_vm0, %v388_v12, %v387_v36 }
 0x241   :  { %v392_v5 = vsel %vm305_vm1, %v3514_v15, %v389_v18  ;;  %v440_v15 = vld [vmem:[%s4370_s4] sm:$0xff] }
 0x242   :  { %3237 = vcosq.f32 %v392_v5  ;;  %2819 = vmatprep.mubr.msk.f32.mxu1 %vm456_vm10, %v440_v15 }
 0x243   :  { %3239 = vsinq.f32 %v392_v5  ;;  %v3346_v5 = vmov 2  }
 0x244   :  { %v3234_v20 = vpop.eup %3233 }
 0x245   :  { %v3236_v25 = vpop.eup %3235  ;;  %v300_v26 = vxor.u32 2147483648, %v3234_v20 }
 0x246   :  { %v297_v27 = vxor.u32 2147483648, %v3236_v25 }
 0x247   :  { %v301_v29 = vsel %vm299_vm2, %v300_v26, %v3236_v25 }
 0x248   :  { %v298_v28 = vsel %vm296_vm3, %v3234_v20, %v297_v27 }
 0x249   :  { %v302_v33 = vsel %vm295_vm4, %v298_v28, %v301_v29 }
 0x24a   :  { %v303_v19 = vsel %vm292_vm5, nan, %v302_v33 }
 0x24b   :  { %v408_v41 = vmul.f32 %v303_v19, %v303_v19 }
 0x24c   :  { %v3238_v35 = vpop.eup %3237 }
 0x24d   :  { %v3240_v39 = vpop.eup %3239  ;;  %v404_v43 = vxor.u32 2147483648, %v3238_v35  ;;  %v418_v32 = vmul.f32 %v412_v45, %v408_v41  ;;  %v3347_v45 = vmov 3  }
 0x24e   :  { %v401_v46 = vxor.u32 2147483648, %v3240_v39 }
 0x24f   :  { %v405_v47 = vsel %vm403_vm6, %v404_v43, %v3240_v39  ;;  %v420_v56 = vadd.f32 %v418_v32, %v3506_v8  ;;  %v116_v8 = vlaneseq }
 0x250   :  { %v402_v50 = vsel %vm400_vm7, %v3238_v35, %v401_v46 }
 0x251   :  { %v406_v31 = vsel %vm399_vm8, %v402_v50, %v405_v47 }
 0x252   :  { %v407_v51 = vsel %vm396_vm9, nan, %v406_v31 }
 0x253   :  { %v409_v53 = vmul.f32 %v407_v51, %v407_v51 }
 0x255   :  { %v419_v57 = vmul.f32 %v416_v11, %v409_v53  ;;  %v3348_v53 = vmov 14  }
 0x257   :  { %v421_v37 = vadd.f32 %v419_v57, %v3508_v9  ;;  %v3606_v9 = vand.u32 127, %v116_v8 }
 0x259   :  { %v3129_v58 = vpack.i.bf16 %v421_v37, %v420_v56  ;;  %v2935_v22 = vpack.c.bf16 %v421_v37, %v420_v56  ;;  %vm119_vm11 = vcmp.ge.s32.totalorder %v3606_v9, 1  ;;  %vm118_vm13 = vcmp.lt.s32.totalorder %v3606_v9, 127 }
 0x25a   :  { %vm3609_vm12 = vmpackc.low %vm119_vm11, %vm119_vm11 }
 0x25b   :  { %3130 = vrot.lane.b32.xlu1 %v3129_v58, %s3344_s11  ;;  %3125 = vrot.lane.b32.xlu0 %v3129_v58, %s3335_s10  ;;  %vm3618_vm14 = vmpackc.low %vm118_vm13, %vm118_vm13  ;;  %v3349_v58 = vmov 15  }
 0x25f   :  { %453 = vperm.xlu1 %3135, %v3481_v48   ;;  %449 = vperm.xlu0 %3134, %v3486_v49  }
 0x263   :  { %3136 = vset.pattern.permute.xlu1 %v3346_v5  ;;  %3137 = vset.pattern.permute.xlu0 %v3347_v45 }
 0x2cd   :  { %v3126_v59 = vpop.permute.xlu0 %3125  ;;  %v3131_v62 = vpop.permute.xlu1 %3130 }
 0x2ce   :  { %v3128_v60 = vunpack.i.h.bf16 %v3126_v59  ;;  %v3127_v61 = vunpack.i.l.bf16 %v3126_v59  ;;  %v3133_v2 = vunpack.i.h.bf16 %v3131_v62  ;;  %v3132_v3 = vunpack.i.l.bf16 %v3131_v62 }
 0x2d0   :  { %v2929_v0 = vpack.c.bf16 %v3128_v60, %v3127_v61  ;;  %v2939_v1 = vpack.c.bf16 %v3133_v2, %v3132_v3 }
 0x2d2   :  { %2931 = vmatprep.subr.msk.bf16.mxu1 %vm3609_vm12, %v2929_v0 }
 0x2d3   :  { %2934 = vmatpush3.bf16.msk.msra.mxu1 %vm3609_vm12, %v2929_v0 }
 0x2d4   :  { %2936 = vmatprep.subr.bf16.mxu1 %v2935_v22 }
 0x2d7   :  { %2938 = vmatpush3.bf16.msra.mxu1 %v2935_v22 }
 0x2d8   :  { %2941 = vmatprep.subr.msk.bf16.mxu1 %vm3618_vm14, %v2939_v1 }
 0x2db   :  { %2944 = vmatpush3.bf16.msk.msra.mxu1 %vm3618_vm14, %v2939_v1 }
 0x2de   :  { %2820 = vmatmul.mubr.msk.f32.vlgmr.msra.gmra.mrb[0].mxu1 %vm456_vm10, %v441_v4  ;;  %v454_v7 = vpop.permute.xlu1 %453  ;;  %v450_v10 = vpop.permute.xlu0 %449 }
 0x3b1   :  { %v2821_v36 = vpop.f32.mrb[0].mxu1 }
 0x3b2   :  { %v3630_v14 = vadd.f32 %v2821_v36, %v454_v7  ;;  %v529_v17 = vpop.f32.mrb[1].mxu1 }
 0x3b3   :  { %v530_v12 = vadd.f32 %v529_v17, %v450_v10 }
 0x3b4   :  { %540 = vadd.xlane.f32.xlu0 %v3630_v14  ;;  %v543_v16 = vmul.f32 %v3630_v14, %v3630_v14 }
 0x3b5   :  { %538 = vadd.xlane.f32.xlu1 %v530_v12  ;;  %v542_v18 = vmul.f32 %v530_v12, %v530_v12 }
 0x3b8   :  { %544 = vadd.xlane.f32.xlu0 %v542_v18 }
 0x3bc   :  { %546 = vadd.xlane.f32.xlu0 %v543_v16 }
 0x441   :  { %v541_v13 = vpop.xlane.xlu0 %540 }
 0x442   :  { %v539_v20 = vpop.xlane.xlu1 %538  ;;  %v549_v27 = vmul.f32 0.0078125, %v541_v13 }
 0x443   :  { %v548_v24 = vmul.f32 0.0078125, %v539_v20 }
 0x444   :  { %v553_v33 = vmul.f32 %v549_v27, %v549_v27 }
 0x445   :  { %v552_v25 = vmul.f32 %v548_v24, %v548_v24  ;;  %v545_v26 = vpop.xlane.xlu0 %544 }
 0x446   :  { %v550_v29 = vmul.f32 0.0078125, %v545_v26 }
 0x448   :  { %v554_v30 = vsub.f32 %v550_v29, %v552_v25 }
 0x449   :  { %v547_v28 = vpop.xlane.xlu0 %546 }
 0x44a   :  { %v556_v19 = vmax.f32 %v554_v30, 0.0  ;;  %v551_v21 = vmul.f32 0.0078125, %v547_v28 }
 0x44c   :  { %v558_v35 = vadd.f32 1e-05, %v556_v19  ;;  %v555_v39 = vsub.f32 %v551_v21, %v553_v33 }
 0x44e   :  { %3241 = vrsqrt.f32 %v558_v35  ;;  %v557_v41 = vmax.f32 %v555_v39, 0.0 }
 0x450   :  { %v559_v43 = vadd.f32 1e-05, %v557_v41 }
 0x452   :  { %3243 = vrsqrt.f32 %v559_v43 }
 0x458   :  { %v3242_v46 = vpop.eup %3241 }
 0x459   :  { %v562_v47 = vmul.f32 %v3242_v46, %v3492_v54 }
 0x45b   :  { %v564_v50 = vmul.f32 %v562_v47, %v548_v24 }
 0x45c   :  { %v3244_v32 = vpop.eup %3243 }
 0x45d   :  { %568 = vrot.lane.b32.xlu1 %v564_v50, %s3335_s10  ;;  %v563_v31 = vmul.f32 %v3244_v32, %v3489_v52 }
 0x45f   :  { %v565_v51 = vmul.f32 %v563_v31, %v549_v27 }
 0x461   :  { %578 = vperm.xlu1 %3136, %v562_v47   ;;  %570 = vrot.lane.b32.xlu0 %v565_v51, %s3335_s10 }
 0x465   :  { %583 = vperm.xlu1 %3136, %v563_v31  }
 0x469   :  { %3138 = vset.pattern.permute.xlu1 %v3348_v53 }
 0x46a   :  { %601 = vperm.xlu1 %3138, %v3486_v49  }
 0x46e   :  { %3139 = vset.pattern.permute.xlu1 %v3347_v45 }
 0x4cf   :  { %v569_v11 = vpop.permute.xlu1 %568 }
 0x4d0   :  { %v574_v56 = vsub.f32 %v3492_v54, %v569_v11 }
 0x4d2   :  { %590 = vperm.xlu1 %3139, %v574_v56  }
 0x4d3   :  { %v571_v57 = vpop.permute.xlu0 %570 }
 0x4d4   :  { %v575_v37 = vsub.f32 %v3489_v52, %v571_v57 }
 0x4d6   :  { %595 = vperm.xlu0 %3137, %v575_v37   ;;  %3140 = vset.pattern.permute.xlu1 %v3348_v53 }
 0x4d7   :  { %605 = vperm.xlu1 %3140, %v3481_v48  }
 0x4da   :  { %3141 = vset.pattern.permute.xlu0 %v3349_v58 }
 0x4db   :  { %821 = vperm.xlu0 %3141, %v3486_v49   ;;  %3142 = vset.pattern.permute.xlu1 %v3349_v58 }
 0x4dc   :  { %825 = vperm.xlu1 %3142, %v3481_v48  }
 0x4e0   :  { %v579_v22 = vpop.permute.xlu1 %578 }
 0x4e1   :  { %v586_v8 = vmul.f32 %v579_v22, %v530_v12 }
 0x4e4   :  { %v584_v15 = vpop.permute.xlu1 %583 }
 0x4e5   :  { %v587_v61 = vmul.f32 %v584_v15, %v3630_v14 }
 0x4e9   :  { %v602_v23 = vpop.permute.xlu1 %601 }
 0x551   :  { %v591_v59 = vpop.permute.xlu1 %590 }
 0x552   :  { %v3645_v60 = vadd.f32 %v591_v59, %v586_v8 }
 0x554   :  { %v3649_v62 = vmul.f32 %v602_v23, %v3645_v60 }
 0x555   :  { %v596_v0 = vpop.permute.xlu0 %595 }
 0x556   :  { %v613_v2 = vand.u32 2139095040, %v3649_v62  ;;  %v3652_v3 = vadd.f32 %v596_v0, %v587_v61  ;;  %v606_v49 = vpop.permute.xlu1 %605  ;;  %v610_v36 = vand.u32 2147483647, %v3649_v62 }
 0x558   :  { %v614_v1 = vshrl.u32 %v613_v2, 23  ;;  %v3655_v48 = vmul.f32 %v606_v49, %v3652_v3  ;;  %v3664_v16 = vand.u32 8388607, %v610_v36 }
 0x55a   :  { %v2622_v4 = vadd.s32 4294967169, %v614_v1  ;;  %v714_v7 = vand.u32 2147483647, %v3655_v48  ;;  %v717_v10 = vand.u32 2139095040, %v3655_v48  ;;  %v618_v27 = vor.u32 8388608, %v3664_v16 }
 0x55c   :  { %v620_v14 = vadd.s32 1, %v2622_v4  ;;  %v718_v17 = vshrl.u32 %v717_v10, 23  ;;  %v721_v12 = vand.u32 8388607, %v714_v7 }
 0x55e   :  { %vm621_vm15 = vcmp.gt.s32.totalorder %v620_v14, 0  ;;  %v2626_v18 = vadd.s32 4294967169, %v718_v17  ;;  %v722_v13 = vor.u32 8388608, %v721_v12 }
 0x55f   :  { %v622_v5 = vsel %vm621_vm15, %v620_v14, 0 }
 0x560   :  { %v3666_v20 = vshrl.u32 %v622_v5, 5  ;;  %v624_v24 = vand.u32 31, %v622_v5  ;;  %v724_v25 = vadd.s32 1, %v2626_v18  ;;  %v3671_v28 = vshll.u32 %v722_v13, 8 }
 0x562   :  { %v625_v26 = vsub.s32 32, %v624_v24  ;;  %v636_v29 = vshll.u32 %v3341_v42, %v624_v24  ;;  %v639_v30 = vshll.u32 %v3342_v44, %v624_v24  ;;  %vm725_vm0 = vcmp.gt.s32.totalorder %v724_v25, 0 }
 0x563   :  { %vm645_vm1 = vcmp.lt.s32.totalorder %v3666_v20, 4  ;;  %v726_v21 = vsel %vm725_vm0, %v724_v25, 0  ;;  %v627_v39 = vshll.u32 %v3338_v34, %v624_v24  ;;  %v630_v41 = vshll.u32 %v3339_v38, %v624_v24 }
 0x564   :  { %v637_v33 = vshrl.u32 %v3342_v44, %v625_v26  ;;  %v640_v19 = vshrl.u32 %v3343_v55, %v625_v26  ;;  %v728_v35 = vand.u32 31, %v726_v21  ;;  %v633_v43 = vshll.u32 %v3340_v40, %v624_v24 }
 0x565   :  { %v727_v46 = vshrl.u32 %v726_v21, 5  ;;  %v628_v47 = vshrl.u32 %v3339_v38, %v625_v26  ;;  %v631_v50 = vshrl.u32 %v3340_v40, %v625_v26  ;;  %v634_v53 = vshrl.u32 %v3341_v42, %v625_v26 }
 0x566   :  { %v638_v45 = vor.u32 %v637_v33, %v636_v29  ;;  %v641_v32 = vor.u32 %v640_v19, %v639_v30  ;;  %v729_v31 = vsub.s32 32, %v728_v35  ;;  %v731_v51 = vshll.u32 %v3338_v34, %v728_v35 }
 0x567   :  { %v734_v56 = vshll.u32 %v3339_v38, %v728_v35  ;;  %v737_v57 = vshll.u32 %v3340_v40, %v728_v35  ;;  %v740_v37 = vshll.u32 %v3341_v42, %v728_v35  ;;  %v743_v23 = vshll.u32 %v3342_v44, %v728_v35 }
 0x568   :  { %v651_v11 = vsel %vm645_vm1, %v638_v45, 920167782  ;;  %v732_v58 = vshrl.u32 %v3339_v38, %v729_v31  ;;  %v735_v22 = vshrl.u32 %v3340_v40, %v729_v31  ;;  %v738_v15 = vshrl.u32 %v3341_v42, %v729_v31 }
 0x569   :  { %vm642_vm2 = vcmp.lt.s32.totalorder %v3666_v20, 1  ;;  %v730_v8 = vshrl.u32 %v3338_v34, %v729_v31  ;;  %v741_v59 = vshrl.u32 %v3342_v44, %v729_v31  ;;  %v744_v61 = vshrl.u32 %v3343_v55, %v729_v31 }
 0x56a   :  { %vm746_vm3 = vcmp.lt.s32.totalorder %v727_v46, 1  ;;  %v733_v0 = vor.u32 %v732_v58, %v731_v51  ;;  %v736_v2 = vor.u32 %v735_v22, %v734_v56  ;;  %v739_v49 = vor.u32 %v738_v15, %v737_v57 }
 0x56b   :  { %vm748_vm4 = vcmp.lt.s32.totalorder %v727_v46, 3  ;;  %v742_v1 = vor.u32 %v741_v59, %v740_v37  ;;  %v745_v4 = vor.u32 %v744_v61, %v743_v23  ;;  %vm749_vm5 = vcmp.lt.s32.totalorder %v727_v46, 4 }
 0x56c   :  { %v629_v10 = vor.u32 %v628_v47, %v627_v39  ;;  %v750_v14 = vsel %vm746_vm3, %v730_v8, %v733_v0  ;;  %v751_v17 = vsel %vm749_vm5, %v739_v49, 2102212464  ;;  %v754_v12 = vsel %vm746_vm3, %v733_v0, %v736_v2 }
 0x56d   :  { %v758_v18 = vsel %vm746_vm3, %v736_v2, %v739_v49  ;;  %v752_v5 = vsel %vm748_vm4, %v736_v2, %v751_v17  ;;  %v755_v13 = vsel %vm749_vm5, %v742_v1, 920167782  ;;  %v759_v24 = vsel %vm749_vm5, %v745_v4, 1326507024 }
 0x56e   :  { %v632_v25 = vor.u32 %v631_v50, %v630_v41  ;;  %vm747_vm6 = vcmp.lt.s32.totalorder %v727_v46, 2  ;;  %v756_v29 = vsel %vm748_vm4, %v739_v49, %v755_v13  ;;  %v760_v30 = vsel %vm748_vm4, %v742_v1, %v759_v24 }
 0x56f   :  { %v635_v33 = vor.u32 %v634_v53, %v633_v43  ;;  %v655_v19 = vsel %vm645_vm1, %v641_v32, 1326507024  ;;  %v753_v21 = vsel %vm747_vm6, %v750_v14, %v752_v5  ;;  %v757_v35 = vsel %vm747_vm6, %v754_v12, %v756_v29 }
 0x570   :  { %v761_v31 = vsel %vm747_vm6, %v758_v18, %v760_v30  ;;  %v3703_v51 = vmul.u32.u64.low %v3671_v28, %v757_v35  ;;  %v3704_v56 = vmul.u32.u64.high %v3671_v28, %v757_v35, %v3703_v51  ;;  %v626_v41 = vshrl.u32 %v3338_v34, %v625_v26 }
 0x571   :  { %v3699_v39 = vmul.u32.u64.low %v3671_v28, %v761_v31  ;;  %v3700_v47 = vmul.u32.u64.high %v3671_v28, %v761_v31, %v3699_v39  ;;  %vm644_vm7 = vcmp.lt.s32.totalorder %v3666_v20, 3  ;;  %v647_v43 = vsel %vm645_vm1, %v635_v33, 2102212464 }
 0x572   :  { %v650_v46 = vsel %vm642_vm2, %v629_v10, %v632_v25  ;;  %vm643_vm8 = vcmp.lt.s32.totalorder %v3666_v20, 2  ;;  %v652_v50 = vsel %vm644_vm7, %v635_v33, %v651_v11  ;;  %v654_v32 = vsel %vm642_vm2, %v632_v25, %v635_v33 }
 0x573   :  { %v656_v53 = vsel %vm644_vm7, %v638_v45, %v655_v19  ;;  %v769_v26 = vmul.u32 %v3671_v28, %v753_v21  ;;  %v653_v57 = vsel %vm643_vm8, %v650_v46, %v652_v50  ;;  %v658_v58 = vshll.u32 %v618_v27, 8 }
 0x574   :  { %v657_v37 = vsel %vm643_vm8, %v654_v32, %v656_v53  ;;  %vm771_vm9 = vc.u32 %v3700_v47, %v3703_v51  ;;  %v772_v11 = vadd.s32 1, %v3704_v56  ;;  %v646_v22 = vsel %vm642_vm2, %v626_v41, %v629_v10 }
 0x575   :  { %v648_v45 = vsel %vm644_vm7, %v632_v25, %v647_v43  ;;  %v3732_v28 = vmul.u32.u64.low %v658_v58, %v657_v37  ;;  %v3733_v15 = vmul.u32.u64.high %v658_v58, %v657_v37, %v3732_v28  ;;  %v770_v21 = vadd.s32 %v3703_v51, %v3700_v47 }
 0x576   :  { %v3735_v23 = vmul.u32.u64.low %v658_v58, %v653_v57  ;;  %v3736_v8 = vmul.u32.u64.high %v658_v58, %v653_v57, %v3735_v23  ;;  %v773_v59 = vsel %vm771_vm9, %v772_v11, %v3704_v56  ;;  %v649_v27 = vsel %vm643_vm8, %v646_v22, %v648_v45 }
 0x577   :  { %v774_v16 = vadd.s32 %v773_v59, %v769_v26  ;;  %v665_v2 = vmul.u32 %v658_v58, %v649_v27  ;;  %vm716_vm0 = vcmp.lt.s32.totalorder %v3655_v48, 0  ;;  %vm715_vm1 = vcmp.le.f32.partialorder %v714_v7, 0.7853982 }
 0x578   :  { %vm667_vm11 = vc.u32 %v3733_v15, %v3735_v23  ;;  %v668_v0 = vadd.s32 1, %v3736_v8  ;;  %v666_v53 = vadd.s32 %v3735_v23, %v3733_v15  ;;  %vm612_vm2 = vcmp.lt.s32.totalorder %v3649_v62, 0 }
 0x579   :  { %v775_v61 = vadd.s32 536870912, %v774_v16  ;;  %vm611_vm3 = vcmp.le.f32.partialorder %v610_v36, 0.7853982  ;;  %vm806_vm7 = vweird.f32 %v3655_v48 }
 0x57a   :  { %v669_v1 = vsel %vm667_vm11, %v668_v0, %v3736_v8 }
 0x57b   :  { %v776_v49 = vshrl.u32 %v775_v61, 30  ;;  %v670_v4 = vadd.s32 %v669_v1, %v665_v2 }
 0x57d   :  { %v777_v10 = vshll.u32 %v776_v49, 30  ;;  %v671_v14 = vadd.s32 536870912, %v670_v4  ;;  %v800_v59 = vsub.s32 4, %v776_v49 }
 0x57f   :  { %v778_v17 = vsub.s32 %v774_v16, %v777_v10  ;;  %v672_v12 = vshrl.u32 %v671_v14, 30  ;;  %v801_v15 = vsel %vm716_vm0, %v800_v59, %v776_v49 }
 0x580   :  { %v803_v14 = vsel %vm715_vm1, 0, %v801_v15 }
 0x581   :  { %v780_v18 = vsub.s32 0, %v778_v17  ;;  %v673_v5 = vshll.u32 %v672_v12, 30  ;;  %v696_v1 = vsub.s32 4, %v672_v12 }
 0x583   :  { %v2627_v13 = vmin.u32 %v780_v18, %v778_v17  ;;  %v674_v24 = vsub.s32 %v670_v4, %v673_v5  ;;  %v697_v18 = vsel %vm612_vm2, %v696_v1, %v672_v12 }
 0x584   :  { %v699_v7 = vsel %vm611_vm3, 0, %v697_v18 }
 0x585   :  { %v782_v20 = vclz %v2627_v13  ;;  %v676_v25 = vsub.s32 0, %v674_v24  ;;  %v807_v13 = vadd.s32 3, %v803_v14 }
 0x587   :  { %v2628_v29 = vadd.s32 4294967294, %v782_v20  ;;  %v2623_v30 = vmin.u32 %v676_v25, %v674_v24  ;;  %v808_v49 = vand.u32 3, %v807_v13 }
 0x589   :  { %vm2629_vm13 = vcmp.lt.s32.totalorder %v2628_v29, 0  ;;  %v678_v19 = vclz %v2623_v30  ;;  %vm813_vm4 = vcmp.eq.s32.totalorder %v808_v49, 2  ;;  %vm810_vm5 = vcmp.eq.s32.totalorder %v808_v49, 0 }
 0x58a   :  { %v785_v33 = vsel %vm2629_vm13, 0, %v2628_v29  ;;  %vm809_vm6 = vcmp.lt.s32.totalorder %v808_v49, 2  ;;  %vm702_vm13 = vweird.f32 %v3649_v62 }
 0x58b   :  { %v786_v35 = vsub.s32 32, %v785_v33  ;;  %v790_v31 = vsub.s32 4294967266, %v785_v33  ;;  %v2624_v39 = vadd.s32 4294967294, %v678_v19  ;;  %v787_v56 = vshll.u32 %v778_v17, %v785_v33 }
 0x58d   :  { %v788_v41 = vshrl.u32 %v770_v21, %v786_v35  ;;  %v791_v43 = vadd.s32 127, %v790_v31  ;;  %vm2625_vm15 = vcmp.lt.s32.totalorder %v2624_v39, 0 }
 0x58e   :  { %v681_v32 = vsel %vm2625_vm15, 0, %v2624_v39 }
 0x58f   :  { %v789_v46 = vor.u32 %v788_v41, %v787_v56  ;;  %v792_v50 = vshll.u32 %v791_v43, 23  ;;  %v682_v26 = vsub.s32 32, %v681_v32  ;;  %v686_v57 = vsub.s32 4294967266, %v681_v32  ;;  %v826_v41 = vpop.permute.xlu1 %825 }
 0x590   :  { %v683_v58 = vshll.u32 %v674_v24, %v681_v32  ;;  %v703_v24 = vadd.s32 3, %v699_v7 }
 0x591   :  { %v793_v37 = vor.u32 4788187, %v792_v50  ;;  %v684_v11 = vshrl.u32 %v666_v53, %v682_v26  ;;  %v687_v22 = vadd.s32 127, %v686_v57  ;;  %v796_v47 = vcvt.s32.f32 %v789_v46  ;;  %v822_v57 = vpop.permute.xlu0 %821 }
 0x592   :  { %v704_v33 = vand.u32 3, %v703_v24  ;;  %v3351_v24 = vmov 4  }
 0x593   :  { %v794_v45 = vand.u32 2147483647, %v793_v37  ;;  %v685_v51 = vor.u32 %v684_v11, %v683_v58  ;;  %v688_v28 = vshll.u32 %v687_v22, 23 }
 0x594   :  { %vm709_vm8 = vcmp.eq.s32.totalorder %v704_v33, 2  ;;  %vm706_vm9 = vcmp.eq.s32.totalorder %v704_v33, 0  ;;  %vm705_vm11 = vcmp.lt.s32.totalorder %v704_v33, 2 }
 0x595   :  { %v797_v8 = vmul.f32 %v796_v47, %v794_v45  ;;  %v689_v16 = vor.u32 4788187, %v688_v28  ;;  %v692_v0 = vcvt.s32.f32 %v685_v51  ;;  %v3350_v47 = vmov 25  }
 0x596   :  { %3154 = vset.pattern.permute.xlu0 %v3350_v47  ;;  %3153 = vset.pattern.permute.xlu1 %v3350_v47  ;;  %v3354_v47 = vmov 17  }
 0x597   :  { %v798_v27 = vxor.u32 2147483648, %v797_v8  ;;  %v690_v61 = vand.u32 2147483647, %v689_v16 }
 0x599   :  { %v799_v2 = vsel %vm716_vm0, %v798_v27, %v797_v8  ;;  %v693_v23 = vmul.f32 %v692_v0, %v690_v61 }
 0x59a   :  { %v802_v4 = vsel %vm715_vm1, %v3655_v48, %v799_v2  ;;  %v2631_v2 = vld [vmem:[%s4370_s4 + $0x18] sm:$0xff] }
 0x59b   :  { %3245 = vcosq.f32 %v802_v4  ;;  %v694_v10 = vxor.u32 2147483648, %v693_v23 }
 0x59c   :  { %3247 = vsinq.f32 %v802_v4 }
 0x59d   :  { %v695_v17 = vsel %vm612_vm2, %v694_v10, %v693_v23 }
 0x59e   :  { %v698_v5 = vsel %vm611_vm3, %v3649_v62, %v695_v17  ;;  %v2630_v62 = vld [vmem:[%s4370_s4 + $0x10] sm:$0xff]  ;;  %v3303_v17 = vld [vmem:[%s4366_s0 + $0x8] sm:$0xff] }
 0x59f   :  { %3249 = vcosq.f32 %v698_v5  ;;  %2834 = vmatprep.mubr.msk.f32.mxu1 %vm456_vm10, %v2630_v62  ;;  %v3353_v62 = vmov 16  }
 0x5a0   :  { %3251 = vsinq.f32 %v698_v5  ;;  %v3304_v5 = vld [vmem:[%s4366_s0] sm:$0xff]  ;;  %s3355_s0 = smov 125  }
 0x5a5   :  { %v3246_v20 = vpop.eup %3245 }
 0x5a6   :  { %v3248_v25 = vpop.eup %3247  ;;  %v814_v29 = vxor.u32 2147483648, %v3246_v20 }
 0x5a7   :  { %v811_v30 = vxor.u32 2147483648, %v3248_v25 }
 0x5a8   :  { %v815_v19 = vsel %vm813_vm4, %v814_v29, %v3248_v25 }
 0x5a9   :  { %v812_v36 = vsel %vm810_vm5, %v3246_v20, %v811_v30  ;;  %v3250_v21 = vpop.eup %3249 }
 0x5aa   :  { %v816_v12 = vsel %vm809_vm6, %v812_v36, %v815_v19  ;;  %v3252_v35 = vpop.eup %3251  ;;  %v710_v31 = vxor.u32 2147483648, %v3250_v21 }
 0x5ab   :  { %v817_v39 = vsel %vm806_vm7, nan, %v816_v12  ;;  %v707_v56 = vxor.u32 2147483648, %v3252_v35 }
 0x5ac   :  { %v819_v43 = vmul.f32 %v817_v39, %v817_v39  ;;  %v711_v46 = vsel %vm709_vm8, %v710_v31, %v3252_v35 }
 0x5ad   :  { %v708_v50 = vsel %vm706_vm9, %v3250_v21, %v707_v56 }
 0x5ae   :  { %v712_v32 = vsel %vm705_vm11, %v708_v50, %v711_v46  ;;  %v829_v53 = vmul.f32 %v826_v41, %v819_v43  ;;  %v3352_v50 = vmov 5  }
 0x5af   :  { %v713_v26 = vsel %vm702_vm13, nan, %v712_v32 }
 0x5b0   :  { %v818_v37 = vmul.f32 %v713_v26, %v713_v26  ;;  %v831_v58 = vadd.f32 %v829_v53, %v3652_v3  ;;  %v3767_v3 = vld [vmem:[%s4369_s3 + $0x8] sm:$0xff] }
 0x5b2   :  { %v828_v48 = vmul.f32 %v822_v57, %v818_v37 }
 0x5b4   :  { %v830_v11 = vadd.f32 %v828_v48, %v3645_v60  ;;  %v3773_v60 = vld [vmem:[%s4369_s3] sm:$0xff] }
 0x5b6   :  { %v3148_v22 = vpack.i.bf16 %v831_v58, %v830_v11  ;;  %v2951_v45 = vpack.c.bf16 %v831_v58, %v830_v11 }
 0x5b8   :  { %3149 = vrot.lane.b32.xlu0 %v3148_v22, %s3344_s11  ;;  %3144 = vrot.lane.b32.xlu1 %v3148_v22, %s3335_s10 }
 0x5bc   :  { %864 = vperm.xlu0 %3154, %v3767_v3   ;;  %860 = vperm.xlu1 %3153, %v3773_v60  }
 0x5c0   :  { %3155 = vset.pattern.permute.xlu1 %v3351_v24  ;;  %3158 = vset.pattern.permute.xlu0 %v3352_v50 }
 0x62a   :  { %v3145_v51 = vpop.permute.xlu1 %3144  ;;  %v3150_v59 = vpop.permute.xlu0 %3149 }
 0x62b   :  { %v3147_v28 = vunpack.i.h.bf16 %v3145_v51  ;;  %v3146_v8 = vunpack.i.l.bf16 %v3145_v51  ;;  %v3152_v27 = vunpack.i.h.bf16 %v3150_v59  ;;  %v3151_v61 = vunpack.i.l.bf16 %v3150_v59 }
 0x62d   :  { %v2945_v16 = vpack.c.bf16 %v3147_v28, %v3146_v8  ;;  %v2955_v0 = vpack.c.bf16 %v3152_v27, %v3151_v61 }
 0x62f   :  { %2947 = vmatprep.subr.msk.bf16.mxu1 %vm3609_vm12, %v2945_v16 }
 0x630   :  { %2950 = vmatpush3.bf16.msk.msra.mxu1 %vm3609_vm12, %v2945_v16 }
 0x631   :  { %2952 = vmatprep.subr.bf16.mxu1 %v2951_v45 }
 0x634   :  { %2954 = vmatpush3.bf16.msra.mxu1 %v2951_v45 }
 0x635   :  { %2957 = vmatprep.subr.msk.bf16.mxu1 %vm3618_vm14, %v2955_v0 }
 0x638   :  { %2960 = vmatpush3.bf16.msk.msra.mxu1 %vm3618_vm14, %v2955_v0 }
 0x63b   :  { %2835 = vmatmul.mubr.msk.f32.vlgmr.msra.gmra.mrb[2].mxu1 %vm456_vm10, %v2631_v2  ;;  %v865_v15 = vpop.permute.xlu0 %864  ;;  %v861_v23 = vpop.permute.xlu1 %860 }
 0x70e   :  { %v2836_v1 = vpop.f32.mrb[2].mxu1 }
 0x70f   :  { %v945_v4 = vadd.f32 %v2836_v1, %v865_v15  ;;  %v939_v10 = vpop.f32.mrb[3].mxu1 }
 0x710   :  { %v940_v14 = vadd.f32 %v939_v10, %v861_v23 }
 0x711   :  { %v3791_v18 = vadd.f32 %v3303_v17, %v945_v4 }
 0x712   :  { %v3796_v13 = vadd.f32 %v3304_v5, %v940_v14 }
 0x713   :  { %952 = vadd.xlane.f32.xlu0 %v3791_v18  ;;  %v955_v49 = vmul.f32 %v3791_v18, %v3791_v18 }
 0x714   :  { %950 = vadd.xlane.f32.xlu1 %v3796_v13  ;;  %v954_v7 = vmul.f32 %v3796_v13, %v3796_v13 }
 0x717   :  { %956 = vadd.xlane.f32.xlu0 %v954_v7 }
 0x718   :  { %958 = vadd.xlane.f32.xlu1 %v955_v49 }
 0x7a0   :  { %v953_v20 = vpop.xlane.xlu0 %952 }
 0x7a1   :  { %v951_v25 = vpop.xlane.xlu1 %950  ;;  %v961_v29 = vmul.f32 0.0078125, %v953_v20 }
 0x7a2   :  { %v960_v30 = vmul.f32 0.0078125, %v951_v25 }
 0x7a3   :  { %v965_v12 = vmul.f32 %v961_v29, %v961_v29 }
 0x7a4   :  { %v964_v33 = vmul.f32 %v960_v30, %v960_v30  ;;  %v957_v19 = vpop.xlane.xlu0 %956 }
 0x7a5   :  { %v962_v36 = vmul.f32 0.0078125, %v957_v19  ;;  %v959_v21 = vpop.xlane.xlu1 %958 }
 0x7a6   :  { %v963_v35 = vmul.f32 0.0078125, %v959_v21 }
 0x7a7   :  { %v966_v31 = vsub.f32 %v962_v36, %v964_v33 }
 0x7a8   :  { %v967_v39 = vsub.f32 %v963_v35, %v965_v12 }
 0x7a9   :  { %v968_v56 = vmax.f32 %v966_v31, 0.0 }
 0x7aa   :  { %v969_v41 = vmax.f32 %v967_v39, 0.0 }
 0x7ab   :  { %v970_v43 = vadd.f32 1e-05, %v968_v56 }
 0x7ac   :  { %v971_v46 = vadd.f32 1e-05, %v969_v41 }
 0x7ad   :  { %3253 = vrsqrt.f32 %v970_v43 }
 0x7ae   :  { %3255 = vrsqrt.f32 %v971_v46 }
 0x7b7   :  { %v3254_v32 = vpop.eup %3253 }
 0x7b8   :  { %v3256_v53 = vpop.eup %3255  ;;  %v974_v26 = vmul.f32 %v3254_v32, %v3492_v54 }
 0x7b9   :  { %v975_v57 = vmul.f32 %v3256_v53, %v3489_v52 }
 0x7ba   :  { %v976_v37 = vmul.f32 %v974_v26, %v960_v30 }
 0x7bb   :  { %v977_v48 = vmul.f32 %v975_v57, %v961_v29 }
 0x7bc   :  { %980 = vrot.lane.b32.xlu0 %v976_v37, %s3335_s10 }
 0x7bd   :  { %982 = vrot.lane.b32.xlu1 %v977_v48, %s3335_s10 }
 0x7c1   :  { %990 = vperm.xlu1 %3155, %v974_v26  }
 0x7c5   :  { %995 = vperm.xlu1 %3155, %v975_v57  }
 0x7c9   :  { %3156 = vset.pattern.permute.xlu1 %v3352_v50 }
 0x82e   :  { %v981_v58 = vpop.permute.xlu0 %980 }
 0x82f   :  { %v986_v11 = vsub.f32 %v3492_v54, %v981_v58  ;;  %v983_v22 = vpop.permute.xlu1 %982 }
 0x830   :  { %v987_v45 = vsub.f32 %v3489_v52, %v983_v22 }
 0x831   :  { %1002 = vperm.xlu0 %3158, %v986_v11  }
 0x832   :  { %1007 = vperm.xlu1 %3156, %v987_v45  }
 0x835   :  { %3159 = vset.pattern.permute.xlu0 %v3353_v62 }
 0x836   :  { %3157 = vset.pattern.permute.xlu1 %v3353_v62  ;;  %1017 = vperm.xlu0 %3159, %v3767_v3  }
 0x837   :  { %1013 = vperm.xlu1 %3157, %v3773_v60  }
 0x83b   :  { %3160 = vset.pattern.permute.xlu1 %v3354_v47 }
 0x83c   :  { %1233 = vperm.xlu1 %3160, %v3773_v60  }
 0x840   :  { %1237 = vperm.xlu1 %3160, %v3767_v3   ;;  %v991_v51 = vpop.permute.xlu1 %990 }
 0x841   :  { %v998_v27 = vmul.f32 %v991_v51, %v3796_v13 }
 0x844   :  { %v996_v28 = vpop.permute.xlu1 %995 }
 0x845   :  { %v999_v16 = vmul.f32 %v996_v28, %v3791_v18 }
 0x8b0   :  { %v1003_v8 = vpop.permute.xlu0 %1002 }
 0x8b1   :  { %v1008_v59 = vpop.permute.xlu1 %1007  ;;  %v3818_v0 = vadd.f32 %v1003_v8, %v998_v27 }
 0x8b2   :  { %v3816_v61 = vadd.f32 %v1008_v59, %v999_v16 }
 0x8b5   :  { %v1018_v2 = vpop.permute.xlu0 %1017 }
 0x8b6   :  { %v3821_v15 = vmul.f32 %v1018_v2, %v3816_v61  ;;  %v1014_v23 = vpop.permute.xlu1 %1013 }
 0x8b7   :  { %v3824_v1 = vmul.f32 %v1014_v23, %v3818_v0 }
 0x8b8   :  { %v1126_v4 = vand.u32 2147483647, %v3821_v15  ;;  %v1129_v10 = vand.u32 2139095040, %v3821_v15 }
 0x8b9   :  { %v1025_v14 = vand.u32 2139095040, %v3824_v1  ;;  %v1022_v7 = vand.u32 2147483647, %v3824_v1 }
 0x8ba   :  { %v1130_v17 = vshrl.u32 %v1129_v10, 23  ;;  %v1133_v5 = vand.u32 8388607, %v1126_v4 }
 0x8bb   :  { %v1026_v49 = vshrl.u32 %v1025_v14, 23  ;;  %v1029_v30 = vand.u32 8388607, %v1022_v7 }
 0x8bc   :  { %v2638_v24 = vadd.s32 4294967169, %v1130_v17  ;;  %v1134_v29 = vor.u32 8388608, %v1133_v5 }
 0x8bd   :  { %v2634_v20 = vadd.s32 4294967169, %v1026_v49  ;;  %v1030_v31 = vor.u32 8388608, %v1029_v30 }
 0x8be   :  { %v1136_v25 = vadd.s32 1, %v2638_v24  ;;  %v3834_v35 = vshll.u32 %v1134_v29, 8 }
 0x8bf   :  { %v1032_v33 = vadd.s32 1, %v2634_v20 }
 0x8c0   :  { %vm1137_vm15 = vcmp.gt.s32.totalorder %v1136_v25, 0 }
 0x8c1   :  { %v1138_v19 = vsel %vm1137_vm15, %v1136_v25, 0  ;;  %vm1033_vm0 = vcmp.gt.s32.totalorder %v1032_v33, 0 }
 0x8c2   :  { %v1139_v36 = vshrl.u32 %v1138_v19, 5  ;;  %v1140_v21 = vand.u32 31, %v1138_v19  ;;  %v1034_v12 = vsel %vm1033_vm0, %v1032_v33, 0  ;;  %vm1128_vm0 = vcmp.lt.s32.totalorder %v3821_v15, 0 }
 0x8c3   :  { %v3837_v41 = vshrl.u32 %v1034_v12, 5  ;;  %v1036_v43 = vand.u32 31, %v1034_v12 }
 0x8c4   :  { %v1141_v39 = vsub.s32 32, %v1140_v21  ;;  %v1143_v56 = vshll.u32 %v3338_v34, %v1140_v21  ;;  %v1146_v46 = vshll.u32 %v3339_v38, %v1140_v21  ;;  %v1149_v50 = vshll.u32 %v3340_v40, %v1140_v21 }
 0x8c5   :  { %v1152_v32 = vshll.u32 %v3341_v42, %v1140_v21  ;;  %v1155_v53 = vshll.u32 %v3342_v44, %v1140_v21  ;;  %vm1158_vm1 = vcmp.lt.s32.totalorder %v1139_v36, 1  ;;  %vm1159_vm2 = vcmp.lt.s32.totalorder %v1139_v36, 2 }
 0x8c6   :  { %v1144_v26 = vshrl.u32 %v3339_v38, %v1141_v39  ;;  %v1147_v57 = vshrl.u32 %v3340_v40, %v1141_v39  ;;  %v1150_v37 = vshrl.u32 %v3341_v42, %v1141_v39  ;;  %v1142_v48 = vshrl.u32 %v3338_v34, %v1141_v39 }
 0x8c7   :  { %v1153_v58 = vshrl.u32 %v3342_v44, %v1141_v39  ;;  %v1156_v11 = vshrl.u32 %v3343_v55, %v1141_v39  ;;  %v1037_v47 = vsub.s32 32, %v1036_v43  ;;  %vm1160_vm3 = vcmp.lt.s32.totalorder %v1139_v36, 3 }
 0x8c8   :  { %v1145_v22 = vor.u32 %v1144_v26, %v1143_v56  ;;  %v1148_v45 = vor.u32 %v1147_v57, %v1146_v46  ;;  %v1151_v62 = vor.u32 %v1150_v37, %v1149_v50  ;;  %vm1161_vm4 = vcmp.lt.s32.totalorder %v1139_v36, 4 }
 0x8c9   :  { %v1154_v51 = vor.u32 %v1153_v58, %v1152_v32  ;;  %v1157_v28 = vor.u32 %v1156_v11, %v1155_v53  ;;  %v1039_v14 = vshll.u32 %v3338_v34, %v1036_v43  ;;  %v1040_v49 = vshrl.u32 %v3339_v38, %v1037_v47 }
 0x8ca   :  { %v1162_v8 = vsel %vm1158_vm1, %v1142_v48, %v1145_v22  ;;  %v1163_v59 = vsel %vm1161_vm4, %v1151_v62, 2102212464  ;;  %v1166_v16 = vsel %vm1158_vm1, %v1145_v22, %v1148_v45  ;;  %v1170_v27 = vsel %vm1158_vm1, %v1148_v45, %v1151_v62 }
 0x8cb   :  { %v1164_v2 = vsel %vm1160_vm3, %v1148_v45, %v1163_v59  ;;  %v1167_v23 = vsel %vm1161_vm4, %v1154_v51, 920167782  ;;  %v1171_v10 = vsel %vm1161_vm4, %v1157_v28, 1326507024  ;;  %v1042_v24 = vshll.u32 %v3339_v38, %v1036_v43 }
 0x8cc   :  { %v1168_v17 = vsel %vm1160_vm3, %v1151_v62, %v1167_v23  ;;  %v1172_v5 = vsel %vm1160_vm3, %v1154_v51, %v1171_v10  ;;  %v1165_v20 = vsel %vm1159_vm2, %v1162_v8, %v1164_v2  ;;  %v1043_v30 = vshrl.u32 %v3340_v40, %v1037_v47 }
 0x8cd   :  { %v1169_v25 = vsel %vm1159_vm2, %v1166_v16, %v1168_v17  ;;  %v1173_v29 = vsel %vm1159_vm2, %v1170_v27, %v1172_v5  ;;  %v1041_v39 = vor.u32 %v1040_v49, %v1039_v14  ;;  %v1045_v46 = vshll.u32 %v3340_v40, %v1036_v43 }
 0x8ce   :  { %v3860_v33 = vmul.u32.u64.low %v3834_v35, %v1173_v29  ;;  %v3861_v19 = vmul.u32.u64.high %v3834_v35, %v1173_v29, %v3860_v33  ;;  %v3864_v21 = vmul.u32.u64.low %v3834_v35, %v1169_v25  ;;  %v3865_v12 = vmul.u32.u64.high %v3834_v35, %v1169_v25, %v3864_v21 }
 0x8cf   :  { %v1044_v56 = vor.u32 %v1043_v30, %v1042_v24  ;;  %v1046_v50 = vshrl.u32 %v3341_v42, %v1037_v47  ;;  %v1048_v32 = vshll.u32 %v3341_v42, %v1036_v43  ;;  %v1049_v36 = vshrl.u32 %v3342_v44, %v1037_v47 }
 0x8d0   :  { %v1052_v53 = vshrl.u32 %v3343_v55, %v1037_v47  ;;  %v1070_v26 = vshll.u32 %v1030_v31, 8  ;;  %v1181_v57 = vmul.u32 %v3834_v35, %v1165_v20  ;;  %v1038_v37 = vshrl.u32 %v3338_v34, %v1037_v47 }
 0x8d1   :  { %v1047_v48 = vor.u32 %v1046_v50, %v1045_v46  ;;  %v1051_v58 = vshll.u32 %v3342_v44, %v1036_v43  ;;  %vm1183_vm5 = vc.u32 %v3861_v19, %v3864_v21  ;;  %v1184_v11 = vadd.s32 1, %v3865_v12 }
 0x8d2   :  { %v1050_v22 = vor.u32 %v1049_v36, %v1048_v32  ;;  %vm1054_vm6 = vcmp.lt.s32.totalorder %v3837_v41, 1  ;;  %vm1056_vm7 = vcmp.lt.s32.totalorder %v3837_v41, 3  ;;  %vm1057_vm8 = vcmp.lt.s32.totalorder %v3837_v41, 4 }
 0x8d3   :  { %v1053_v45 = vor.u32 %v1052_v53, %v1051_v58  ;;  %v1062_v31 = vsel %vm1054_vm6, %v1041_v39, %v1044_v56  ;;  %v1185_v35 = vsel %vm1183_vm5, %v1184_v11, %v3865_v12  ;;  %v1059_v62 = vsel %vm1057_vm8, %v1047_v48, 2102212464 }
 0x8d4   :  { %v1063_v47 = vsel %vm1057_vm8, %v1050_v22, 920167782  ;;  %v1066_v51 = vsel %vm1054_vm6, %v1044_v56, %v1047_v48  ;;  %v1186_v28 = vadd.s32 %v1185_v35, %v1181_v57  ;;  %vm1055_vm9 = vcmp.lt.s32.totalorder %v3837_v41, 2 }
 0x8d5   :  { %v1064_v43 = vsel %vm1056_vm7, %v1047_v48, %v1063_v47  ;;  %v1067_v8 = vsel %vm1057_vm8, %v1053_v45, 1326507024  ;;  %v1058_v59 = vsel %vm1054_vm6, %v1038_v37, %v1041_v39  ;;  %v1060_v16 = vsel %vm1056_vm7, %v1044_v56, %v1059_v62 }
 0x8d6   :  { %v1065_v27 = vsel %vm1055_vm9, %v1062_v31, %v1064_v43  ;;  %v1068_v2 = vsel %vm1056_vm7, %v1050_v22, %v1067_v8  ;;  %v1187_v23 = vadd.s32 536870912, %v1186_v28  ;;  %v1061_v20 = vsel %vm1055_vm9, %v1058_v59, %v1060_v16 }
 0x8d7   :  { %v1069_v10 = vsel %vm1055_vm9, %v1066_v51, %v1068_v2  ;;  %v3882_v14 = vmul.u32.u64.low %v1070_v26, %v1065_v27  ;;  %v3883_v17 = vmul.u32.u64.high %v1070_v26, %v1065_v27, %v3882_v14  ;;  %v1077_v41 = vmul.u32 %v1070_v26, %v1061_v20 }
 0x8d8   :  { %v3885_v5 = vmul.u32.u64.low %v1070_v26, %v1069_v10  ;;  %v3886_v49 = vmul.u32.u64.high %v1070_v26, %v1069_v10, %v3885_v5  ;;  %v1188_v24 = vshrl.u32 %v1187_v23, 30  ;;  %v1182_v58 = vadd.s32 %v3864_v21, %v3861_v19 }
 0x8d9   :  { %v1080_v29 = vadd.s32 1, %v3883_v17  ;;  %vm1127_vm1 = vcmp.le.f32.partialorder %v1126_v4, 0.7853982  ;;  %vm1024_vm2 = vcmp.lt.s32.totalorder %v3824_v1, 0  ;;  %vm1023_vm3 = vcmp.le.f32.partialorder %v1022_v7, 0.7853982  ;;  %v1234_v7 = vpop.permute.xlu1 %1233 }
 0x8da   :  { %v1189_v25 = vshll.u32 %v1188_v24, 30  ;;  %vm1079_vm11 = vc.u32 %v3886_v49, %v3882_v14  ;;  %v1078_v27 = vadd.s32 %v3882_v14, %v3886_v49  ;;  %v1212_v21 = vsub.s32 4, %v1188_v24 }
 0x8db   :  { %v1081_v33 = vsel %vm1079_vm11, %v1080_v29, %v3883_v17  ;;  %vm1218_vm7 = vweird.f32 %v3821_v15 }
 0x8dc   :  { %v1190_v30 = vsub.s32 %v1186_v28, %v1189_v25  ;;  %v1082_v12 = vadd.s32 %v1081_v33, %v1077_v41 }
 0x8de   :  { %v1192_v39 = vsub.s32 0, %v1190_v30  ;;  %v1083_v56 = vadd.s32 536870912, %v1082_v12 }
 0x8e0   :  { %v2639_v46 = vmin.u32 %v1192_v39, %v1190_v30  ;;  %v1084_v50 = vshrl.u32 %v1083_v56, 30 }
 0x8e2   :  { %v1194_v32 = vclz %v2639_v46  ;;  %v1085_v36 = vshll.u32 %v1084_v50, 30  ;;  %v1108_v46 = vsub.s32 4, %v1084_v50 }
 0x8e4   :  { %v2640_v53 = vadd.s32 4294967294, %v1194_v32  ;;  %v1086_v57 = vsub.s32 %v1082_v12, %v1085_v36  ;;  %v1109_v4 = vsel %vm1024_vm2, %v1108_v46, %v1084_v50 }
 0x8e6   :  { %vm2641_vm13 = vcmp.lt.s32.totalorder %v2640_v53, 0  ;;  %v1088_v48 = vsub.s32 0, %v1086_v57 }
 0x8e7   :  { %v1197_v37 = vsel %vm2641_vm13, 0, %v2640_v53  ;;  %vm1114_vm13 = vweird.f32 %v3824_v1 }
 0x8e8   :  { %v1198_v26 = vsub.s32 32, %v1197_v37  ;;  %v1202_v11 = vsub.s32 4294967266, %v1197_v37  ;;  %v2635_v22 = vmin.u32 %v1088_v48, %v1086_v57  ;;  %v1199_v45 = vshll.u32 %v1190_v30, %v1197_v37 }
 0x8e9   :  { %v1213_v30 = vsel %vm1128_vm0, %v1212_v21, %v1188_v24  ;;  %v1111_v48 = vsel %vm1023_vm3, 0, %v1109_v4 }
 0x8ea   :  { %v1200_v31 = vshrl.u32 %v1182_v58, %v1198_v26  ;;  %v1203_v35 = vadd.s32 127, %v1202_v11  ;;  %v1090_v62 = vclz %v2635_v22  ;;  %v1215_v39 = vsel %vm1127_vm1, 0, %v1213_v30 }
 0x8eb   :  { %v1219_v32 = vadd.s32 3, %v1215_v39  ;;  %v1115_v22 = vadd.s32 3, %v1111_v48 }
 0x8ec   :  { %v1201_v47 = vor.u32 %v1200_v31, %v1199_v45  ;;  %v1204_v51 = vshll.u32 %v1203_v35, 23  ;;  %v2636_v28 = vadd.s32 4294967294, %v1090_v62 }
 0x8ed   :  { %v1116_v50 = vand.u32 3, %v1115_v22 }
 0x8ee   :  { %v1205_v43 = vor.u32 4788187, %v1204_v51  ;;  %vm2637_vm15 = vcmp.lt.s32.totalorder %v2636_v28, 0  ;;  %v1208_v59 = vcvt.s32.f32 %v1201_v47 }
 0x8ef   :  { %v1093_v16 = vsel %vm2637_vm15, 0, %v2636_v28  ;;  %vm1121_vm8 = vcmp.eq.s32.totalorder %v1116_v50, 2  ;;  %vm1118_vm9 = vcmp.eq.s32.totalorder %v1116_v50, 0  ;;  %vm1117_vm11 = vcmp.lt.s32.totalorder %v1116_v50, 2 }
 0x8f0   :  { %v1206_v8 = vand.u32 2147483647, %v1205_v43  ;;  %v1094_v2 = vsub.s32 32, %v1093_v16  ;;  %v1098_v23 = vsub.s32 4294967266, %v1093_v16  ;;  %v1095_v10 = vshll.u32 %v1086_v57, %v1093_v16 }
 0x8f1   :  { %v1220_v57 = vand.u32 3, %v1219_v32  ;;  %vm121_vm15 = vcmp.ge.s32.totalorder %v3606_v9, 3 }
 0x8f2   :  { %v1209_v19 = vmul.f32 %v1208_v59, %v1206_v8  ;;  %v1096_v17 = vshrl.u32 %v1078_v27, %v1094_v2  ;;  %v1099_v5 = vadd.s32 127, %v1098_v23  ;;  %v1238_v27 = vpop.permute.xlu1 %1237 }
 0x8f3   :  { %vm1225_vm4 = vcmp.eq.s32.totalorder %v1220_v57, 2  ;;  %vm1222_vm5 = vcmp.eq.s32.totalorder %v1220_v57, 0  ;;  %vm1221_vm6 = vcmp.lt.s32.totalorder %v1220_v57, 2  ;;  %v3358_v57 = vmov 6  }
 0x8f4   :  { %v1210_v20 = vxor.u32 2147483648, %v1209_v19  ;;  %v1097_v25 = vor.u32 %v1096_v17, %v1095_v10  ;;  %v1100_v29 = vshll.u32 %v1099_v5, 23 }
 0x8f6   :  { %v1211_v41 = vsel %vm1128_vm0, %v1210_v20, %v1209_v19  ;;  %v1101_v33 = vor.u32 4788187, %v1100_v29  ;;  %v1104_v12 = vcvt.s32.f32 %v1097_v25  ;;  %v2642_v25 = vld [vmem:[%s4370_s4 + $0x20] sm:$0xff]  ;;  %vm2962_vm0 = vmpackc.low %vm121_vm15, %vm121_vm15 }
 0x8f7   :  { %v1214_v14 = vsel %vm1127_vm1, %v3821_v15, %v1211_v41  ;;  %2849 = vmatprep.mubr.msk.f32.mxu1 %vm456_vm10, %v2642_v25  ;;  %vm120_vm1 = vcmp.lt.s32.totalorder %v3606_v9, 125 }
 0x8f8   :  { %3257 = vcosq.f32 %v1214_v14  ;;  %v1102_v49 = vand.u32 2147483647, %v1101_v33 }
 0x8f9   :  { %3259 = vsinq.f32 %v1214_v14 }
 0x8fa   :  { %v1105_v56 = vmul.f32 %v1104_v12, %v1102_v49  ;;  %v2643_v12 = vld [vmem:[%s4370_s4 + $0x28] sm:$0xff] }
 0x8fc   :  { %v1106_v36 = vxor.u32 2147483648, %v1105_v56 }
 0x8fe   :  { %v1107_v53 = vsel %vm1024_vm2, %v1106_v36, %v1105_v56  ;;  %vm2972_vm2 = vmpackc.low %vm120_vm1, %vm120_vm1 }
 0x8ff   :  { %v1110_v24 = vsel %vm1023_vm3, %v3824_v1, %v1107_v53  ;;  %v3357_v1 = vmov 26  }
 0x900   :  { %3261 = vcosq.f32 %v1110_v24  ;;  %3172 = vset.pattern.permute.xlu1 %v3357_v1  ;;  %3171 = vset.pattern.permute.xlu0 %v3357_v1 }
 0x901   :  { %3263 = vsinq.f32 %v1110_v24 }
 0x902   :  { %v3258_v37 = vpop.eup %3257 }
 0x903   :  { %v3260_v58 = vpop.eup %3259  ;;  %v1226_v26 = vxor.u32 2147483648, %v3258_v37 }
 0x904   :  { %v1223_v11 = vxor.u32 2147483648, %v3260_v58 }
 0x905   :  { %v1227_v45 = vsel %vm1225_vm4, %v1226_v26, %v3260_v58 }
 0x906   :  { %v1224_v31 = vsel %vm1222_vm5, %v3258_v37, %v1223_v11 }
 0x907   :  { %v1228_v35 = vsel %vm1221_vm6, %v1224_v31, %v1227_v45 }
 0x908   :  { %v1229_v62 = vsel %vm1218_vm7, nan, %v1228_v35 }
 0x909   :  { %v1231_v43 = vmul.f32 %v1229_v62, %v1229_v62 }
 0x90a   :  { %v3262_v47 = vpop.eup %3261 }
 0x90b   :  { %v3264_v51 = vpop.eup %3263  ;;  %v1122_v28 = vxor.u32 2147483648, %v3262_v47  ;;  %v1241_v23 = vmul.f32 %v1238_v27, %v1231_v43 }
 0x90c   :  { %v1119_v8 = vxor.u32 2147483648, %v3264_v51 }
 0x90d   :  { %v1123_v59 = vsel %vm1121_vm8, %v1122_v28, %v3264_v51  ;;  %v1243_v10 = vadd.f32 %v1241_v23, %v3816_v61 }
 0x90e   :  { %v1120_v16 = vsel %vm1118_vm9, %v3262_v47, %v1119_v8  ;;  %v3359_v8 = vmov 7  }
 0x90f   :  { %v1124_v2 = vsel %vm1117_vm11, %v1120_v16, %v1123_v59 }
 0x910   :  { %v1125_v19 = vsel %vm1114_vm13, nan, %v1124_v2 }
 0x911   :  { %v1230_v15 = vmul.f32 %v1125_v19, %v1125_v19 }
 0x913   :  { %v1240_v21 = vmul.f32 %v1234_v7, %v1230_v15  ;;  %v3360_v15 = vmov 18  }
 0x915   :  { %v1242_v17 = vadd.f32 %v1240_v21, %v3818_v0 }
 0x917   :  { %v3166_v5 = vpack.i.bf16 %v1243_v10, %v1242_v17  ;;  %v2967_v20 = vpack.c.bf16 %v1243_v10, %v1242_v17 }
 0x919   :  { %3167 = vrot.lane.b32.xlu1 %v3166_v5, %s3355_s0  ;;  %3162 = vrot.lane.b32.xlu0 %v3166_v5, %s3356_s28 }
 0x91d   :  { %1276 = vperm.xlu1 %3172, %v3767_v3   ;;  %1272 = vperm.xlu0 %3171, %v3773_v60  }
 0x921   :  { %3173 = vset.pattern.permute.xlu1 %v3358_v57  ;;  %3174 = vset.pattern.permute.xlu0 %v3359_v8 }
 0x98b   :  { %v3163_v61 = vpop.permute.xlu0 %3162  ;;  %v3168_v41 = vpop.permute.xlu1 %3167 }
 0x98c   :  { %v3165_v0 = vunpack.i.h.bf16 %v3163_v61  ;;  %v3164_v29 = vunpack.i.l.bf16 %v3163_v61  ;;  %v3170_v33 = vunpack.i.h.bf16 %v3168_v41  ;;  %v3169_v14 = vunpack.i.l.bf16 %v3168_v41 }
 0x98e   :  { %v2961_v30 = vpack.c.bf16 %v3165_v0, %v3164_v29  ;;  %v2971_v49 = vpack.c.bf16 %v3170_v33, %v3169_v14 }
 0x990   :  { %2963 = vmatprep.subr.msk.bf16.mxu1 %vm2962_vm0, %v2961_v30 }
 0x991   :  { %2966 = vmatpush3.bf16.msk.msra.mxu1 %vm2962_vm0, %v2961_v30 }
 0x992   :  { %2968 = vmatprep.subr.bf16.mxu1 %v2967_v20 }
 0x995   :  { %2970 = vmatpush3.bf16.msra.mxu1 %v2967_v20  ;;  %v3361_v20 = vmov 19  }
 0x996   :  { %2973 = vmatprep.subr.msk.bf16.mxu1 %vm2972_vm2, %v2971_v49 }
 0x999   :  { %2976 = vmatpush3.bf16.msk.msra.mxu1 %vm2972_vm2, %v2971_v49 }
 0x99c   :  { %2850 = vmatmul.mubr.msk.f32.vlgmr.msra.gmra.mrb[4].mxu1 %vm456_vm10, %v2643_v12  ;;  %v1277_v39 = vpop.permute.xlu1 %1276  ;;  %v1273_v56 = vpop.permute.xlu0 %1272 }
 0xa6f   :  { %v2851_v46 = vpop.f32.mrb[4].mxu1 }
 0xa70   :  { %v3917_v32 = vadd.f32 %v2851_v46, %v1277_v39  ;;  %v1351_v36 = vpop.f32.mrb[5].mxu1 }
 0xa71   :  { %v1352_v53 = vadd.f32 %v1351_v36, %v1273_v56 }
 0xa72   :  { %1362 = vadd.xlane.f32.xlu0 %v3917_v32  ;;  %v1365_v24 = vmul.f32 %v3917_v32, %v3917_v32 }
 0xa73   :  { %1360 = vadd.xlane.f32.xlu1 %v1352_v53  ;;  %v1364_v4 = vmul.f32 %v1352_v53, %v1352_v53 }
 0xa76   :  { %1366 = vadd.xlane.f32.xlu0 %v1364_v4 }
 0xa7a   :  { %1368 = vadd.xlane.f32.xlu0 %v1365_v24 }
 0xaff   :  { %v1363_v37 = vpop.xlane.xlu0 %1362 }
 0xb00   :  { %v1361_v48 = vpop.xlane.xlu1 %1360  ;;  %v1371_v22 = vmul.f32 0.0078125, %v1363_v37 }
 0xb01   :  { %v1370_v58 = vmul.f32 0.0078125, %v1361_v48 }
 0xb02   :  { %v1375_v7 = vmul.f32 %v1371_v22, %v1371_v22 }
 0xb03   :  { %v1374_v26 = vmul.f32 %v1370_v58, %v1370_v58  ;;  %v1367_v11 = vpop.xlane.xlu0 %1366 }
 0xb04   :  { %v1372_v45 = vmul.f32 0.0078125, %v1367_v11 }
 0xb06   :  { %v1376_v31 = vsub.f32 %v1372_v45, %v1374_v26 }
 0xb07   :  { %v1369_v35 = vpop.xlane.xlu0 %1368 }
 0xb08   :  { %v1378_v50 = vmax.f32 %v1376_v31, 0.0  ;;  %v1373_v62 = vmul.f32 0.0078125, %v1369_v35 }
 0xb0a   :  { %v1380_v47 = vadd.f32 1e-05, %v1378_v50  ;;  %v1377_v51 = vsub.f32 %v1373_v62, %v1375_v7 }
 0xb0c   :  { %3265 = vrsqrt.f32 %v1380_v47  ;;  %v1379_v28 = vmax.f32 %v1377_v51, 0.0 }
 0xb0e   :  { %v1381_v43 = vadd.f32 1e-05, %v1379_v28 }
 0xb10   :  { %3267 = vrsqrt.f32 %v1381_v43 }
 0xb16   :  { %v3266_v59 = vpop.eup %3265 }
 0xb17   :  { %v1384_v16 = vmul.f32 %v3266_v59, %v3492_v54 }
 0xb19   :  { %v1386_v27 = vmul.f32 %v1384_v16, %v1370_v58 }
 0xb1a   :  { %v3268_v2 = vpop.eup %3267 }
 0xb1b   :  { %1390 = vrot.lane.b32.xlu1 %v1386_v27, %s3335_s10  ;;  %v1385_v23 = vmul.f32 %v3268_v2, %v3489_v52 }
 0xb1d   :  { %v1387_v19 = vmul.f32 %v1385_v23, %v1371_v22 }
 0xb1f   :  { %1400 = vperm.xlu1 %3173, %v1384_v16   ;;  %1392 = vrot.lane.b32.xlu0 %v1387_v19, %s3335_s10 }
 0xb23   :  { %1405 = vperm.xlu1 %3173, %v1385_v23  }
 0xb27   :  { %3175 = vset.pattern.permute.xlu1 %v3360_v15 }
 0xb28   :  { %1423 = vperm.xlu1 %3175, %v3773_v60  }
 0xb2c   :  { %3176 = vset.pattern.permute.xlu1 %v3359_v8 }
 0xb8d   :  { %v1391_v21 = vpop.permute.xlu1 %1390 }
 0xb8e   :  { %v1396_v10 = vsub.f32 %v3492_v54, %v1391_v21 }
 0xb90   :  { %1412 = vperm.xlu1 %3176, %v1396_v10  }
 0xb91   :  { %v1393_v17 = vpop.permute.xlu0 %1392 }
 0xb92   :  { %v1397_v5 = vsub.f32 %v3489_v52, %v1393_v17 }
 0xb94   :  { %1417 = vperm.xlu0 %3174, %v1397_v5   ;;  %3177 = vset.pattern.permute.xlu1 %v3360_v15 }
 0xb95   :  { %1427 = vperm.xlu1 %3177, %v3767_v3  }
 0xb98   :  { %3178 = vset.pattern.permute.xlu0 %v3361_v20 }
 0xb99   :  { %1643 = vperm.xlu0 %3178, %v3773_v60   ;;  %3179 = vset.pattern.permute.xlu1 %v3361_v20 }
 0xb9a   :  { %1647 = vperm.xlu1 %3179, %v3767_v3  }
 0xb9e   :  { %v1401_v25 = vpop.permute.xlu1 %1400 }
 0xb9f   :  { %v1408_v0 = vmul.f32 %v1401_v25, %v1352_v53 }
 0xba2   :  { %v1406_v1 = vpop.permute.xlu1 %1405 }
 0xba3   :  { %v1409_v30 = vmul.f32 %v1406_v1, %v3917_v32 }
 0xba7   :  { %v1424_v61 = vpop.permute.xlu1 %1423 }
 0xc0f   :  { %v1413_v29 = vpop.permute.xlu1 %1412 }
 0xc10   :  { %v3932_v41 = vadd.f32 %v1413_v29, %v1408_v0 }
 0xc12   :  { %v3936_v33 = vmul.f32 %v1424_v61, %v3932_v41 }
 0xc13   :  { %v1418_v14 = vpop.permute.xlu0 %1417 }
 0xc14   :  { %v1435_v49 = vand.u32 2139095040, %v3936_v33  ;;  %v3939_v12 = vadd.f32 %v1418_v14, %v1409_v30  ;;  %v1428_v60 = vpop.permute.xlu1 %1427  ;;  %v1432_v32 = vand.u32 2147483647, %v3936_v33 }
 0xc16   :  { %v1436_v39 = vshrl.u32 %v1435_v49, 23  ;;  %v3942_v3 = vmul.f32 %v1428_v60, %v3939_v12  ;;  %v3951_v37 = vand.u32 8388607, %v1432_v32 }
 0xc18   :  { %v2646_v56 = vadd.s32 4294967169, %v1436_v39  ;;  %v1536_v46 = vand.u32 2147483647, %v3942_v3  ;;  %v1539_v36 = vand.u32 2139095040, %v3942_v3  ;;  %v1440_v31 = vor.u32 8388608, %v3951_v37 }
 0xc1a   :  { %v1442_v53 = vadd.s32 1, %v2646_v56  ;;  %v1540_v4 = vshrl.u32 %v1539_v36, 23  ;;  %v1543_v24 = vand.u32 8388607, %v1536_v46 }
 0xc1c   :  { %vm1443_vm3 = vcmp.gt.s32.totalorder %v1442_v53, 0  ;;  %v2650_v57 = vadd.s32 4294967169, %v1540_v4  ;;  %v1544_v58 = vor.u32 8388608, %v1543_v24 }
 0xc1d   :  { %v1444_v48 = vsel %vm1443_vm3, %v1442_v53, 0 }
 0xc1e   :  { %v3953_v26 = vshrl.u32 %v1444_v48, 5  ;;  %v1446_v11 = vand.u32 31, %v1444_v48  ;;  %v1546_v22 = vadd.s32 1, %v2650_v57  ;;  %v3958_v50 = vshll.u32 %v1544_v58, 8 }
 0xc20   :  { %v1447_v45 = vsub.s32 32, %v1446_v11  ;;  %v1458_v35 = vshll.u32 %v3341_v42, %v1446_v11  ;;  %v1461_v7 = vshll.u32 %v3342_v44, %v1446_v11  ;;  %vm1547_vm4 = vcmp.gt.s32.totalorder %v1546_v22, 0 }
 0xc21   :  { %vm1467_vm5 = vcmp.lt.s32.totalorder %v3953_v26, 4  ;;  %v1548_v51 = vsel %vm1547_vm4, %v1546_v22, 0  ;;  %v1449_v43 = vshll.u32 %v3338_v34, %v1446_v11  ;;  %v1452_v8 = vshll.u32 %v3339_v38, %v1446_v11 }
 0xc22   :  { %v1459_v62 = vshrl.u32 %v3342_v44, %v1447_v45  ;;  %v1462_v47 = vshrl.u32 %v3343_v55, %v1447_v45  ;;  %v1550_v28 = vand.u32 31, %v1548_v51  ;;  %v1455_v59 = vshll.u32 %v3340_v40, %v1446_v11 }
 0xc23   :  { %v1549_v27 = vshrl.u32 %v1548_v51, 5  ;;  %v1450_v2 = vshrl.u32 %v3339_v38, %v1447_v45  ;;  %v1453_v23 = vshrl.u32 %v3340_v40, %v1447_v45  ;;  %v1456_v10 = vshrl.u32 %v3341_v42, %v1447_v45 }
 0xc24   :  { %v1460_v16 = vor.u32 %v1459_v62, %v1458_v35  ;;  %v1463_v19 = vor.u32 %v1462_v47, %v1461_v7  ;;  %v1551_v15 = vsub.s32 32, %v1550_v28  ;;  %v1553_v21 = vshll.u32 %v3338_v34, %v1550_v28 }
 0xc25   :  { %v1556_v5 = vshll.u32 %v3339_v38, %v1550_v28  ;;  %v1559_v20 = vshll.u32 %v3340_v40, %v1550_v28  ;;  %v1562_v25 = vshll.u32 %v3341_v42, %v1550_v28  ;;  %v1565_v29 = vshll.u32 %v3342_v44, %v1550_v28 }
 0xc26   :  { %v1473_v17 = vsel %vm1467_vm5, %v1460_v16, 920167782  ;;  %v1554_v1 = vshrl.u32 %v3339_v38, %v1551_v15  ;;  %v1557_v61 = vshrl.u32 %v3340_v40, %v1551_v15  ;;  %v1560_v0 = vshrl.u32 %v3341_v42, %v1551_v15 }
 0xc27   :  { %vm1464_vm6 = vcmp.lt.s32.totalorder %v3953_v26, 1  ;;  %v1552_v30 = vshrl.u32 %v3338_v34, %v1551_v15  ;;  %v1563_v14 = vshrl.u32 %v3342_v44, %v1551_v15  ;;  %v1566_v49 = vshrl.u32 %v3343_v55, %v1551_v15 }
 0xc28   :  { %vm1568_vm7 = vcmp.lt.s32.totalorder %v1549_v27, 1  ;;  %v1555_v60 = vor.u32 %v1554_v1, %v1553_v21  ;;  %v1558_v39 = vor.u32 %v1557_v61, %v1556_v5  ;;  %v1561_v56 = vor.u32 %v1560_v0, %v1559_v20 }
 0xc29   :  { %vm1570_vm8 = vcmp.lt.s32.totalorder %v1549_v27, 3  ;;  %v1564_v36 = vor.u32 %v1563_v14, %v1562_v25  ;;  %v1567_v53 = vor.u32 %v1566_v49, %v1565_v29  ;;  %vm1571_vm9 = vcmp.lt.s32.totalorder %v1549_v27, 4 }
 0xc2a   :  { %v1451_v4 = vor.u32 %v1450_v2, %v1449_v43  ;;  %v1572_v24 = vsel %vm1568_vm7, %v1552_v30, %v1555_v60  ;;  %v1573_v57 = vsel %vm1571_vm9, %v1561_v56, 2102212464  ;;  %v1576_v48 = vsel %vm1568_vm7, %v1555_v60, %v1558_v39 }
 0xc2b   :  { %v1580_v58 = vsel %vm1568_vm7, %v1558_v39, %v1561_v56  ;;  %v1574_v11 = vsel %vm1570_vm8, %v1558_v39, %v1573_v57  ;;  %v1577_v22 = vsel %vm1571_vm9, %v1564_v36, 920167782  ;;  %v1581_v35 = vsel %vm1571_vm9, %v1567_v53, 1326507024 }
 0xc2c   :  { %v1454_v7 = vor.u32 %v1453_v23, %v1452_v8  ;;  %vm1569_vm11 = vcmp.lt.s32.totalorder %v1549_v27, 2  ;;  %v1578_v62 = vsel %vm1570_vm8, %v1561_v56, %v1577_v22  ;;  %v1582_v47 = vsel %vm1570_vm8, %v1564_v36, %v1581_v35 }
 0xc2d   :  { %v1457_v51 = vor.u32 %v1456_v10, %v1455_v59  ;;  %v1477_v28 = vsel %vm1467_vm5, %v1463_v19, 1326507024  ;;  %v1575_v15 = vsel %vm1569_vm11, %v1572_v24, %v1574_v11  ;;  %v1579_v21 = vsel %vm1569_vm11, %v1576_v48, %v1578_v62 }
 0xc2e   :  { %v1583_v5 = vsel %vm1569_vm11, %v1580_v58, %v1582_v47  ;;  %v3990_v20 = vmul.u32.u64.low %v3958_v50, %v1579_v21  ;;  %v3991_v25 = vmul.u32.u64.high %v3958_v50, %v1579_v21, %v3990_v20  ;;  %v1448_v8 = vshrl.u32 %v3338_v34, %v1447_v45 }
 0xc2f   :  { %v3986_v43 = vmul.u32.u64.low %v3958_v50, %v1583_v5  ;;  %v3987_v2 = vmul.u32.u64.high %v3958_v50, %v1583_v5, %v3986_v43  ;;  %vm1466_vm13 = vcmp.lt.s32.totalorder %v3953_v26, 3  ;;  %v1469_v59 = vsel %vm1467_vm5, %v1457_v51, 2102212464 }
 0xc30   :  { %v1472_v27 = vsel %vm1464_vm6, %v1451_v4, %v1454_v7  ;;  %vm1465_vm15 = vcmp.lt.s32.totalorder %v3953_v26, 2  ;;  %v1474_v23 = vsel %vm1466_vm13, %v1457_v51, %v1473_v17  ;;  %v1476_v19 = vsel %vm1464_vm6, %v1454_v7, %v1457_v51 }
 0xc31   :  { %v1478_v10 = vsel %vm1466_vm13, %v1460_v16, %v1477_v28  ;;  %v1591_v45 = vmul.u32 %v3958_v50, %v1575_v15  ;;  %v1475_v1 = vsel %vm1465_vm15, %v1472_v27, %v1474_v23  ;;  %v1480_v0 = vshll.u32 %v1440_v31, 8 }
 0xc32   :  { %v1479_v61 = vsel %vm1465_vm15, %v1476_v19, %v1478_v10  ;;  %vm1593_vm0 = vc.u32 %v3987_v2, %v3990_v20  ;;  %v1594_v17 = vadd.s32 1, %v3991_v25  ;;  %v1468_v29 = vsel %vm1464_vm6, %v1448_v8, %v1451_v4 }
 0xc33   :  { %v1470_v16 = vsel %vm1466_vm13, %v1454_v7, %v1469_v59  ;;  %v4019_v50 = vmul.u32.u64.low %v1480_v0, %v1479_v61  ;;  %v4020_v30 = vmul.u32.u64.high %v1480_v0, %v1479_v61, %v4019_v50  ;;  %v1592_v5 = vadd.s32 %v3990_v20, %v3987_v2 }
 0xc34   :  { %v4022_v14 = vmul.u32.u64.low %v1480_v0, %v1475_v1  ;;  %v4023_v49 = vmul.u32.u64.high %v1480_v0, %v1475_v1, %v4022_v14  ;;  %v1595_v60 = vsel %vm1593_vm0, %v1594_v17, %v3991_v25  ;;  %v1471_v31 = vsel %vm1465_vm15, %v1468_v29, %v1470_v16 }
 0xc35   :  { %v1596_v37 = vadd.s32 %v1595_v60, %v1591_v45  ;;  %v1487_v36 = vmul.u32 %v1480_v0, %v1471_v31  ;;  %vm1538_vm4 = vcmp.lt.s32.totalorder %v3942_v3, 0  ;;  %vm1537_vm5 = vcmp.le.f32.partialorder %v1536_v46, 0.7853982 }
 0xc36   :  { %vm1489_vm1 = vc.u32 %v4020_v30, %v4022_v14  ;;  %v1490_v56 = vadd.s32 1, %v4023_v49  ;;  %v1488_v1 = vadd.s32 %v4022_v14, %v4020_v30  ;;  %vm1434_vm6 = vcmp.lt.s32.totalorder %v3936_v33, 0 }
 0xc37   :  { %v1597_v39 = vadd.s32 536870912, %v1596_v37  ;;  %vm1433_vm7 = vcmp.le.f32.partialorder %v1432_v32, 0.7853982  ;;  %vm1628_vm13 = vweird.f32 %v3942_v3 }
 0xc38   :  { %v1491_v4 = vsel %vm1489_vm1, %v1490_v56, %v4023_v49 }
 0xc39   :  { %v1598_v53 = vshrl.u32 %v1597_v39, 30  ;;  %v1492_v24 = vadd.s32 %v1491_v4, %v1487_v36 }
 0xc3b   :  { %v1599_v57 = vshll.u32 %v1598_v53, 30  ;;  %v1493_v48 = vadd.s32 536870912, %v1492_v24  ;;  %v1622_v31 = vsub.s32 4, %v1598_v53 }
 0xc3d   :  { %v1600_v58 = vsub.s32 %v1596_v37, %v1599_v57  ;;  %v1494_v11 = vshrl.u32 %v1493_v48, 30  ;;  %v1623_v30 = vsel %vm1538_vm4, %v1622_v31, %v1598_v53 }
 0xc3f   :  { %v1602_v22 = vsub.s32 0, %v1600_v58  ;;  %v1495_v35 = vshll.u32 %v1494_v11, 30  ;;  %v1518_v57 = vsub.s32 4, %v1494_v11 }
 0xc41   :  { %v2651_v7 = vmin.u32 %v1602_v22, %v1600_v58  ;;  %v1496_v62 = vsub.s32 %v1492_v24, %v1495_v35  ;;  %v1625_v22 = vsel %vm1537_vm5, 0, %v1623_v30 }
 0xc43   :  { %v1604_v26 = vclz %v2651_v7  ;;  %v1498_v47 = vsub.s32 0, %v1496_v62  ;;  %v1519_v7 = vsel %vm1434_vm6, %v1518_v57, %v1494_v11 }
 0xc44   :  { %v1521_v46 = vsel %vm1433_vm7, 0, %v1519_v7 }
 0xc45   :  { %v2652_v51 = vadd.s32 4294967294, %v1604_v26  ;;  %v2647_v28 = vmin.u32 %v1498_v47, %v1496_v62  ;;  %v1629_v26 = vadd.s32 3, %v1625_v22  ;;  %v1525_v47 = vadd.s32 3, %v1521_v46 }
 0xc47   :  { %vm2653_vm2 = vcmp.lt.s32.totalorder %v2652_v51, 0  ;;  %v1500_v21 = vclz %v2647_v28  ;;  %v1630_v53 = vand.u32 3, %v1629_v26 }
 0xc48   :  { %v1607_v15 = vsel %vm2653_vm2, 0, %v2652_v51  ;;  %vm1524_vm2 = vweird.f32 %v3936_v33 }
 0xc49   :  { %v1608_v43 = vsub.s32 32, %v1607_v15  ;;  %v1612_v25 = vsub.s32 4294967266, %v1607_v15  ;;  %v2648_v8 = vadd.s32 4294967294, %v1500_v21  ;;  %v1609_v59 = vshll.u32 %v1600_v58, %v1607_v15 }
 0xc4a   :  { %vm1635_vm8 = vcmp.eq.s32.totalorder %v1630_v53, 2  ;;  %vm1632_vm9 = vcmp.eq.s32.totalorder %v1630_v53, 0  ;;  %vm1631_vm11 = vcmp.lt.s32.totalorder %v1630_v53, 2 }
 0xc4b   :  { %v1610_v27 = vshrl.u32 %v1592_v5, %v1608_v43  ;;  %v1613_v23 = vadd.s32 127, %v1612_v25  ;;  %vm2649_vm3 = vcmp.lt.s32.totalorder %v2648_v8, 0  ;;  %v1526_v5 = vand.u32 3, %v1525_v47 }
 0xc4c   :  { %v1503_v45 = vsel %vm2649_vm3, 0, %v2648_v8  ;;  %v3363_v47 = vmov 8  }
 0xc4d   :  { %v1611_v19 = vor.u32 %v1610_v27, %v1609_v59  ;;  %v1614_v10 = vshll.u32 %v1613_v23, 23  ;;  %v1504_v61 = vsub.s32 32, %v1503_v45  ;;  %v1508_v0 = vsub.s32 4294967266, %v1503_v45 }
 0xc4e   :  { %v1505_v29 = vshll.u32 %v1496_v62, %v1503_v45  ;;  %vm1531_vm15 = vcmp.eq.s32.totalorder %v1526_v5, 2  ;;  %vm1528_vm0 = vcmp.eq.s32.totalorder %v1526_v5, 0  ;;  %vm1527_vm1 = vcmp.lt.s32.totalorder %v1526_v5, 2 }
 0xc4f   :  { %v1615_v17 = vor.u32 4788187, %v1614_v10  ;;  %v1506_v16 = vshrl.u32 %v1488_v1, %v1504_v61  ;;  %v1509_v50 = vadd.s32 127, %v1508_v0  ;;  %v1618_v2 = vcvt.s32.f32 %v1611_v19  ;;  %v1648_v19 = vpop.permute.xlu1 %1647 }
 0xc51   :  { %v1616_v49 = vand.u32 2147483647, %v1615_v17  ;;  %v1507_v20 = vor.u32 %v1506_v16, %v1505_v29  ;;  %v1510_v60 = vshll.u32 %v1509_v50, 23  ;;  %v1644_v29 = vpop.permute.xlu0 %1643 }
 0xc53   :  { %v1619_v37 = vmul.f32 %v1618_v2, %v1616_v49  ;;  %v1511_v39 = vor.u32 4788187, %v1510_v60  ;;  %v1514_v4 = vcvt.s32.f32 %v1507_v20  ;;  %v3362_v60 = vmov 27  }
 0xc54   :  { %3191 = vset.pattern.permute.xlu0 %v3362_v60  ;;  %3190 = vset.pattern.permute.xlu1 %v3362_v60 }
 0xc55   :  { %v1620_v56 = vxor.u32 2147483648, %v1619_v37  ;;  %v1512_v36 = vand.u32 2147483647, %v1511_v39 }
 0xc57   :  { %v1621_v24 = vsel %vm1538_vm4, %v1620_v56, %v1619_v37  ;;  %v1515_v14 = vmul.f32 %v1514_v4, %v1512_v36 }
 0xc58   :  { %v1624_v48 = vsel %vm1537_vm5, %v3942_v3, %v1621_v24 }
 0xc59   :  { %3269 = vcosq.f32 %v1624_v48  ;;  %v1516_v58 = vxor.u32 2147483648, %v1515_v14 }
 0xc5a   :  { %3271 = vsinq.f32 %v1624_v48 }
 0xc5b   :  { %v1517_v35 = vsel %vm1434_vm6, %v1516_v58, %v1515_v14  ;;  %v2655_v14 = vld [vmem:[%s4370_s4 + $0x38] sm:$0xff] }
 0xc5c   :  { %v1520_v62 = vsel %vm1433_vm7, %v3936_v33, %v1517_v35  ;;  %v2654_v33 = vld [vmem:[%s4370_s4 + $0x30] sm:$0xff] }
 0xc5d   :  { %3273 = vcosq.f32 %v1520_v62  ;;  %2864 = vmatprep.mubr.msk.f32.mxu0 %vm456_vm10, %v2654_v33 }
 0xc5e   :  { %3275 = vsinq.f32 %v1520_v62 }
 0xc63   :  { %v3270_v51 = vpop.eup %3269 }
 0xc64   :  { %v3272_v28 = vpop.eup %3271  ;;  %v1636_v15 = vxor.u32 2147483648, %v3270_v51 }
 0xc65   :  { %v1633_v21 = vxor.u32 2147483648, %v3272_v28 }
 0xc66   :  { %v1637_v43 = vsel %vm1635_vm8, %v1636_v15, %v3272_v28 }
 0xc67   :  { %v1634_v32 = vsel %vm1632_vm9, %v3270_v51, %v1633_v21  ;;  %v3274_v25 = vpop.eup %3273 }
 0xc68   :  { %v1638_v11 = vsel %vm1631_vm11, %v1634_v32, %v1637_v43  ;;  %v3276_v8 = vpop.eup %3275  ;;  %v1532_v59 = vxor.u32 2147483648, %v3274_v25 }
 0xc69   :  { %v1639_v27 = vsel %vm1628_vm13, nan, %v1638_v11  ;;  %v1529_v23 = vxor.u32 2147483648, %v3276_v8 }
 0xc6a   :  { %v1641_v10 = vmul.f32 %v1639_v27, %v1639_v27  ;;  %v1533_v45 = vsel %vm1531_vm15, %v1532_v59, %v3276_v8 }
 0xc6b   :  { %v1530_v1 = vsel %vm1528_vm0, %v3274_v25, %v1529_v23 }
 0xc6c   :  { %v1534_v61 = vsel %vm1527_vm1, %v1530_v1, %v1533_v45  ;;  %v1651_v0 = vmul.f32 %v1648_v19, %v1641_v10  ;;  %v3364_v10 = vmov 9  }
 0xc6d   :  { %v1535_v17 = vsel %vm1524_vm2, nan, %v1534_v61 }
 0xc6e   :  { %v1640_v16 = vmul.f32 %v1535_v17, %v1535_v17  ;;  %v1653_v50 = vadd.f32 %v1651_v0, %v3939_v12  ;;  %v4054_v12 = vld [vmem:[%s4369_s3 + $0x8] sm:$0xff] }
 0xc70   :  { %v1650_v3 = vmul.f32 %v1644_v29, %v1640_v16 }
 0xc72   :  { %v1652_v49 = vadd.f32 %v1650_v3, %v3932_v41  ;;  %v4060_v41 = vld [vmem:[%s4369_s3] sm:$0xff] }
 0xc74   :  { %v3185_v2 = vpack.i.bf16 %v1653_v50, %v1652_v49  ;;  %v2983_v20 = vpack.c.bf16 %v1653_v50, %v1652_v49 }
 0xc76   :  { %3186 = vrot.lane.b32.xlu0 %v3185_v2, %s3344_s11  ;;  %3181 = vrot.lane.b32.xlu1 %v3185_v2, %s3335_s10  ;;  %v3365_v2 = vmov 20  }
 0xc7a   :  { %1686 = vperm.xlu0 %3191, %v4054_v12   ;;  %1682 = vperm.xlu1 %3190, %v4060_v41  }
 0xc7e   :  { %3192 = vset.pattern.permute.xlu1 %v3363_v47  ;;  %3195 = vset.pattern.permute.xlu0 %v3364_v10 }
 0xce8   :  { %v3182_v37 = vpop.permute.xlu1 %3181  ;;  %v3187_v56 = vpop.permute.xlu0 %3186 }
 0xce9   :  { %v3184_v31 = vunpack.i.h.bf16 %v3182_v37  ;;  %v3183_v39 = vunpack.i.l.bf16 %v3182_v37  ;;  %v3189_v4 = vunpack.i.h.bf16 %v3187_v56  ;;  %v3188_v24 = vunpack.i.l.bf16 %v3187_v56 }
 0xceb   :  { %v2977_v36 = vpack.c.bf16 %v3184_v31, %v3183_v39  ;;  %v2987_v30 = vpack.c.bf16 %v3189_v4, %v3188_v24 }
 0xced   :  { %2979 = vmatprep.subr.msk.bf16.mxu0 %vm3609_vm12, %v2977_v36 }
 0xcee   :  { %2982 = vmatpush3.bf16.msk.msra.mxu0 %vm3609_vm12, %v2977_v36 }
 0xcef   :  { %2984 = vmatprep.subr.bf16.mxu0 %v2983_v20 }
 0xcf2   :  { %2986 = vmatpush3.bf16.msra.mxu0 %v2983_v20  ;;  %v3366_v20 = vmov 21  }
 0xcf3   :  { %2989 = vmatprep.subr.msk.bf16.mxu0 %vm3618_vm14, %v2987_v30 }
 0xcf6   :  { %2992 = vmatpush3.bf16.msk.msra.mxu0 %vm3618_vm14, %v2987_v30 }
 0xcf9   :  { %2865 = vmatmul.mubr.msk.f32.vlgmr.msra.gmra.mrb[2].mxu0 %vm456_vm10, %v2655_v14  ;;  %v1687_v57 = vpop.permute.xlu0 %1686  ;;  %v1683_v48 = vpop.permute.xlu1 %1682 }
 0xdcc   :  { %v2866_v58 = vpop.f32.mrb[2].mxu0 }
 0xdcd   :  { %v1767_v22 = vadd.f32 %v2866_v58, %v1687_v57  ;;  %v1761_v35 = vpop.f32.mrb[3].mxu0 }
 0xdce   :  { %v1762_v7 = vadd.f32 %v1761_v35, %v1683_v48 }
 0xdcf   :  { %v4076_v62 = vadd.f32 %v1767_v22, %v3791_v18 }
 0xdd0   :  { %v4079_v26 = vadd.f32 %v1762_v7, %v3796_v13 }
 0xdd1   :  { %1774 = vadd.xlane.f32.xlu0 %v4076_v62  ;;  %v1777_v53 = vmul.f32 %v4076_v62, %v4076_v62 }
 0xdd2   :  { %1772 = vadd.xlane.f32.xlu1 %v4079_v26  ;;  %v1776_v46 = vmul.f32 %v4079_v26, %v4079_v26 }
 0xdd5   :  { %1778 = vadd.xlane.f32.xlu0 %v1776_v46 }
 0xdd6   :  { %1780 = vadd.xlane.f32.xlu1 %v1777_v53 }
 0xe5e   :  { %v1775_v51 = vpop.xlane.xlu0 %1774 }
 0xe5f   :  { %v1773_v18 = vpop.xlane.xlu1 %1772  ;;  %v1783_v28 = vmul.f32 0.0078125, %v1775_v51 }
 0xe60   :  { %v1782_v15 = vmul.f32 0.0078125, %v1773_v18 }
 0xe61   :  { %v1787_v32 = vmul.f32 %v1783_v28, %v1783_v28 }
 0xe62   :  { %v1786_v13 = vmul.f32 %v1782_v15, %v1782_v15  ;;  %v1779_v21 = vpop.xlane.xlu0 %1778 }
 0xe63   :  { %v1784_v5 = vmul.f32 0.0078125, %v1779_v21  ;;  %v1781_v43 = vpop.xlane.xlu1 %1780 }
 0xe64   :  { %v1785_v25 = vmul.f32 0.0078125, %v1781_v43 }
 0xe65   :  { %v1788_v11 = vsub.f32 %v1784_v5, %v1786_v13 }
 0xe66   :  { %v1789_v8 = vsub.f32 %v1785_v25, %v1787_v32 }
 0xe67   :  { %v1790_v59 = vmax.f32 %v1788_v11, 0.0 }
 0xe68   :  { %v1791_v27 = vmax.f32 %v1789_v8, 0.0 }
 0xe69   :  { %v1792_v23 = vadd.f32 1e-05, %v1790_v59 }
 0xe6a   :  { %v1793_v19 = vadd.f32 1e-05, %v1791_v27 }
 0xe6b   :  { %3277 = vrsqrt.f32 %v1792_v23 }
 0xe6c   :  { %3279 = vrsqrt.f32 %v1793_v19 }
 0xe75   :  { %v3278_v45 = vpop.eup %3277 }
 0xe76   :  { %v3280_v1 = vpop.eup %3279  ;;  %v1796_v61 = vmul.f32 %v3278_v45, %v3492_v54 }
 0xe77   :  { %v1797_v0 = vmul.f32 %v3280_v1, %v3489_v52 }
 0xe78   :  { %v1798_v17 = vmul.f32 %v1796_v61, %v1782_v15 }
 0xe79   :  { %v1799_v29 = vmul.f32 %v1797_v0, %v1783_v28 }
 0xe7a   :  { %1802 = vrot.lane.b32.xlu0 %v1798_v17, %s3335_s10 }
 0xe7b   :  { %1804 = vrot.lane.b32.xlu1 %v1799_v29, %s3335_s10 }
 0xe7f   :  { %1812 = vperm.xlu1 %3192, %v1796_v61  }
 0xe83   :  { %1817 = vperm.xlu1 %3192, %v1797_v0  }
 0xe87   :  { %3193 = vset.pattern.permute.xlu1 %v3364_v10 }
 0xeec   :  { %v1803_v16 = vpop.permute.xlu0 %1802 }
 0xeed   :  { %v1808_v3 = vsub.f32 %v3492_v54, %v1803_v16  ;;  %v1805_v50 = vpop.permute.xlu1 %1804 }
 0xeee   :  { %v1809_v49 = vsub.f32 %v3489_v52, %v1805_v50 }
 0xeef   :  { %1824 = vperm.xlu0 %3195, %v1808_v3  }
 0xef0   :  { %1829 = vperm.xlu1 %3193, %v1809_v49  }
 0xef3   :  { %3196 = vset.pattern.permute.xlu0 %v3365_v2 }
 0xef4   :  { %3194 = vset.pattern.permute.xlu1 %v3365_v2  ;;  %1839 = vperm.xlu0 %3196, %v4054_v12  }
 0xef5   :  { %1835 = vperm.xlu1 %3194, %v4060_v41  }
 0xef9   :  { %3197 = vset.pattern.permute.xlu1 %v3366_v20 }
 0xefa   :  { %2055 = vperm.xlu1 %3197, %v4060_v41  }
 0xefe   :  { %2059 = vperm.xlu1 %3197, %v4054_v12   ;;  %v1813_v33 = vpop.permute.xlu1 %1812 }
 0xeff   :  { %v1820_v56 = vmul.f32 %v1813_v33, %v4079_v26 }
 0xf02   :  { %v1818_v60 = vpop.permute.xlu1 %1817 }
 0xf03   :  { %v1821_v39 = vmul.f32 %v1818_v60, %v4076_v62 }
 0xf6e   :  { %v1825_v37 = vpop.permute.xlu0 %1824 }
 0xf6f   :  { %v1830_v31 = vpop.permute.xlu1 %1829  ;;  %v4101_v4 = vadd.f32 %v1825_v37, %v1820_v56 }
 0xf70   :  { %v4099_v36 = vadd.f32 %v1830_v31, %v1821_v39 }
 0xf73   :  { %v1840_v24 = vpop.permute.xlu0 %1839 }
 0xf74   :  { %v4104_v30 = vmul.f32 %v1840_v24, %v4099_v36  ;;  %v1836_v14 = vpop.permute.xlu1 %1835 }
 0xf75   :  { %v4107_v57 = vmul.f32 %v1836_v14, %v4101_v4 }
 0xf76   :  { %v1948_v48 = vand.u32 2147483647, %v4104_v30  ;;  %v1951_v58 = vand.u32 2139095040, %v4104_v30 }
 0xf77   :  { %v1847_v22 = vand.u32 2139095040, %v4107_v57  ;;  %v1844_v46 = vand.u32 2147483647, %v4107_v57 }
 0xf78   :  { %v1952_v35 = vshrl.u32 %v1951_v58, 23  ;;  %v1955_v7 = vand.u32 8388607, %v1948_v48 }
 0xf79   :  { %v1848_v53 = vshrl.u32 %v1847_v22, 23  ;;  %v1851_v15 = vand.u32 8388607, %v1844_v46 }
 0xf7a   :  { %v2662_v47 = vadd.s32 4294967169, %v1952_v35  ;;  %v1956_v28 = vor.u32 8388608, %v1955_v7 }
 0xf7b   :  { %v2658_v51 = vadd.s32 4294967169, %v1848_v53  ;;  %v1852_v11 = vor.u32 8388608, %v1851_v15 }
 0xf7c   :  { %v1958_v18 = vadd.s32 1, %v2662_v47  ;;  %v4117_v25 = vshll.u32 %v1956_v28, 8 }
 0xf7d   :  { %v1854_v13 = vadd.s32 1, %v2658_v51 }
 0xf7e   :  { %vm1959_vm3 = vcmp.gt.s32.totalorder %v1958_v18, 0 }
 0xf7f   :  { %v1960_v21 = vsel %vm1959_vm3, %v1958_v18, 0  ;;  %vm1855_vm4 = vcmp.gt.s32.totalorder %v1854_v13, 0 }
 0xf80   :  { %v1961_v5 = vshrl.u32 %v1960_v21, 5  ;;  %v1962_v43 = vand.u32 31, %v1960_v21  ;;  %v1856_v32 = vsel %vm1855_vm4, %v1854_v13, 0  ;;  %vm1950_vm4 = vcmp.lt.s32.totalorder %v4104_v30, 0 }
 0xf81   :  { %v4120_v27 = vshrl.u32 %v1856_v32, 5  ;;  %v1858_v23 = vand.u32 31, %v1856_v32 }
 0xf82   :  { %v1963_v8 = vsub.s32 32, %v1962_v43  ;;  %v1965_v59 = vshll.u32 %v3338_v34, %v1962_v43  ;;  %v1968_v19 = vshll.u32 %v3339_v38, %v1962_v43  ;;  %v1971_v10 = vshll.u32 %v3340_v40, %v1962_v43 }
 0xf83   :  { %v1974_v45 = vshll.u32 %v3341_v42, %v1962_v43  ;;  %v1977_v1 = vshll.u32 %v3342_v44, %v1962_v43  ;;  %vm1980_vm5 = vcmp.lt.s32.totalorder %v1961_v5, 1  ;;  %vm1981_vm6 = vcmp.lt.s32.totalorder %v1961_v5, 2 }
 0xf84   :  { %v1966_v61 = vshrl.u32 %v3339_v38, %v1963_v8  ;;  %v1969_v0 = vshrl.u32 %v3340_v40, %v1963_v8  ;;  %v1972_v17 = vshrl.u32 %v3341_v42, %v1963_v8  ;;  %v1964_v29 = vshrl.u32 %v3338_v34, %v1963_v8 }
 0xf85   :  { %v1975_v16 = vshrl.u32 %v3342_v44, %v1963_v8  ;;  %v1978_v3 = vshrl.u32 %v3343_v55, %v1963_v8  ;;  %v1859_v20 = vsub.s32 32, %v1858_v23  ;;  %vm1982_vm7 = vcmp.lt.s32.totalorder %v1961_v5, 3 }
 0xf86   :  { %v1967_v50 = vor.u32 %v1966_v61, %v1965_v59  ;;  %v1970_v49 = vor.u32 %v1969_v0, %v1968_v19  ;;  %v1973_v2 = vor.u32 %v1972_v17, %v1971_v10  ;;  %vm1983_vm8 = vcmp.lt.s32.totalorder %v1961_v5, 4 }
 0xf87   :  { %v1976_v33 = vor.u32 %v1975_v16, %v1974_v45  ;;  %v1979_v60 = vor.u32 %v1978_v3, %v1977_v1  ;;  %v1861_v22 = vshll.u32 %v3338_v34, %v1858_v23  ;;  %v1862_v53 = vshrl.u32 %v3339_v38, %v1859_v20 }
 0xf88   :  { %v1984_v37 = vsel %vm1980_vm5, %v1964_v29, %v1967_v50  ;;  %v1985_v31 = vsel %vm1983_vm8, %v1973_v2, 2102212464  ;;  %v1988_v39 = vsel %vm1980_vm5, %v1967_v50, %v1970_v49  ;;  %v1992_v56 = vsel %vm1980_vm5, %v1970_v49, %v1973_v2 }
 0xf89   :  { %v1986_v24 = vsel %vm1982_vm7, %v1970_v49, %v1985_v31  ;;  %v1989_v14 = vsel %vm1983_vm8, %v1976_v33, 920167782  ;;  %v1993_v58 = vsel %vm1983_vm8, %v1979_v60, 1326507024  ;;  %v1864_v47 = vshll.u32 %v3339_v38, %v1858_v23 }
 0xf8a   :  { %v1990_v35 = vsel %vm1982_vm7, %v1973_v2, %v1989_v14  ;;  %v1994_v7 = vsel %vm1982_vm7, %v1976_v33, %v1993_v58  ;;  %v1987_v51 = vsel %vm1981_vm6, %v1984_v37, %v1986_v24  ;;  %v1865_v15 = vshrl.u32 %v3340_v40, %v1859_v20 }
 0xf8b   :  { %v1991_v18 = vsel %vm1981_vm6, %v1988_v39, %v1990_v35  ;;  %v1995_v28 = vsel %vm1981_vm6, %v1992_v56, %v1994_v7  ;;  %v1863_v8 = vor.u32 %v1862_v53, %v1861_v22  ;;  %v1867_v19 = vshll.u32 %v3340_v40, %v1858_v23 }
 0xf8c   :  { %v4143_v13 = vmul.u32.u64.low %v4117_v25, %v1995_v28  ;;  %v4144_v21 = vmul.u32.u64.high %v4117_v25, %v1995_v28, %v4143_v13  ;;  %v4147_v43 = vmul.u32.u64.low %v4117_v25, %v1991_v18  ;;  %v4148_v32 = vmul.u32.u64.high %v4117_v25, %v1991_v18, %v4147_v43 }
 0xf8d   :  { %v1866_v59 = vor.u32 %v1865_v15, %v1864_v47  ;;  %v1868_v10 = vshrl.u32 %v3341_v42, %v1859_v20  ;;  %v1870_v45 = vshll.u32 %v3341_v42, %v1858_v23  ;;  %v1871_v5 = vshrl.u32 %v3342_v44, %v1859_v20 }
 0xf8e   :  { %v1874_v1 = vshrl.u32 %v3343_v55, %v1859_v20  ;;  %v1892_v61 = vshll.u32 %v1852_v11, 8  ;;  %v2003_v0 = vmul.u32 %v4117_v25, %v1987_v51  ;;  %v1860_v17 = vshrl.u32 %v3338_v34, %v1859_v20 }
 0xf8f   :  { %v1869_v29 = vor.u32 %v1868_v10, %v1867_v19  ;;  %v1873_v16 = vshll.u32 %v3342_v44, %v1858_v23  ;;  %vm2005_vm9 = vc.u32 %v4144_v21, %v4147_v43  ;;  %v2006_v3 = vadd.s32 1, %v4148_v32 }
 0xf90   :  { %v1872_v50 = vor.u32 %v1871_v5, %v1870_v45  ;;  %vm1876_vm11 = vcmp.lt.s32.totalorder %v4120_v27, 1  ;;  %vm1878_vm13 = vcmp.lt.s32.totalorder %v4120_v27, 3  ;;  %vm1879_vm15 = vcmp.lt.s32.totalorder %v4120_v27, 4 }
 0xf91   :  { %v1875_v49 = vor.u32 %v1874_v1, %v1873_v16  ;;  %v1884_v11 = vsel %vm1876_vm11, %v1863_v8, %v1866_v59  ;;  %v2007_v25 = vsel %vm2005_vm9, %v2006_v3, %v4148_v32  ;;  %v1881_v2 = vsel %vm1879_vm15, %v1869_v29, 2102212464 }
 0xf92   :  { %v1885_v20 = vsel %vm1879_vm15, %v1872_v50, 920167782  ;;  %v1888_v33 = vsel %vm1876_vm11, %v1866_v59, %v1869_v29  ;;  %v2008_v60 = vadd.s32 %v2007_v25, %v2003_v0  ;;  %vm1877_vm0 = vcmp.lt.s32.totalorder %v4120_v27, 2 }
 0xf93   :  { %v1886_v23 = vsel %vm1878_vm13, %v1869_v29, %v1885_v20  ;;  %v1889_v37 = vsel %vm1879_vm15, %v1875_v49, 1326507024  ;;  %v1880_v31 = vsel %vm1876_vm11, %v1860_v17, %v1863_v8  ;;  %v1882_v39 = vsel %vm1878_vm13, %v1866_v59, %v1881_v2 }
 0xf94   :  { %v1887_v56 = vsel %vm1877_vm0, %v1884_v11, %v1886_v23  ;;  %v1890_v24 = vsel %vm1878_vm13, %v1872_v50, %v1889_v37  ;;  %v2009_v14 = vadd.s32 536870912, %v2008_v60  ;;  %v1883_v51 = vsel %vm1877_vm0, %v1880_v31, %v1882_v39 }
 0xf95   :  { %v1891_v58 = vsel %vm1877_vm0, %v1888_v33, %v1890_v24  ;;  %v4165_v22 = vmul.u32.u64.low %v1892_v61, %v1887_v56  ;;  %v4166_v35 = vmul.u32.u64.high %v1892_v61, %v1887_v56, %v4165_v22  ;;  %v1899_v27 = vmul.u32 %v1892_v61, %v1883_v51 }
 0xf96   :  { %v4168_v7 = vmul.u32.u64.low %v1892_v61, %v1891_v58  ;;  %v4169_v53 = vmul.u32.u64.high %v1892_v61, %v1891_v58, %v4168_v7  ;;  %v2010_v47 = vshrl.u32 %v2009_v14, 30  ;;  %v2004_v16 = vadd.s32 %v4147_v43, %v4144_v21 }
 0xf97   :  { %v1902_v28 = vadd.s32 1, %v4166_v35  ;;  %vm1949_vm5 = vcmp.le.f32.partialorder %v1948_v48, 0.7853982  ;;  %vm1846_vm6 = vcmp.lt.s32.totalorder %v4107_v57, 0  ;;  %vm1845_vm7 = vcmp.le.f32.partialorder %v1844_v46, 0.7853982  ;;  %v2056_v46 = vpop.permute.xlu1 %2055 }
 0xf98   :  { %v2011_v18 = vshll.u32 %v2010_v47, 30  ;;  %vm1901_vm1 = vc.u32 %v4169_v53, %v4165_v22  ;;  %v1900_v56 = vadd.s32 %v4165_v22, %v4169_v53  ;;  %v2034_v43 = vsub.s32 4, %v2010_v47 }
 0xf99   :  { %v1903_v13 = vsel %vm1901_vm1, %v1902_v28, %v4166_v35  ;;  %vm2040_vm13 = vweird.f32 %v4104_v30 }
 0xf9a   :  { %v2012_v15 = vsub.s32 %v2008_v60, %v2011_v18  ;;  %v1904_v32 = vadd.s32 %v1903_v13, %v1899_v27 }
 0xf9c   :  { %v2014_v8 = vsub.s32 0, %v2012_v15  ;;  %v1905_v59 = vadd.s32 536870912, %v1904_v32 }
 0xf9e   :  { %v2663_v19 = vmin.u32 %v2014_v8, %v2012_v15  ;;  %v1906_v10 = vshrl.u32 %v1905_v59, 30 }
 0xfa0   :  { %v2016_v45 = vclz %v2663_v19  ;;  %v1907_v5 = vshll.u32 %v1906_v10, 30  ;;  %v1930_v19 = vsub.s32 4, %v1906_v10 }
 0xfa2   :  { %v2664_v1 = vadd.s32 4294967294, %v2016_v45  ;;  %v1908_v0 = vsub.s32 %v1904_v32, %v1907_v5  ;;  %v1931_v48 = vsel %vm1846_vm6, %v1930_v19, %v1906_v10 }
 0xfa4   :  { %vm2665_vm2 = vcmp.lt.s32.totalorder %v2664_v1, 0  ;;  %v1910_v29 = vsub.s32 0, %v1908_v0 }
 0xfa5   :  { %v2019_v17 = vsel %vm2665_vm2, 0, %v2664_v1  ;;  %vm1936_vm2 = vweird.f32 %v4107_v57 }
 0xfa6   :  { %v2020_v61 = vsub.s32 32, %v2019_v17  ;;  %v2024_v3 = vsub.s32 4294967266, %v2019_v17  ;;  %v2659_v50 = vmin.u32 %v1910_v29, %v1908_v0  ;;  %v2021_v49 = vshll.u32 %v2012_v15, %v2019_v17 }
 0xfa7   :  { %v2035_v15 = vsel %vm1950_vm4, %v2034_v43, %v2010_v47  ;;  %v1933_v29 = vsel %vm1845_vm7, 0, %v1931_v48 }
 0xfa8   :  { %v2022_v11 = vshrl.u32 %v2004_v16, %v2020_v61  ;;  %v2025_v25 = vadd.s32 127, %v2024_v3  ;;  %v1912_v2 = vclz %v2659_v50  ;;  %v2037_v8 = vsel %vm1949_vm5, 0, %v2035_v15 }
 0xfa9   :  { %v2041_v45 = vadd.s32 3, %v2037_v8  ;;  %v1937_v50 = vadd.s32 3, %v1933_v29 }
 0xfaa   :  { %v2023_v20 = vor.u32 %v2022_v11, %v2021_v49  ;;  %v2026_v33 = vshll.u32 %v2025_v25, 23  ;;  %v2660_v60 = vadd.s32 4294967294, %v1912_v2 }
 0xfab   :  { %v1938_v10 = vand.u32 3, %v1937_v50 }
 0xfac   :  { %v2027_v23 = vor.u32 4788187, %v2026_v33  ;;  %vm2661_vm3 = vcmp.lt.s32.totalorder %v2660_v60, 0  ;;  %v2030_v31 = vcvt.s32.f32 %v2023_v20 }
 0xfad   :  { %v1915_v39 = vsel %vm2661_vm3, 0, %v2660_v60  ;;  %vm1943_vm15 = vcmp.eq.s32.totalorder %v1938_v10, 2  ;;  %vm1940_vm0 = vcmp.eq.s32.totalorder %v1938_v10, 0  ;;  %vm1939_vm1 = vcmp.lt.s32.totalorder %v1938_v10, 2 }
 0xfae   :  { %v2028_v37 = vand.u32 2147483647, %v2027_v23  ;;  %v1916_v24 = vsub.s32 32, %v1915_v39  ;;  %v1920_v14 = vsub.s32 4294967266, %v1915_v39  ;;  %v1917_v58 = vshll.u32 %v1908_v0, %v1915_v39 }
 0xfaf   :  { %v2042_v0 = vand.u32 3, %v2041_v45  ;;  %vm123_vm3 = vcmp.ge.s32.totalorder %v3606_v9, 5 }
 0xfb0   :  { %v2031_v21 = vmul.f32 %v2030_v31, %v2028_v37  ;;  %v1918_v35 = vshrl.u32 %v1900_v56, %v1916_v24  ;;  %v1921_v7 = vadd.s32 127, %v1920_v14  ;;  %v2060_v56 = vpop.permute.xlu1 %2059 }
 0xfb1   :  { %vm2047_vm8 = vcmp.eq.s32.totalorder %v2042_v0, 2  ;;  %vm2044_vm9 = vcmp.eq.s32.totalorder %v2042_v0, 0  ;;  %vm2043_vm11 = vcmp.lt.s32.totalorder %v2042_v0, 2 }
 0xfb2   :  { %v2032_v51 = vxor.u32 2147483648, %v2031_v21  ;;  %v1919_v18 = vor.u32 %v1918_v35, %v1917_v58  ;;  %v1922_v28 = vshll.u32 %v1921_v7, 23 }
 0xfb4   :  { %v2033_v27 = vsel %vm1950_vm4, %v2032_v51, %v2031_v21  ;;  %v1923_v13 = vor.u32 4788187, %v1922_v28  ;;  %v1926_v32 = vcvt.s32.f32 %v1919_v18  ;;  %v2666_v18 = vld [vmem:[%s4370_s4 + $0x40] sm:$0xff]  ;;  %vm2994_vm4 = vmpackc.low %vm123_vm3, %vm123_vm3 }
 0xfb5   :  { %v2036_v22 = vsel %vm1949_vm5, %v4104_v30, %v2033_v27  ;;  %2879 = vmatprep.mubr.msk.f32.mxu1 %vm456_vm10, %v2666_v18  ;;  %vm122_vm5 = vcmp.lt.s32.totalorder %v3606_v9, 123 }
 0xfb6   :  { %3281 = vcosq.f32 %v2036_v22  ;;  %v1924_v53 = vand.u32 2147483647, %v1923_v13 }
 0xfb7   :  { %3283 = vsinq.f32 %v2036_v22 }
 0xfb8   :  { %v1927_v59 = vmul.f32 %v1926_v32, %v1924_v53  ;;  %v2667_v32 = vld [vmem:[%s4370_s4 + $0x48] sm:$0xff] }
 0xfba   :  { %v1928_v5 = vxor.u32 2147483648, %v1927_v59 }
 0xfbc   :  { %v1929_v1 = vsel %vm1846_vm6, %v1928_v5, %v1927_v59  ;;  %vm3004_vm6 = vmpackc.low %vm122_vm5, %vm122_vm5 }
 0xfbd   :  { %v1932_v47 = vsel %vm1845_vm7, %v4107_v57, %v1929_v1  ;;  %v3369_v57 = vmov 28  }
 0xfbe   :  { %3285 = vcosq.f32 %v1932_v47  ;;  %3209 = vset.pattern.permute.xlu1 %v3369_v57  ;;  %3208 = vset.pattern.permute.xlu0 %v3369_v57 }
 0xfbf   :  { %3287 = vsinq.f32 %v1932_v47  ;;  %v3370_v47 = vmov 10  }
 0xfc0   :  { %v3282_v17 = vpop.eup %3281 }
 0xfc1   :  { %v3284_v16 = vpop.eup %3283  ;;  %v2048_v61 = vxor.u32 2147483648, %v3282_v17 }
 0xfc2   :  { %v2045_v3 = vxor.u32 2147483648, %v3284_v16 }
 0xfc3   :  { %v2049_v49 = vsel %vm2047_vm8, %v2048_v61, %v3284_v16 }
 0xfc4   :  { %v2046_v11 = vsel %vm2044_vm9, %v3282_v17, %v2045_v3 }
 0xfc5   :  { %v2050_v25 = vsel %vm2043_vm11, %v2046_v11, %v2049_v49 }
 0xfc6   :  { %v2051_v2 = vsel %vm2040_vm13, nan, %v2050_v25 }
 0xfc7   :  { %v2053_v23 = vmul.f32 %v2051_v2, %v2051_v2 }
 0xfc8   :  { %v3286_v20 = vpop.eup %3285 }
 0xfc9   :  { %v3288_v33 = vpop.eup %3287  ;;  %v1944_v60 = vxor.u32 2147483648, %v3286_v20  ;;  %v2063_v14 = vmul.f32 %v2060_v56, %v2053_v23  ;;  %v3371_v23 = vmov 11  }
 0xfca   :  { %v1941_v37 = vxor.u32 2147483648, %v3288_v33 }
 0xfcb   :  { %v1945_v31 = vsel %vm1943_vm15, %v1944_v60, %v3288_v33  ;;  %v2065_v58 = vadd.f32 %v2063_v14, %v4099_v36 }
 0xfcc   :  { %v1942_v39 = vsel %vm1940_vm0, %v3286_v20, %v1941_v37 }
 0xfcd   :  { %v1946_v24 = vsel %vm1939_vm1, %v1942_v39, %v1945_v31 }
 0xfce   :  { %v1947_v21 = vsel %vm1936_vm2, nan, %v1946_v24 }
 0xfcf   :  { %v2052_v30 = vmul.f32 %v1947_v21, %v1947_v21  ;;  %v3372_v21 = vmov 22  }
 0xfd1   :  { %v2062_v43 = vmul.f32 %v2056_v46, %v2052_v30 }
 0xfd3   :  { %v2064_v35 = vadd.f32 %v2062_v43, %v4101_v4 }
 0xfd5   :  { %v3203_v7 = vpack.i.bf16 %v2065_v58, %v2064_v35  ;;  %v2999_v51 = vpack.c.bf16 %v2065_v58, %v2064_v35 }
 0xfd7   :  { %3204 = vrot.lane.b32.xlu1 %v3203_v7, %s3367_s16  ;;  %3199 = vrot.lane.b32.xlu0 %v3203_v7, %s3368_s17  ;;  %v3373_v7 = vmov 23  }
 0xfdb   :  { %2098 = vperm.xlu1 %3209, %v4054_v12   ;;  %2094 = vperm.xlu0 %3208, %v4060_v41  }
 0xfdf   :  { %3210 = vset.pattern.permute.xlu1 %v3370_v47  ;;  %3211 = vset.pattern.permute.xlu0 %v3371_v23 }
0x1049   :  { %v3200_v36 = vpop.permute.xlu0 %3199  ;;  %v3205_v27 = vpop.permute.xlu1 %3204 }
0x104a   :  { %v3202_v4 = vunpack.i.h.bf16 %v3200_v36  ;;  %v3201_v28 = vunpack.i.l.bf16 %v3200_v36  ;;  %v3207_v13 = vunpack.i.h.bf16 %v3205_v27  ;;  %v3206_v22 = vunpack.i.l.bf16 %v3205_v27 }
0x104c   :  { %v2993_v15 = vpack.c.bf16 %v3202_v4, %v3201_v28  ;;  %v3003_v53 = vpack.c.bf16 %v3207_v13, %v3206_v22 }
0x104e   :  { %2995 = vmatprep.subr.msk.bf16.mxu1 %vm2994_vm4, %v2993_v15 }
0x104f   :  { %2998 = vmatpush3.bf16.msk.msra.mxu1 %vm2994_vm4, %v2993_v15 }
0x1050   :  { %3000 = vmatprep.subr.bf16.mxu1 %v2999_v51 }
0x1053   :  { %3002 = vmatpush3.bf16.msra.mxu1 %v2999_v51 }
0x1054   :  { %3005 = vmatprep.subr.msk.bf16.mxu1 %vm3004_vm6, %v3003_v53 }
0x1057   :  { %3008 = vmatpush3.bf16.msk.msra.mxu1 %vm3004_vm6, %v3003_v53 }
0x105a   :  { %2880 = vmatmul.mubr.msk.f32.vlgmr.msra.gmra.mrb[6].mxu1 %vm456_vm10, %v2667_v32  ;;  %v2099_v8 = vpop.permute.xlu1 %2098  ;;  %v2095_v59 = vpop.permute.xlu0 %2094 }
0x112d   :  { %v2881_v19 = vpop.f32.mrb[6].mxu1 }
0x112e   :  { %v4200_v45 = vadd.f32 %v2881_v19, %v2099_v8  ;;  %v2173_v5 = vpop.f32.mrb[7].mxu1 }
0x112f   :  { %v2174_v9 = vadd.f32 %v2173_v5, %v2095_v59 }
0x1130   :  { %2184 = vadd.xlane.f32.xlu0 %v4200_v45  ;;  %v2187_v48 = vmul.f32 %v4200_v45, %v4200_v45 }
0x1131   :  { %2182 = vadd.xlane.f32.xlu1 %v2174_v9  ;;  %v2186_v1 = vmul.f32 %v2174_v9, %v2174_v9 }
0x1134   :  { %2188 = vadd.xlane.f32.xlu0 %v2186_v1 }
0x1138   :  { %2190 = vadd.xlane.f32.xlu0 %v2187_v48 }
0x11bd   :  { %v2185_v0 = vpop.xlane.xlu0 %2184 }
0x11be   :  { %v2183_v17 = vpop.xlane.xlu1 %2182  ;;  %v2193_v3 = vmul.f32 0.0078125, %v2185_v0 }
0x11bf   :  { %v2192_v29 = vmul.f32 0.0078125, %v2183_v17 }
0x11c0   :  { %v2197_v25 = vmul.f32 %v2193_v3, %v2193_v3 }
0x11c1   :  { %v2196_v16 = vmul.f32 %v2192_v29, %v2192_v29  ;;  %v2189_v61 = vpop.xlane.xlu0 %2188 }
0x11c2   :  { %v2194_v50 = vmul.f32 0.0078125, %v2189_v61 }
0x11c4   :  { %v2198_v49 = vsub.f32 %v2194_v50, %v2196_v16 }
0x11c5   :  { %v2191_v11 = vpop.xlane.xlu0 %2190 }
0x11c6   :  { %v2200_v46 = vmax.f32 %v2198_v49, 0.0  ;;  %v2195_v10 = vmul.f32 0.0078125, %v2191_v11 }
0x11c8   :  { %v2202_v2 = vadd.f32 1e-05, %v2200_v46  ;;  %v2199_v20 = vsub.f32 %v2195_v10, %v2197_v25 }
0x11ca   :  { %3289 = vrsqrt.f32 %v2202_v2  ;;  %v2201_v33 = vmax.f32 %v2199_v20, 0.0 }
0x11cc   :  { %v2203_v60 = vadd.f32 1e-05, %v2201_v33 }
0x11ce   :  { %3291 = vrsqrt.f32 %v2203_v60 }
0x11d4   :  { %v3290_v37 = vpop.eup %3289 }
0x11d5   :  { %v2206_v31 = vmul.f32 %v3290_v37, %v3492_v54 }
0x11d7   :  { %v2208_v39 = vmul.f32 %v2206_v31, %v2192_v29 }
0x11d8   :  { %v3292_v56 = vpop.eup %3291 }
0x11d9   :  { %2212 = vrot.lane.b32.xlu1 %v2208_v39, %s3335_s10  ;;  %v2207_v24 = vmul.f32 %v3292_v56, %v3489_v52 }
0x11db   :  { %v2209_v14 = vmul.f32 %v2207_v24, %v2193_v3 }
0x11dd   :  { %2222 = vperm.xlu1 %3210, %v2206_v31   ;;  %2214 = vrot.lane.b32.xlu0 %v2209_v14, %s3335_s10 }
0x11e1   :  { %2227 = vperm.xlu1 %3210, %v2207_v24  }
0x11e5   :  { %3212 = vset.pattern.permute.xlu1 %v3372_v21 }
0x11e6   :  { %2245 = vperm.xlu1 %3212, %v4060_v41  }
0x11ea   :  { %3213 = vset.pattern.permute.xlu1 %v3371_v23 }
0x124b   :  { %v2213_v30 = vpop.permute.xlu1 %2212 }
0x124c   :  { %v2218_v43 = vsub.f32 %v3492_v54, %v2213_v30 }
0x124e   :  { %2234 = vperm.xlu1 %3213, %v2218_v43  }
0x124f   :  { %v2215_v58 = vpop.permute.xlu0 %2214 }
0x1250   :  { %v2219_v35 = vsub.f32 %v3489_v52, %v2215_v58 }
0x1252   :  { %2239 = vperm.xlu0 %3211, %v2219_v35   ;;  %3214 = vset.pattern.permute.xlu1 %v3372_v21 }
0x1253   :  { %2249 = vperm.xlu1 %3214, %v4054_v12  }
0x1256   :  { %3215 = vset.pattern.permute.xlu0 %v3373_v7 }
0x1257   :  { %2465 = vperm.xlu0 %3215, %v4060_v41   ;;  %3216 = vset.pattern.permute.xlu1 %v3373_v7 }
0x1258   :  { %2469 = vperm.xlu1 %3216, %v4054_v12  }
0x125c   :  { %v2223_v51 = vpop.permute.xlu1 %2222 }
0x125d   :  { %v2230_v36 = vmul.f32 %v2223_v51, %v2174_v9 }
0x1260   :  { %v2228_v18 = vpop.permute.xlu1 %2227 }
0x1261   :  { %v2231_v52 = vmul.f32 %v2228_v18, %v4200_v45 }
0x1265   :  { %v2246_v57 = vpop.permute.xlu1 %2245 }
0x12cd   :  { %v2235_v54 = vpop.permute.xlu1 %2234 }
0x12ce   :  { %v4215_v4 = vadd.f32 %v2235_v54, %v2230_v36 }
0x12d0   :  { %v4219_v28 = vmul.f32 %v2246_v57, %v4215_v4 }
0x12d1   :  { %v2240_v27 = vpop.permute.xlu0 %2239 }
0x12d2   :  { %v2257_v15 = vand.u32 2139095040, %v4219_v28  ;;  %v4222_v13 = vadd.f32 %v2240_v27, %v2231_v52  ;;  %v2250_v41 = vpop.permute.xlu1 %2249  ;;  %v2254_v59 = vand.u32 2147483647, %v4219_v28 }
0x12d4   :  { %v2258_v22 = vshrl.u32 %v2257_v15, 23  ;;  %v4225_v12 = vmul.f32 %v2250_v41, %v4222_v13  ;;  %v4234_v1 = vand.u32 8388607, %v2254_v59 }
0x12d6   :  { %v2670_v53 = vadd.s32 4294967169, %v2258_v22  ;;  %v2358_v32 = vand.u32 2147483647, %v4225_v12  ;;  %v2361_v8 = vand.u32 2139095040, %v4225_v12  ;;  %v2262_v61 = vor.u32 8388608, %v4234_v1 }
0x12d8   :  { %v2264_v19 = vadd.s32 1, %v2670_v53  ;;  %v2362_v45 = vshrl.u32 %v2361_v8, 23  ;;  %v2365_v5 = vand.u32 8388607, %v2358_v32 }
0x12da   :  { %vm2265_vm7 = vcmp.gt.s32.totalorder %v2264_v19, 0  ;;  %v2674_v9 = vadd.s32 4294967169, %v2362_v45  ;;  %v2366_v47 = vor.u32 8388608, %v2365_v5 }
0x12db   :  { %v2266_v48 = vsel %vm2265_vm7, %v2264_v19, 0 }
0x12dc   :  { %v4236_v0 = vshrl.u32 %v2266_v48, 5  ;;  %v2268_v17 = vand.u32 31, %v2266_v48  ;;  %v2368_v29 = vadd.s32 1, %v2674_v9  ;;  %v4241_v49 = vshll.u32 %v2366_v47, 8 }
0x12de   :  { %v2269_v16 = vsub.s32 32, %v2268_v17  ;;  %v2280_v3 = vshll.u32 %v3341_v42, %v2268_v17  ;;  %v2283_v50 = vshll.u32 %v3342_v44, %v2268_v17  ;;  %vm2369_vm8 = vcmp.gt.s32.totalorder %v2368_v29, 0 }
0x12df   :  { %vm2289_vm9 = vcmp.lt.s32.totalorder %v4236_v0, 4  ;;  %v2370_v46 = vsel %vm2369_vm8, %v2368_v29, 0  ;;  %v2271_v2 = vshll.u32 %v3338_v34, %v2268_v17  ;;  %v2274_v20 = vshll.u32 %v3339_v38, %v2268_v17 }
0x12e0   :  { %v2281_v11 = vshrl.u32 %v3342_v44, %v2269_v16  ;;  %v2284_v25 = vshrl.u32 %v3343_v55, %v2269_v16  ;;  %v2372_v10 = vand.u32 31, %v2370_v46  ;;  %v2277_v33 = vshll.u32 %v3340_v40, %v2268_v17 }
0x12e1   :  { %v2371_v23 = vshrl.u32 %v2370_v46, 5  ;;  %v2272_v37 = vshrl.u32 %v3339_v38, %v2269_v16  ;;  %v2275_v31 = vshrl.u32 %v3340_v40, %v2269_v16  ;;  %v2278_v14 = vshrl.u32 %v3341_v42, %v2269_v16 }
0x12e2   :  { %v2282_v60 = vor.u32 %v2281_v11, %v2280_v3  ;;  %v2285_v39 = vor.u32 %v2284_v25, %v2283_v50  ;;  %v2373_v56 = vsub.s32 32, %v2372_v10  ;;  %v2375_v24 = vshll.u32 %v3338_v34, %v2372_v10 }
0x12e3   :  { %v2378_v30 = vshll.u32 %v3339_v38, %v2372_v10  ;;  %v2381_v43 = vshll.u32 %v3340_v40, %v2372_v10  ;;  %v2384_v58 = vshll.u32 %v3341_v42, %v2372_v10  ;;  %v2387_v18 = vshll.u32 %v3342_v44, %v2372_v10 }
0x12e4   :  { %v2295_v21 = vsel %vm2289_vm9, %v2282_v60, 920167782  ;;  %v2376_v35 = vshrl.u32 %v3339_v38, %v2373_v56  ;;  %v2379_v7 = vshrl.u32 %v3340_v40, %v2373_v56  ;;  %v2382_v51 = vshrl.u32 %v3341_v42, %v2373_v56 }
0x12e5   :  { %vm2286_vm11 = vcmp.lt.s32.totalorder %v4236_v0, 1  ;;  %v2374_v57 = vshrl.u32 %v3338_v34, %v2373_v56  ;;  %v2385_v36 = vshrl.u32 %v3342_v44, %v2373_v56  ;;  %v2388_v54 = vshrl.u32 %v3343_v55, %v2373_v56 }
0x12e6   :  { %vm2390_vm13 = vcmp.lt.s32.totalorder %v2371_v23, 1  ;;  %v2377_v52 = vor.u32 %v2376_v35, %v2375_v24  ;;  %v2380_v27 = vor.u32 %v2379_v7, %v2378_v30  ;;  %v2383_v15 = vor.u32 %v2382_v51, %v2381_v43 }
0x12e7   :  { %vm2392_vm15 = vcmp.lt.s32.totalorder %v2371_v23, 3  ;;  %v2386_v38 = vor.u32 %v2385_v36, %v2384_v58  ;;  %v2389_v41 = vor.u32 %v2388_v54, %v2387_v18  ;;  %vm2393_vm0 = vcmp.lt.s32.totalorder %v2371_v23, 4 }
0x12e8   :  { %v2273_v40 = vor.u32 %v2272_v37, %v2271_v2  ;;  %v2394_v42 = vsel %vm2390_vm13, %v2374_v57, %v2377_v52  ;;  %v2395_v22 = vsel %vm2393_vm0, %v2383_v15, 2102212464  ;;  %v2398_v53 = vsel %vm2390_vm13, %v2377_v52, %v2380_v27 }
0x12e9   :  { %v2402_v8 = vsel %vm2390_vm13, %v2380_v27, %v2383_v15  ;;  %v2396_v19 = vsel %vm2392_vm15, %v2380_v27, %v2395_v22  ;;  %v2399_v45 = vsel %vm2393_vm0, %v2386_v38, 920167782  ;;  %v2403_v5 = vsel %vm2393_vm0, %v2389_v41, 1326507024 }
0x12ea   :  { %v2276_v9 = vor.u32 %v2275_v31, %v2274_v20  ;;  %vm2391_vm1 = vcmp.lt.s32.totalorder %v2371_v23, 2  ;;  %v2400_v44 = vsel %vm2392_vm15, %v2383_v15, %v2399_v45  ;;  %v2404_v55 = vsel %vm2392_vm15, %v2386_v38, %v2403_v5 }
0x12eb   :  { %v2279_v48 = vor.u32 %v2278_v14, %v2277_v33  ;;  %v2299_v47 = vsel %vm2289_vm9, %v2285_v39, 1326507024  ;;  %v2397_v17 = vsel %vm2391_vm1, %v2394_v42, %v2396_v19  ;;  %v2401_v29 = vsel %vm2391_vm1, %v2398_v53, %v2400_v44 }
0x12ec   :  { %v2405_v3 = vsel %vm2391_vm1, %v2402_v8, %v2404_v55  ;;  %v4273_v25 = vmul.u32.u64.low %v4241_v49, %v2401_v29  ;;  %v4274_v46 = vmul.u32.u64.high %v4241_v49, %v2401_v29, %v4273_v25  ;;  %v2270_v10 = vshrl.u32 %v3338_v34, %v2269_v16 }
0x12ed   :  { %v4269_v50 = vmul.u32.u64.low %v4241_v49, %v2405_v3  ;;  %v4270_v11 = vmul.u32.u64.high %v4241_v49, %v2405_v3, %v4269_v50  ;;  %vm2288_vm2 = vcmp.lt.s32.totalorder %v4236_v0, 3  ;;  %v2291_v2 = vsel %vm2289_vm9, %v2279_v48, 2102212464 }
0x12ee   :  { %v2294_v20 = vsel %vm2286_vm11, %v2273_v40, %v2276_v9  ;;  %vm2287_vm3 = vcmp.lt.s32.totalorder %v4236_v0, 2  ;;  %v2296_v33 = vsel %vm2288_vm2, %v2279_v48, %v2295_v21  ;;  %v2298_v23 = vsel %vm2286_vm11, %v2276_v9, %v2279_v48 }
0x12ef   :  { %v2300_v37 = vsel %vm2288_vm2, %v2282_v60, %v2299_v47  ;;  %v2413_v34 = vmul.u32 %v4241_v49, %v2397_v17  ;;  %v2297_v16 = vsel %vm2287_vm3, %v2294_v20, %v2296_v33  ;;  %v2302_v39 = vshll.u32 %v2262_v61, 8 }
0x12f0   :  { %v2301_v31 = vsel %vm2287_vm3, %v2298_v23, %v2300_v37  ;;  %vm2415_vm4 = vc.u32 %v4270_v11, %v4273_v25  ;;  %v2416_v56 = vadd.s32 1, %v4274_v46  ;;  %v2290_v24 = vsel %vm2286_vm11, %v2270_v10, %v2273_v40 }
0x12f1   :  { %v2292_v60 = vsel %vm2288_vm2, %v2276_v9, %v2291_v2  ;;  %v4302_v49 = vmul.u32.u64.low %v2302_v39, %v2301_v31  ;;  %v4303_v14 = vmul.u32.u64.high %v2302_v39, %v2301_v31, %v4302_v49  ;;  %v2414_v45 = vadd.s32 %v4273_v25, %v4270_v11 }
0x12f2   :  { %v4305_v21 = vmul.u32.u64.low %v2302_v39, %v2297_v16  ;;  %v4306_v30 = vmul.u32.u64.high %v2302_v39, %v2297_v16, %v4305_v21  ;;  %v2417_v43 = vsel %vm2415_vm4, %v2416_v56, %v4274_v46  ;;  %v2293_v61 = vsel %vm2287_vm3, %v2290_v24, %v2292_v60 }
0x12f3   :  { %v2418_v1 = vadd.s32 %v2417_v43, %v2413_v34  ;;  %v2309_v7 = vmul.u32 %v2302_v39, %v2293_v61  ;;  %vm2360_vm8 = vcmp.lt.s32.totalorder %v4225_v12, 0  ;;  %vm2359_vm9 = vcmp.le.f32.partialorder %v2358_v32, 0.7853982 }
0x12f4   :  { %vm2311_vm5 = vc.u32 %v4303_v14, %v4305_v21  ;;  %v2312_v35 = vadd.s32 1, %v4306_v30  ;;  %v2310_v50 = vadd.s32 %v4305_v21, %v4303_v14  ;;  %vm2256_vm11 = vcmp.lt.s32.totalorder %v4219_v28, 0 }
0x12f5   :  { %v2419_v58 = vadd.s32 536870912, %v2418_v1  ;;  %vm2255_vm13 = vcmp.le.f32.partialorder %v2254_v59, 0.7853982  ;;  %vm2450_vm2 = vweird.f32 %v4225_v12 }
0x12f6   :  { %v2313_v18 = vsel %vm2311_vm5, %v2312_v35, %v4306_v30 }
0x12f7   :  { %v2420_v51 = vshrl.u32 %v2419_v58, 30  ;;  %v2314_v57 = vadd.s32 %v2313_v18, %v2309_v7 }
0x12f9   :  { %v2421_v36 = vshll.u32 %v2420_v51, 30  ;;  %v2315_v54 = vadd.s32 536870912, %v2314_v57  ;;  %v2444_v31 = vsub.s32 4, %v2420_v51 }
0x12fb   :  { %v2422_v52 = vsub.s32 %v2418_v1, %v2421_v36  ;;  %v2316_v27 = vshrl.u32 %v2315_v54, 30  ;;  %v2445_v14 = vsel %vm2360_vm8, %v2444_v31, %v2420_v51 }
0x12fc   :  { %v2447_v61 = vsel %vm2359_vm9, 0, %v2445_v14 }
0x12fd   :  { %v2424_v15 = vsub.s32 0, %v2422_v52  ;;  %v2317_v38 = vshll.u32 %v2316_v27, 30  ;;  %v2340_v30 = vsub.s32 4, %v2316_v27  ;;  %v2451_v18 = vadd.s32 3, %v2447_v61 }
0x12ff   :  { %v2675_v41 = vmin.u32 %v2424_v15, %v2422_v52  ;;  %v2318_v40 = vsub.s32 %v2314_v57, %v2317_v38  ;;  %v2341_v35 = vsel %vm2256_vm11, %v2340_v30, %v2316_v27  ;;  %v2452_v51 = vand.u32 3, %v2451_v18 }
0x1300   :  { %v2343_v32 = vsel %vm2255_vm13, 0, %v2341_v35 }
0x1301   :  { %v2426_v0 = vclz %v2675_v41  ;;  %v2320_v42 = vsub.s32 0, %v2318_v40  ;;  %v2347_v57 = vadd.s32 3, %v2343_v32  ;;  %vm2457_vm15 = vcmp.eq.s32.totalorder %v2452_v51, 2 }
0x1302   :  { %vm2454_vm0 = vcmp.eq.s32.totalorder %v2452_v51, 0  ;;  %vm2453_vm1 = vcmp.lt.s32.totalorder %v2452_v51, 2 }
0x1303   :  { %v2676_v22 = vadd.s32 4294967294, %v2426_v0  ;;  %v2671_v53 = vmin.u32 %v2320_v42, %v2318_v40  ;;  %v2348_v38 = vand.u32 3, %v2347_v57 }
0x1305   :  { %vm2677_vm6 = vcmp.lt.s32.totalorder %v2676_v22, 0  ;;  %v2322_v19 = vclz %v2671_v53  ;;  %vm2353_vm3 = vcmp.eq.s32.totalorder %v2348_v38, 2  ;;  %vm2350_vm4 = vcmp.eq.s32.totalorder %v2348_v38, 0 }
0x1306   :  { %v2429_v8 = vsel %vm2677_vm6, 0, %v2676_v22  ;;  %vm2349_vm5 = vcmp.lt.s32.totalorder %v2348_v38, 2  ;;  %vm2346_vm6 = vweird.f32 %v4219_v28 }
0x1307   :  { %v2430_v5 = vsub.s32 32, %v2429_v8  ;;  %v2434_v9 = vsub.s32 4294967266, %v2429_v8  ;;  %v2672_v44 = vadd.s32 4294967294, %v2322_v19  ;;  %v2431_v55 = vshll.u32 %v2422_v52, %v2429_v8  ;;  %v2470_v8 = vpop.permute.xlu1 %2469 }
0x1309   :  { %v2432_v48 = vshrl.u32 %v2414_v45, %v2430_v5  ;;  %v2435_v47 = vadd.s32 127, %v2434_v9  ;;  %vm2673_vm7 = vcmp.lt.s32.totalorder %v2672_v44, 0 }
0x130a   :  { %v2325_v3 = vsel %vm2673_vm7, 0, %v2672_v44 }
0x130b   :  { %v2433_v17 = vor.u32 %v2432_v48, %v2431_v55  ;;  %v2436_v29 = vshll.u32 %v2435_v47, 23  ;;  %v2326_v46 = vsub.s32 32, %v2325_v3  ;;  %v2330_v10 = vsub.s32 4294967266, %v2325_v3  ;;  %v2466_v48 = vpop.permute.xlu0 %2465 }
0x130c   :  { %v2327_v20 = vshll.u32 %v2318_v40, %v2325_v3 }
0x130d   :  { %v2437_v2 = vor.u32 4788187, %v2436_v29  ;;  %v2328_v33 = vshrl.u32 %v2310_v50, %v2326_v46  ;;  %v2331_v23 = vadd.s32 127, %v2330_v10  ;;  %v2440_v11 = vcvt.s32.f32 %v2433_v17 }
0x130e   :  { %v3374_v46 = vmov 29  }
0x130f   :  { %v2438_v37 = vand.u32 2147483647, %v2437_v2  ;;  %v2329_v25 = vor.u32 %v2328_v33, %v2327_v20  ;;  %v2332_v34 = vshll.u32 %v2331_v23, 23  ;;  %3228 = vset.pattern.permute.xlu0 %v3374_v46  ;;  %3227 = vset.pattern.permute.xlu1 %v3374_v46 }
0x1311   :  { %v2441_v16 = vmul.f32 %v2440_v11, %v2438_v37  ;;  %v2333_v39 = vor.u32 4788187, %v2332_v34  ;;  %v2336_v60 = vcvt.s32.f32 %v2329_v25  ;;  %v2679_v34 = vld [vmem:[%s4370_s4 + $0x58] sm:$0xff] }
0x1313   :  { %v2442_v56 = vxor.u32 2147483648, %v2441_v16  ;;  %v2334_v24 = vand.u32 2147483647, %v2333_v39 }
0x1315   :  { %v2443_v49 = vsel %vm2360_vm8, %v2442_v56, %v2441_v16  ;;  %v2337_v21 = vmul.f32 %v2336_v60, %v2334_v24 }
0x1316   :  { %v2446_v43 = vsel %vm2359_vm9, %v4225_v12, %v2443_v49 }
0x1317   :  { %3293 = vcosq.f32 %v2446_v43  ;;  %v2338_v1 = vxor.u32 2147483648, %v2337_v21 }
0x1318   :  { %3295 = vsinq.f32 %v2446_v43 }
0x1319   :  { %v2339_v58 = vsel %vm2256_vm11, %v2338_v1, %v2337_v21 }
0x131a   :  { %v2342_v7 = vsel %vm2255_vm13, %v4219_v28, %v2339_v58  ;;  %v2678_v28 = vld [vmem:[%s4370_s4 + $0x50] sm:$0xff] }
0x131b   :  { %3297 = vcosq.f32 %v2342_v7  ;;  %2894 = vmatprep.mubr.msk.f32.mxu0 %vm456_vm10, %v2678_v28 }
0x131c   :  { %3299 = vsinq.f32 %v2342_v7 }
0x1321   :  { %v3294_v36 = vpop.eup %3293 }
0x1322   :  { %v3296_v54 = vpop.eup %3295  ;;  %v2458_v52 = vxor.u32 2147483648, %v3294_v36 }
0x1323   :  { %v2455_v15 = vxor.u32 2147483648, %v3296_v54 }
0x1324   :  { %v2459_v41 = vsel %vm2457_vm15, %v2458_v52, %v3296_v54 }
0x1325   :  { %v2456_v59 = vsel %vm2454_vm0, %v3294_v36, %v2455_v15  ;;  %v3298_v40 = vpop.eup %3297 }
0x1326   :  { %v2460_v27 = vsel %vm2453_vm1, %v2456_v59, %v2459_v41  ;;  %v3300_v0 = vpop.eup %3299  ;;  %v2354_v42 = vxor.u32 2147483648, %v3298_v40 }
0x1327   :  { %v2461_v22 = vsel %vm2450_vm2, nan, %v2460_v27  ;;  %v2351_v53 = vxor.u32 2147483648, %v3300_v0 }
0x1328   :  { %v2463_v19 = vmul.f32 %v2461_v22, %v2461_v22  ;;  %v2355_v45 = vsel %vm2353_vm3, %v2354_v42, %v3300_v0 }
0x1329   :  { %v2352_v5 = vsel %vm2350_vm4, %v3298_v40, %v2351_v53 }
0x132a   :  { %v2356_v9 = vsel %vm2349_vm5, %v2352_v5, %v2355_v45  ;;  %v2473_v44 = vmul.f32 %v2470_v8, %v2463_v19 }
0x132b   :  { %v2357_v55 = vsel %vm2346_vm6, nan, %v2356_v9 }
0x132c   :  { %v2462_v47 = vmul.f32 %v2357_v55, %v2357_v55  ;;  %v2475_v17 = vadd.f32 %v2473_v44, %v4222_v13  ;;  %v3307_v13 = vld [vmem:[%s4369_s3 + $0x8] sm:$0xff] }
0x132e   :  { %v2472_v12 = vmul.f32 %v2466_v48, %v2462_v47 }
0x1330   :  { %v2474_v29 = vadd.f32 %v2472_v12, %v4215_v4  ;;  %v3308_v4 = vld [vmem:[%s4369_s3] sm:$0xff] }
0x1332   :  { %v3217_v3 = vpack.i.bf16 %v2475_v17, %v2474_v29  ;;  %v3015_v50 = vpack.c.bf16 %v2475_v17, %v2474_v29 }
0x1334   :  { %3223 = vrot.lane.b32.xlu0 %v3217_v3, %s3344_s11  ;;  %3218 = vrot.lane.b32.xlu1 %v3217_v3, %s3335_s10  ;;  %s3375_s11 = smov [#allocation3]  }
0x1335   :  { %s2601_s0 = sshll.u32 %s3375_s11, 4  ;;  %s2602_s0 = int_to_ptr.vmem [resolvable:$true] %s2601_s0 }
0x1336   :  { %s3309_s28 = scalar_lea.vmem %s2602_s0, 256  ;;  %p3314_p1 = scmp.lt.s32.totalorder %s2602_s0, %s2602_s0 }
0x1337   :  { %p3310_p0 = scmp.ne.s32.totalorder %s2602_s0, %s3309_s28  ;;  %p3315_p2 = scmp.lt.s32.totalorder %s3309_s28, %s3309_s28 }
0x1338   :  { %2508 = vperm.xlu0 %3228, %v3307_v13   ;;  %2504 = vperm.xlu1 %3227, %v3308_v4  }
0x1339   :  { %p3316_p3 = por %p3315_p2, %p3314_p1 }
0x133b   :  { %p3317_p4 = pnand %p3316_p3, %p3310_p0 }
0x13a6   :  { %v3219_v10 = vpop.permute.xlu1 %3218  ;;  %v3224_v33 = vpop.permute.xlu0 %3223 }
0x13a7   :  { %v3221_v2 = vunpack.i.h.bf16 %v3219_v10  ;;  %v3220_v20 = vunpack.i.l.bf16 %v3219_v10  ;;  %v3226_v37 = vunpack.i.h.bf16 %v3224_v33  ;;  %v3225_v11 = vunpack.i.l.bf16 %v3224_v33 }
0x13a9   :  { %v3009_v23 = vpack.c.bf16 %v3221_v2, %v3220_v20  ;;  %v3019_v25 = vpack.c.bf16 %v3226_v37, %v3225_v11 }
0x13ab   :  { %3011 = vmatprep.subr.msk.bf16.mxu0 %vm3609_vm12, %v3009_v23 }
0x13ac   :  { %3014 = vmatpush3.bf16.msk.msra.mxu0 %vm3609_vm12, %v3009_v23 }
0x13ad   :  { %3016 = vmatprep.subr.bf16.mxu0 %v3015_v50 }
0x13b0   :  { %3018 = vmatpush3.bf16.msra.mxu0 %v3015_v50 }
0x13b1   :  { %3021 = vmatprep.subr.msk.bf16.mxu0 %vm3618_vm14, %v3019_v25 }
0x13b4   :  { %3024 = vmatpush3.bf16.msk.msra.mxu0 %vm3618_vm14, %v3019_v25 }
0x13b7   :  { %2895 = vmatmul.mubr.msk.f32.vlgmr.msra.gmra.mrb[4].mxu0 %vm456_vm10, %v2679_v34  ;;  %v2509_v16 = vpop.permute.xlu0 %2508  ;;  %v2505_v31 = vpop.permute.xlu1 %2504 }
0x148a   :  { %v2896_v39 = vpop.f32.mrb[4].mxu0 }
0x148b   :  { %v2589_v63 = vadd.f32 %v2896_v39, %v2509_v16  ;;  %v2583_v56 = vpop.f32.mrb[5].mxu0 }
0x148c   :  { %v2584_v24 = vadd.f32 %v2583_v56, %v2505_v31 }
0x148d   :  { %v2593_v60 = vadd.f32 %v2589_v63, %v4076_v62 }
0x148e   :  { %v2592_v49 = vadd.f32 %v2584_v24, %v4079_v26 }
0x148f   :  { %2595 = vst [vmem:[#allocation3 + $0x8] sm:$0xff] %v2593_v60 }
0x1490   :  { %2594 = vst [vmem:[#allocation3] sm:$0xff] %v2592_v49 }
0x1491   :  { %3320 = shalt.err (!%p3317_p4)
}
0x1492   :  { %s3321_s30 = scalar_lea.hbm %s4371_s5, 256 }
0x1493   :  { %p3322_p5 = scmp.ne.s32.totalorder %s4371_s5, %s3321_s30  ;;  %p3325_p6 = scmp.lt.u32.totalorder %s3321_s30, %s4371_s5 }
0x1495   :  { %p3327_p7 = pnand %p3325_p6, %p3322_p5 }
0x1497   :  { %3330 = shalt.err (!%p3327_p7)
}
0x1498   :  { %s3376_s8 = smov 128   ;;  %s3377_s9 = smov 8  }
0x1499   :  { %2607 = dma.vmem_to_hbm [thread:$0]  %s2602_s0, 256, %s4371_s5, [#allocation4], %s3376_s8, %s3376_s8, %s3377_s9  }
0x149a   :  { %3331 = dma.done.wait [#allocation4], 256  }
0x149b   :  { %3332 = vsyncadd [#allocation4], 4294967040 }
0x149c   :  { %2611 = vsyncpa [#allocation4], 1 }

</bundles_post_ra>
